<compile_context>
chip_gen: v5e
topology: v5e:2x2
jax: 0.10.0
libtpu: 0.0.40
codegen_flags: <defaults>
</compile_context>

<pallas_src>
import jax
import jax.numpy as jnp
from jax import lax
from jax.experimental import pallas as pl
from jax.experimental.pallas import tpu as pltpu


# ----------------------------------------------------------------------------
# Pallas kernel: full G_LSTM sequence + fused crop_seq reduction (one invocation)
# ----------------------------------------------------------------------------
def glstm_seq_kernel(x_ref, wx_ref, wh_ref, wc_ref, wco_ref, b_ref, mask_ref,
                     out_ref, gx_sc):
    B, seq_len = mask_ref.shape
    H = wco_ref.shape[0]

    # Hoisted input projection + bias fold: ONE (seq*B, IN) @ (IN, 4H) bf16 MXU matmul
    # accumulated in f32, bias broadcast-added once (off the serial recurrence).
    # Gate order along the 4H axis: [input, forget, output, memory].
    gx_sc[...] = (jnp.dot(x_ref[...], wx_ref[...],
                          preferred_element_type=jnp.float32)
                  + b_ref[...])                              # (seq*B, 4H) f32

    wh = wh_ref[...]                  # (H, 4H)  bf16  recurrent h -> all gates
    wc = wc_ref[...]                  # (H, 2H)  bf16  cell -> [i, f] gates only
    wco = wco_ref[...]                # (H, H)   bf16  cell -> o gate

    h = jnp.zeros((B, H), jnp.float32)
    c = jnp.zeros((B, H), jnp.float32)
    out = jnp.zeros((B, H), jnp.float32)

    # Trace-time unrolled recurrence (seq_len is small and static).
    for t in range(seq_len):
        gx = gx_sc[t * B:(t + 1) * B, :]                     # (B, 4H) static slice
        rec = jnp.dot(h.astype(jnp.bfloat16), wh,
                      preferred_element_type=jnp.float32)    # (B, 4H)
        cif = jnp.dot(c.astype(jnp.bfloat16), wc,
                      preferred_element_type=jnp.float32)    # (B, 2H)
        pre = gx + rec                                       # (B, 4H) f32

        i_g = jax.nn.sigmoid(pre[:, 0 * H:1 * H] + cif[:, 0 * H:1 * H])
        f_g = jax.nn.sigmoid(pre[:, 1 * H:2 * H] + cif[:, 1 * H:2 * H])
        g_g = jnp.tanh(pre[:, 3 * H:4 * H])
        next_c = f_g * c + i_g * g_g
        o_g = jax.nn.sigmoid(
            pre[:, 2 * H:3 * H]
            + jnp.dot(next_c.astype(jnp.bfloat16), wco,
                      preferred_element_type=jnp.float32))
        h = o_g * next_c
        c = next_c
        # crop_seq: mask[b, t] == 1 iff t is the last valid step for batch row b.
        out = out + mask_ref[:, t:t + 1] * h

    out_ref[...] = out


def sal_seq_lstm(x_tokens, lengths, Wx, Wh, Wc, Wco, b):
    """x_tokens: (seq_len, B, IN) f32; lengths: (B,) int32. Returns (B, H) f32."""
    seq_len, B, IN = x_tokens.shape
    H = Wh.shape[0]

    # bf16 matmul operands (accumulation stays f32 inside the kernel).
    x_flat = x_tokens.reshape(seq_len * B, IN).astype(jnp.bfloat16)
    Wx_b = Wx.astype(jnp.bfloat16)
    Wh_b = Wh.astype(jnp.bfloat16)
    Wc_b = Wc.astype(jnp.bfloat16)
    Wco_b = Wco.astype(jnp.bfloat16)
    b2d = b.reshape(1, 4 * H).astype(jnp.float32)

    # crop_seq one-hot mask, compact (B, seq_len): 1 at the last valid step per row.
    mask = (jnp.arange(seq_len)[None, :] ==
            (lengths.astype(jnp.int32) - 1)[:, None]).astype(jnp.float32)

    return pl.pallas_call(
        glstm_seq_kernel,
        out_shape=jax.ShapeDtypeStruct((B, H), jnp.float32),
        grid_spec=pltpu.PrefetchScalarGridSpec(
            num_scalar_prefetch=0,
            grid=(1,),   # single invocation: everything (<1 MiB) resident in VMEM
            in_specs=[
                pl.BlockSpec((seq_len * B, IN), lambda i: (0, 0)),   # fixation tokens
                pl.BlockSpec((IN, 4 * H), lambda i: (0, 0)),         # Wx (packed gates)
                pl.BlockSpec((H, 4 * H), lambda i: (0, 0)),          # Wh (h -> all gates)
                pl.BlockSpec((H, 2 * H), lambda i: (0, 0)),          # Wc (c -> i,f gates)
                pl.BlockSpec((H, H), lambda i: (0, 0)),              # Wco (c -> o gate)
                pl.BlockSpec((1, 4 * H), lambda i: (0, 0)),          # summed biases
                pl.BlockSpec((B, seq_len), lambda i: (0, 0)),        # crop_seq mask
            ],
            out_specs=pl.BlockSpec((B, H), lambda i: (0, 0)),
            scratch_shapes=[pltpu.VMEM((seq_len * B, 4 * H), jnp.float32)],  # gx
        ),
        compiler_params=pltpu.CompilerParams(
            dimension_semantics=("arbitrary",)),
    )(x_flat, Wx_b, Wh_b, Wc_b, Wco_b, b2d, mask)


# ----------------------------------------------------------------------------
# Glue (plain JAX): backend stand-in, fixation gather, length processing
# ----------------------------------------------------------------------------
# TODO(synk): the real Sal_seq backend is a pretrained ResNet50 truncated before
# avgpool/fc; replicating it is out of scope for a synthetic kernel.  A single
# deterministic strided conv + ReLU stands in, producing an NCHW feature map of
# the correct rank (B, FEAT, h, w).
def backend_standin(img, conv_w):
    y = lax.conv_general_dilated(img, conv_w, window_strides=(4, 4),
                                 padding="VALID",
                                 dimension_numbers=("NCHW", "OIHW", "NCHW"))
    return jax.nn.relu(y)


def get_fix_tokens(x, fixs, im_size):
    """x: (B, FEAT, h, w); fixs: (B, seq, 2) pixel coords. Returns (B, FEAT, seq)."""
    H_img, W_img = im_size
    B, feat, h, w = x.shape
    row = jnp.floor(fixs[:, :, 0] * (h - 1) / H_img).astype(jnp.int32)
    col = jnp.floor(fixs[:, :, 1] * (w - 1) / W_img).astype(jnp.int32)
    idx = row * w + col                                   # (B, seq)
    x_flat = x.reshape(B, feat, h * w)
    idx_b = jnp.broadcast_to(idx[:, None, :], (B, feat, idx.shape[1]))
    return jnp.take_along_axis(x_flat, idx_b, axis=2)


def process_lengths(padding_mask, seq_len):
    pads = padding_mask[:, -seq_len:]
    lengths = seq_len - jnp.sum(pads, axis=1).astype(jnp.int32)
    # mirror PyTorch mask[i][lengths[i]-1] wrap-around when length == 0
    return jnp.where(lengths == 0, seq_len, lengths)


def sal_seq_forward(img, fixation, padding_mask, params, seq_len, im_size):
    lengths = process_lengths(padding_mask, seq_len)
    feats = backend_standin(img, params["conv_w"])        # (B, FEAT, h, w)
    x = get_fix_tokens(feats, fixation, im_size)          # (B, FEAT, seq)
    x_tokens = jnp.transpose(x, (2, 0, 1)).astype(jnp.float32)  # (seq, B, FEAT)
    return sal_seq_lstm(x_tokens, lengths, params["Wx"], params["Wh"],
                        params["Wc"], params["Wco"], params["b"])


# ----------------------------------------------------------------------------
# Pure-JAX f32 reference of the G_LSTM + crop_seq (for correctness check)
# ----------------------------------------------------------------------------
def ref_lstm(x_tokens, lengths, Wx, Wh, Wc, Wco, b):
    seq_len, B, _ = x_tokens.shape
    H = Wh.shape[0]
    h = jnp.zeros((B, H), jnp.float32)
    c = jnp.zeros((B, H), jnp.float32)
    out = jnp.zeros((B, H), jnp.float32)
    for t in range(seq_len):
        gates = x_tokens[t] @ Wx + h @ Wh + b
        gc = c @ Wc
        i = jax.nn.sigmoid(gates[:, :H] + gc[:, :H])
        f = jax.nn.sigmoid(gates[:, H:2 * H] + gc[:, H:])
        g = jnp.tanh(gates[:, 3 * H:])
        next_c = f * c + i * g
        o = jax.nn.sigmoid(gates[:, 2 * H:3 * H] + next_c @ Wco)
        h = o * next_c
        c = next_c
        out = out + jnp.where((lengths == t + 1)[:, None], h, 0.0)
    return out


# ----------------------------------------------------------------------------
if __name__ == "__main__":
    B = 8
    SEQ_LEN = 8
    IM_SIZE = (16, 16)          # image height/width
    FEAT = 256                  # backend feature channels (input_size of G_LSTM)
    HIDDEN = 128                # LSTM hidden size
    K = 4                       # stand-in conv kernel / stride -> 4x4 feature map

    key = jax.random.PRNGKey(0)
    keys = jax.random.split(key, 12)

    def unif(k, shape, fan_in):
        bound = 1.0 / jnp.sqrt(fan_in)
        return jax.random.uniform(k, shape, jnp.float32, -bound, bound)

    params = {
        # stand-in backend conv (OIHW)
        "conv_w": unif(keys[0], (FEAT, 3, K, K), 3 * K * K),
        # G_LSTM packed weights; gate order along 4H axis: [i, f, o, g(memory)]
        "Wx": unif(keys[1], (FEAT, 4 * HIDDEN), FEAT),
        "Wh": unif(keys[2], (HIDDEN, 4 * HIDDEN), HIDDEN),
        "Wc": unif(keys[3], (HIDDEN, 2 * HIDDEN), HIDDEN),   # input_c, forget_c
        "Wco": unif(keys[4], (HIDDEN, HIDDEN), HIDDEN),      # output_c
        # per-gate biases pre-summed: b_i = bxi+bhi+bci, b_f = ..., b_o = ..., b_g = bxg+bhg
        "b": unif(keys[5], (4 * HIDDEN,), HIDDEN),
    }
    # Unused in forward(): decoder Linear(hidden, 2) + LogSoftmax (defined in
    # __init__ but never applied), so they are not materialized here.

    # Deterministic inputs
    img = jax.random.normal(keys[6], (B, 3, IM_SIZE[0], IM_SIZE[1]), jnp.float32)
    fixation = jnp.stack(
        [jax.random.uniform(keys[7], (B, SEQ_LEN), jnp.float32, 0.0, IM_SIZE[0]),
         jax.random.uniform(keys[8], (B, SEQ_LEN), jnp.float32, 0.0, IM_SIZE[1])],
        axis=-1)                                             # (B, seq, 2)
    # right-padded padding_mask: 1 marks padded positions
    lens = jax.random.randint(keys[9], (B,), 1, SEQ_LEN + 1)
    padding_mask = (jnp.arange(SEQ_LEN)[None, :] >= lens[:, None]).astype(jnp.float32)

    out = sal_seq_forward(img, fixation, padding_mask, params, SEQ_LEN, IM_SIZE)
    out = jax.block_until_ready(out)

    # correctness check against pure-JAX f32 reference (tolerance relaxed because
    # the kernel uses bf16 matmul operands with f32 accumulation)
    feats = backend_standin(img, params["conv_w"])
    x_tok = jnp.transpose(get_fix_tokens(feats, fixation, IM_SIZE), (2, 0, 1))
    lengths = process_lengths(padding_mask, SEQ_LEN)
    ref = ref_lstm(x_tok, lengths, params["Wx"], params["Wh"],
                   params["Wc"], params["Wco"], params["b"].reshape(1, -1))
    assert out.shape == (B, HIDDEN)
    assert jnp.allclose(out, ref, atol=2e-2, rtol=2e-2), "Pallas kernel mismatch"

    print("KERNEL_OK")
</pallas_src>

<mosaic_0001>
module attributes {stable_mosaic.version = 11 : i64} {
  func.func @glstm_seq_kernel(%arg0: i32, %arg1: memref<64x256xbf16, #tpu.memory_space<vmem>>, %arg2: memref<256x512xbf16, #tpu.memory_space<vmem>>, %arg3: memref<128x512xbf16, #tpu.memory_space<vmem>>, %arg4: memref<128x256xbf16, #tpu.memory_space<vmem>>, %arg5: memref<128x128xbf16, #tpu.memory_space<vmem>>, %arg6: memref<1x512xf32, #tpu.memory_space<vmem>>, %arg7: memref<8x8xf32, #tpu.memory_space<vmem>>, %arg8: memref<8x128xf32, #tpu.memory_space<vmem>>, %arg9: memref<64x512xf32, #tpu.memory_space<vmem>>) attributes {dimension_semantics = [#tpu.dimension_semantics<arbitrary>], iteration_bounds = array<i64: 1>, scalar_prefetch = 0 : i64, scratch_operands = 1 : i64, tpu.core_type = #tpu.core_type<tc>, window_params = [{pipeline_mode = #tpu.pipeline_mode<synchronous>, transform_indices = @transform_0, window_bounds = array<i64: 64, 256>}, {pipeline_mode = #tpu.pipeline_mode<synchronous>, transform_indices = @transform_1, window_bounds = array<i64: 256, 512>}, {pipeline_mode = #tpu.pipeline_mode<synchronous>, transform_indices = @transform_2, window_bounds = array<i64: 128, 512>}, {pipeline_mode = #tpu.pipeline_mode<synchronous>, transform_indices = @transform_3, window_bounds = array<i64: 128, 256>}, {pipeline_mode = #tpu.pipeline_mode<synchronous>, transform_indices = @transform_4, window_bounds = array<i64: 128, 128>}, {pipeline_mode = #tpu.pipeline_mode<synchronous>, transform_indices = @transform_5, window_bounds = array<i64: 1, 512>}, {pipeline_mode = #tpu.pipeline_mode<synchronous>, transform_indices = @transform_6, window_bounds = array<i64: 8, 8>}, {pipeline_mode = #tpu.pipeline_mode<synchronous>, transform_indices = @transform_7, window_bounds = array<i64: 8, 128>}]} {
    %c0 = arith.constant 0 : index
    %c0_0 = arith.constant 0 : index
    %0 = vector.load %arg1[%c0, %c0_0] : memref<64x256xbf16, #tpu.memory_space<vmem>>, vector<64x256xbf16>
    %c0_1 = arith.constant 0 : index
    %c0_2 = arith.constant 0 : index
    %1 = vector.load %arg2[%c0_1, %c0_2] : memref<256x512xbf16, #tpu.memory_space<vmem>>, vector<256x512xbf16>
    %cst = arith.constant dense<0.000000e+00> : vector<64x512xf32>
    %2 = tpu.matmul %0, %1, %cst {dimension_numbers = #tpu.dot_dimension_numbers<[1], [0], [0], [1], [0, 0, 1, 1], [], []>} : vector<64x256xbf16>, vector<256x512xbf16>, vector<64x512xf32> -> vector<64x512xf32>
    %c0_3 = arith.constant 0 : index
    %c0_4 = arith.constant 0 : index
    %3 = vector.load %arg6[%c0_3, %c0_4] : memref<1x512xf32, #tpu.memory_space<vmem>>, vector<1x512xf32>
    %4 = vector.broadcast %3 : vector<1x512xf32> to vector<64x512xf32>
    %5 = arith.addf %2, %4 : vector<64x512xf32>
    %c0_5 = arith.constant 0 : index
    %c0_6 = arith.constant 0 : index
    %6 = vector.load %arg9[%c0_5, %c0_6] : memref<64x512xf32, #tpu.memory_space<vmem>>, vector<64x512xf32>
    tpu.vector_store %arg9[%c0_5, %c0_6], %5 {strides = array<i32>} : memref<64x512xf32, #tpu.memory_space<vmem>>, vector<64x512xf32>,
    %c0_7 = arith.constant 0 : index
    %c0_8 = arith.constant 0 : index
    %7 = vector.load %arg3[%c0_7, %c0_8] : memref<128x512xbf16, #tpu.memory_space<vmem>>, vector<128x512xbf16>
    %c0_9 = arith.constant 0 : index
    %c0_10 = arith.constant 0 : index
    %8 = vector.load %arg4[%c0_9, %c0_10] : memref<128x256xbf16, #tpu.memory_space<vmem>>, vector<128x256xbf16>
    %c0_11 = arith.constant 0 : index
    %c0_12 = arith.constant 0 : index
    %9 = vector.load %arg5[%c0_11, %c0_12] : memref<128x128xbf16, #tpu.memory_space<vmem>>, vector<128x128xbf16>
    %cst_13 = arith.constant 0.000000e+00 : f32
    %10 = vector.broadcast %cst_13 : f32 to vector<8x128xf32>
    %cst_14 = arith.constant 0.000000e+00 : f32
    %11 = vector.broadcast %cst_14 : f32 to vector<8x128xf32>
    %cst_15 = arith.constant 0.000000e+00 : f32
    %12 = vector.broadcast %cst_15 : f32 to vector<8x128xf32>
    %c0_16 = arith.constant 0 : index
    %c0_17 = arith.constant 0 : index
    %13 = vector.load %arg9[%c0_16, %c0_17] : memref<64x512xf32, #tpu.memory_space<vmem>>, vector<8x512xf32>
    %14 = arith.truncf %10 : vector<8x128xf32> to vector<8x128xbf16>
    %cst_18 = arith.constant dense<0.000000e+00> : vector<8x512xf32>
    %15 = tpu.matmul %14, %7, %cst_18 {dimension_numbers = #tpu.dot_dimension_numbers<[1], [0], [0], [1], [0, 0, 1, 1], [], []>} : vector<8x128xbf16>, vector<128x512xbf16>, vector<8x512xf32> -> vector<8x512xf32>
    %16 = arith.truncf %11 : vector<8x128xf32> to vector<8x128xbf16>
    %cst_19 = arith.constant dense<0.000000e+00> : vector<8x256xf32>
    %17 = tpu.matmul %16, %8, %cst_19 {dimension_numbers = #tpu.dot_dimension_numbers<[1], [0], [0], [1], [0, 0, 1, 1], [], []>} : vector<8x128xbf16>, vector<128x256xbf16>, vector<8x256xf32> -> vector<8x256xf32>
    %18 = arith.addf %13, %15 : vector<8x512xf32>
    %19 = vector.extract_strided_slice %18 {offsets = [0, 0], sizes = [8, 128], strides = [1, 1]} : vector<8x512xf32> to vector<8x128xf32>
    %20 = vector.extract_strided_slice %17 {offsets = [0, 0], sizes = [8, 128], strides = [1, 1]} : vector<8x256xf32> to vector<8x128xf32>
    %21 = arith.addf %19, %20 : vector<8x128xf32>
    %22 = arith.negf %21 : vector<8x128xf32>
    %23 = math.exp %22 : vector<8x128xf32>
    %cst_20 = arith.constant 1.000000e+00 : f32
    %24 = vector.broadcast %cst_20 : f32 to vector<8x128xf32>
    %25 = arith.addf %24, %23 : vector<8x128xf32>
    %26 = arith.divf %24, %25 : vector<8x128xf32>
    %27 = vector.extract_strided_slice %18 {offsets = [0, 128], sizes = [8, 128], strides = [1, 1]} : vector<8x512xf32> to vector<8x128xf32>
    %28 = vector.extract_strided_slice %17 {offsets = [0, 128], sizes = [8, 128], strides = [1, 1]} : vector<8x256xf32> to vector<8x128xf32>
    %29 = arith.addf %27, %28 : vector<8x128xf32>
    %30 = arith.negf %29 : vector<8x128xf32>
    %31 = math.exp %30 : vector<8x128xf32>
    %cst_21 = arith.constant 1.000000e+00 : f32
    %32 = vector.broadcast %cst_21 : f32 to vector<8x128xf32>
    %33 = arith.addf %32, %31 : vector<8x128xf32>
    %34 = arith.divf %32, %33 : vector<8x128xf32>
    %35 = vector.extract_strided_slice %18 {offsets = [0, 384], sizes = [8, 128], strides = [1, 1]} : vector<8x512xf32> to vector<8x128xf32>
    %36 = math.tanh %35 : vector<8x128xf32>
    %37 = arith.mulf %34, %11 : vector<8x128xf32>
    %38 = arith.mulf %26, %36 : vector<8x128xf32>
    %39 = arith.addf %37, %38 : vector<8x128xf32>
    %40 = vector.extract_strided_slice %18 {offsets = [0, 256], sizes = [8, 128], strides = [1, 1]} : vector<8x512xf32> to vector<8x128xf32>
    %41 = arith.truncf %39 : vector<8x128xf32> to vector<8x128xbf16>
    %cst_22 = arith.constant dense<0.000000e+00> : vector<8x128xf32>
    %42 = tpu.matmul %41, %9, %cst_22 {dimension_numbers = #tpu.dot_dimension_numbers<[1], [0], [0], [1], [0, 0, 1, 1], [], []>} : vector<8x128xbf16>, vector<128x128xbf16>, vector<8x128xf32> -> vector<8x128xf32>
    %43 = arith.addf %40, %42 : vector<8x128xf32>
    %44 = arith.negf %43 : vector<8x128xf32>
    %45 = math.exp %44 : vector<8x128xf32>
    %cst_23 = arith.constant 1.000000e+00 : f32
    %46 = vector.broadcast %cst_23 : f32 to vector<8x128xf32>
    %47 = arith.addf %46, %45 : vector<8x128xf32>
    %48 = arith.divf %46, %47 : vector<8x128xf32>
    %49 = arith.mulf %48, %39 : vector<8x128xf32>
    %c0_24 = arith.constant 0 : index
    %c0_25 = arith.constant 0 : index
    %50 = vector.load %arg7[%c0_24, %c0_25] : memref<8x8xf32, #tpu.memory_space<vmem>>, vector<8x1xf32>
    %51 = vector.broadcast %50 : vector<8x1xf32> to vector<8x128xf32>
    %52 = arith.mulf %51, %49 : vector<8x128xf32>
    %53 = arith.addf %12, %52 : vector<8x128xf32>
    %c8 = arith.constant 8 : index
    %c0_26 = arith.constant 0 : index
    %54 = vector.load %arg9[%c8, %c0_26] : memref<64x512xf32, #tpu.memory_space<vmem>>, vector<8x512xf32>
    %55 = arith.truncf %49 : vector<8x128xf32> to vector<8x128xbf16>
    %cst_27 = arith.constant dense<0.000000e+00> : vector<8x512xf32>
    %56 = tpu.matmul %55, %7, %cst_27 {dimension_numbers = #tpu.dot_dimension_numbers<[1], [0], [0], [1], [0, 0, 1, 1], [], []>} : vector<8x128xbf16>, vector<128x512xbf16>, vector<8x512xf32> -> vector<8x512xf32>
    %57 = arith.truncf %39 : vector<8x128xf32> to vector<8x128xbf16>
    %cst_28 = arith.constant dense<0.000000e+00> : vector<8x256xf32>
    %58 = tpu.matmul %57, %8, %cst_28 {dimension_numbers = #tpu.dot_dimension_numbers<[1], [0], [0], [1], [0, 0, 1, 1], [], []>} : vector<8x128xbf16>, vector<128x256xbf16>, vector<8x256xf32> -> vector<8x256xf32>
    %59 = arith.addf %54, %56 : vector<8x512xf32>
    %60 = vector.extract_strided_slice %59 {offsets = [0, 0], sizes = [8, 128], strides = [1, 1]} : vector<8x512xf32> to vector<8x128xf32>
    %61 = vector.extract_strided_slice %58 {offsets = [0, 0], sizes = [8, 128], strides = [1, 1]} : vector<8x256xf32> to vector<8x128xf32>
    %62 = arith.addf %60, %61 : vector<8x128xf32>
    %63 = arith.negf %62 : vector<8x128xf32>
    %64 = math.exp %63 : vector<8x128xf32>
    %cst_29 = arith.constant 1.000000e+00 : f32
    %65 = vector.broadcast %cst_29 : f32 to vector<8x128xf32>
    %66 = arith.addf %65, %64 : vector<8x128xf32>
    %67 = arith.divf %65, %66 : vector<8x128xf32>
    %68 = vector.extract_strided_slice %59 {offsets = [0, 128], sizes = [8, 128], strides = [1, 1]} : vector<8x512xf32> to vector<8x128xf32>
    %69 = vector.extract_strided_slice %58 {offsets = [0, 128], sizes = [8, 128], strides = [1, 1]} : vector<8x256xf32> to vector<8x128xf32>
    %70 = arith.addf %68, %69 : vector<8x128xf32>
    %71 = arith.negf %70 : vector<8x128xf32>
    %72 = math.exp %71 : vector<8x128xf32>
    %cst_30 = arith.constant 1.000000e+00 : f32
    %73 = vector.broadcast %cst_30 : f32 to vector<8x128xf32>
    %74 = arith.addf %73, %72 : vector<8x128xf32>
    %75 = arith.divf %73, %74 : vector<8x128xf32>
    %76 = vector.extract_strided_slice %59 {offsets = [0, 384], sizes = [8, 128], strides = [1, 1]} : vector<8x512xf32> to vector<8x128xf32>
    %77 = math.tanh %76 : vector<8x128xf32>
    %78 = arith.mulf %75, %39 : vector<8x128xf32>
    %79 = arith.mulf %67, %77 : vector<8x128xf32>
    %80 = arith.addf %78, %79 : vector<8x128xf32>
    %81 = vector.extract_strided_slice %59 {offsets = [0, 256], sizes = [8, 128], strides = [1, 1]} : vector<8x512xf32> to vector<8x128xf32>
    %82 = arith.truncf %80 : vector<8x128xf32> to vector<8x128xbf16>
    %cst_31 = arith.constant dense<0.000000e+00> : vector<8x128xf32>
    %83 = tpu.matmul %82, %9, %cst_31 {dimension_numbers = #tpu.dot_dimension_numbers<[1], [0], [0], [1], [0, 0, 1, 1], [], []>} : vector<8x128xbf16>, vector<128x128xbf16>, vector<8x128xf32> -> vector<8x128xf32>
    %84 = arith.addf %81, %83 : vector<8x128xf32>
    %85 = arith.negf %84 : vector<8x128xf32>
    %86 = math.exp %85 : vector<8x128xf32>
    %cst_32 = arith.constant 1.000000e+00 : f32
    %87 = vector.broadcast %cst_32 : f32 to vector<8x128xf32>
    %88 = arith.addf %87, %86 : vector<8x128xf32>
    %89 = arith.divf %87, %88 : vector<8x128xf32>
    %90 = arith.mulf %89, %80 : vector<8x128xf32>
    %c0_33 = arith.constant 0 : index
    %c1 = arith.constant 1 : index
    %91 = vector.load %arg7[%c0_33, %c1] : memref<8x8xf32, #tpu.memory_space<vmem>>, vector<8x1xf32>
    %92 = vector.broadcast %91 : vector<8x1xf32> to vector<8x128xf32>
    %93 = arith.mulf %92, %90 : vector<8x128xf32>
    %94 = arith.addf %53, %93 : vector<8x128xf32>
    %c16 = arith.constant 16 : index
    %c0_34 = arith.constant 0 : index
    %95 = vector.load %arg9[%c16, %c0_34] : memref<64x512xf32, #tpu.memory_space<vmem>>, vector<8x512xf32>
    %96 = arith.truncf %90 : vector<8x128xf32> to vector<8x128xbf16>
    %cst_35 = arith.constant dense<0.000000e+00> : vector<8x512xf32>
    %97 = tpu.matmul %96, %7, %cst_35 {dimension_numbers = #tpu.dot_dimension_numbers<[1], [0], [0], [1], [0, 0, 1, 1], [], []>} : vector<8x128xbf16>, vector<128x512xbf16>, vector<8x512xf32> -> vector<8x512xf32>
    %98 = arith.truncf %80 : vector<8x128xf32> to vector<8x128xbf16>
    %cst_36 = arith.constant dense<0.000000e+00> : vector<8x256xf32>
    %99 = tpu.matmul %98, %8, %cst_36 {dimension_numbers = #tpu.dot_dimension_numbers<[1], [0], [0], [1], [0, 0, 1, 1], [], []>} : vector<8x128xbf16>, vector<128x256xbf16>, vector<8x256xf32> -> vector<8x256xf32>
    %100 = arith.addf %95, %97 : vector<8x512xf32>
    %101 = vector.extract_strided_slice %100 {offsets = [0, 0], sizes = [8, 128], strides = [1, 1]} : vector<8x512xf32> to vector<8x128xf32>
    %102 = vector.extract_strided_slice %99 {offsets = [0, 0], sizes = [8, 128], strides = [1, 1]} : vector<8x256xf32> to vector<8x128xf32>
    %103 = arith.addf %101, %102 : vector<8x128xf32>
    %104 = arith.negf %103 : vector<8x128xf32>
    %105 = math.exp %104 : vector<8x128xf32>
    %cst_37 = arith.constant 1.000000e+00 : f32
    %106 = vector.broadcast %cst_37 : f32 to vector<8x128xf32>
    %107 = arith.addf %106, %105 : vector<8x128xf32>
    %108 = arith.divf %106, %107 : vector<8x128xf32>
    %109 = vector.extract_strided_slice %100 {offsets = [0, 128], sizes = [8, 128], strides = [1, 1]} : vector<8x512xf32> to vector<8x128xf32>
    %110 = vector.extract_strided_slice %99 {offsets = [0, 128], sizes = [8, 128], strides = [1, 1]} : vector<8x256xf32> to vector<8x128xf32>
    %111 = arith.addf %109, %110 : vector<8x128xf32>
    %112 = arith.negf %111 : vector<8x128xf32>
    %113 = math.exp %112 : vector<8x128xf32>
    %cst_38 = arith.constant 1.000000e+00 : f32
    %114 = vector.broadcast %cst_38 : f32 to vector<8x128xf32>
    %115 = arith.addf %114, %113 : vector<8x128xf32>
    %116 = arith.divf %114, %115 : vector<8x128xf32>
    %117 = vector.extract_strided_slice %100 {offsets = [0, 384], sizes = [8, 128], strides = [1, 1]} : vector<8x512xf32> to vector<8x128xf32>
    %118 = math.tanh %117 : vector<8x128xf32>
    %119 = arith.mulf %116, %80 : vector<8x128xf32>
    %120 = arith.mulf %108, %118 : vector<8x128xf32>
    %121 = arith.addf %119, %120 : vector<8x128xf32>
    %122 = vector.extract_strided_slice %100 {offsets = [0, 256], sizes = [8, 128], strides = [1, 1]} : vector<8x512xf32> to vector<8x128xf32>
    %123 = arith.truncf %121 : vector<8x128xf32> to vector<8x128xbf16>
    %cst_39 = arith.constant dense<0.000000e+00> : vector<8x128xf32>
    %124 = tpu.matmul %123, %9, %cst_39 {dimension_numbers = #tpu.dot_dimension_numbers<[1], [0], [0], [1], [0, 0, 1, 1], [], []>} : vector<8x128xbf16>, vector<128x128xbf16>, vector<8x128xf32> -> vector<8x128xf32>
    %125 = arith.addf %122, %124 : vector<8x128xf32>
    %126 = arith.negf %125 : vector<8x128xf32>
    %127 = math.exp %126 : vector<8x128xf32>
    %cst_40 = arith.constant 1.000000e+00 : f32
    %128 = vector.broadcast %cst_40 : f32 to vector<8x128xf32>
    %129 = arith.addf %128, %127 : vector<8x128xf32>
    %130 = arith.divf %128, %129 : vector<8x128xf32>
    %131 = arith.mulf %130, %121 : vector<8x128xf32>
    %c0_41 = arith.constant 0 : index
    %c2 = arith.constant 2 : index
    %132 = vector.load %arg7[%c0_41, %c2] : memref<8x8xf32, #tpu.memory_space<vmem>>, vector<8x1xf32>
    %133 = vector.broadcast %132 : vector<8x1xf32> to vector<8x128xf32>
    %134 = arith.mulf %133, %131 : vector<8x128xf32>
    %135 = arith.addf %94, %134 : vector<8x128xf32>
    %c24 = arith.constant 24 : index
    %c0_42 = arith.constant 0 : index
    %136 = vector.load %arg9[%c24, %c0_42] : memref<64x512xf32, #tpu.memory_space<vmem>>, vector<8x512xf32>
    %137 = arith.truncf %131 : vector<8x128xf32> to vector<8x128xbf16>
    %cst_43 = arith.constant dense<0.000000e+00> : vector<8x512xf32>
    %138 = tpu.matmul %137, %7, %cst_43 {dimension_numbers = #tpu.dot_dimension_numbers<[1], [0], [0], [1], [0, 0, 1, 1], [], []>} : vector<8x128xbf16>, vector<128x512xbf16>, vector<8x512xf32> -> vector<8x512xf32>
    %139 = arith.truncf %121 : vector<8x128xf32> to vector<8x128xbf16>
    %cst_44 = arith.constant dense<0.000000e+00> : vector<8x256xf32>
    %140 = tpu.matmul %139, %8, %cst_44 {dimension_numbers = #tpu.dot_dimension_numbers<[1], [0], [0], [1], [0, 0, 1, 1], [], []>} : vector<8x128xbf16>, vector<128x256xbf16>, vector<8x256xf32> -> vector<8x256xf32>
    %141 = arith.addf %136, %138 : vector<8x512xf32>
    %142 = vector.extract_strided_slice %141 {offsets = [0, 0], sizes = [8, 128], strides = [1, 1]} : vector<8x512xf32> to vector<8x128xf32>
    %143 = vector.extract_strided_slice %140 {offsets = [0, 0], sizes = [8, 128], strides = [1, 1]} : vector<8x256xf32> to vector<8x128xf32>
    %144 = arith.addf %142, %143 : vector<8x128xf32>
    %145 = arith.negf %144 : vector<8x128xf32>
    %146 = math.exp %145 : vector<8x128xf32>
    %cst_45 = arith.constant 1.000000e+00 : f32
    %147 = vector.broadcast %cst_45 : f32 to vector<8x128xf32>
    %148 = arith.addf %147, %146 : vector<8x128xf32>
    %149 = arith.divf %147, %148 : vector<8x128xf32>
    %150 = vector.extract_strided_slice %141 {offsets = [0, 128], sizes = [8, 128], strides = [1, 1]} : vector<8x512xf32> to vector<8x128xf32>
    %151 = vector.extract_strided_slice %140 {offsets = [0, 128], sizes = [8, 128], strides = [1, 1]} : vector<8x256xf32> to vector<8x128xf32>
    %152 = arith.addf %150, %151 : vector<8x128xf32>
    %153 = arith.negf %152 : vector<8x128xf32>
    %154 = math.exp %153 : vector<8x128xf32>
    %cst_46 = arith.constant 1.000000e+00 : f32
    %155 = vector.broadcast %cst_46 : f32 to vector<8x128xf32>
    %156 = arith.addf %155, %154 : vector<8x128xf32>
    %157 = arith.divf %155, %156 : vector<8x128xf32>
    %158 = vector.extract_strided_slice %141 {offsets = [0, 384], sizes = [8, 128], strides = [1, 1]} : vector<8x512xf32> to vector<8x128xf32>
    %159 = math.tanh %158 : vector<8x128xf32>
    %160 = arith.mulf %157, %121 : vector<8x128xf32>
    %161 = arith.mulf %149, %159 : vector<8x128xf32>
    %162 = arith.addf %160, %161 : vector<8x128xf32>
    %163 = vector.extract_strided_slice %141 {offsets = [0, 256], sizes = [8, 128], strides = [1, 1]} : vector<8x512xf32> to vector<8x128xf32>
    %164 = arith.truncf %162 : vector<8x128xf32> to vector<8x128xbf16>
    %cst_47 = arith.constant dense<0.000000e+00> : vector<8x128xf32>
    %165 = tpu.matmul %164, %9, %cst_47 {dimension_numbers = #tpu.dot_dimension_numbers<[1], [0], [0], [1], [0, 0, 1, 1], [], []>} : vector<8x128xbf16>, vector<128x128xbf16>, vector<8x128xf32> -> vector<8x128xf32>
    %166 = arith.addf %163, %165 : vector<8x128xf32>
    %167 = arith.negf %166 : vector<8x128xf32>
    %168 = math.exp %167 : vector<8x128xf32>
    %cst_48 = arith.constant 1.000000e+00 : f32
    %169 = vector.broadcast %cst_48 : f32 to vector<8x128xf32>
    %170 = arith.addf %169, %168 : vector<8x128xf32>
    %171 = arith.divf %169, %170 : vector<8x128xf32>
    %172 = arith.mulf %171, %162 : vector<8x128xf32>
    %c0_49 = arith.constant 0 : index
    %c3 = arith.constant 3 : index
    %173 = vector.load %arg7[%c0_49, %c3] : memref<8x8xf32, #tpu.memory_space<vmem>>, vector<8x1xf32>
    %174 = vector.broadcast %173 : vector<8x1xf32> to vector<8x128xf32>
    %175 = arith.mulf %174, %172 : vector<8x128xf32>
    %176 = arith.addf %135, %175 : vector<8x128xf32>
    %c32 = arith.constant 32 : index
    %c0_50 = arith.constant 0 : index
    %177 = vector.load %arg9[%c32, %c0_50] : memref<64x512xf32, #tpu.memory_space<vmem>>, vector<8x512xf32>
    %178 = arith.truncf %172 : vector<8x128xf32> to vector<8x128xbf16>
    %cst_51 = arith.constant dense<0.000000e+00> : vector<8x512xf32>
    %179 = tpu.matmul %178, %7, %cst_51 {dimension_numbers = #tpu.dot_dimension_numbers<[1], [0], [0], [1], [0, 0, 1, 1], [], []>} : vector<8x128xbf16>, vector<128x512xbf16>, vector<8x512xf32> -> vector<8x512xf32>
    %180 = arith.truncf %162 : vector<8x128xf32> to vector<8x128xbf16>
    %cst_52 = arith.constant dense<0.000000e+00> : vector<8x256xf32>
    %181 = tpu.matmul %180, %8, %cst_52 {dimension_numbers = #tpu.dot_dimension_numbers<[1], [0], [0], [1], [0, 0, 1, 1], [], []>} : vector<8x128xbf16>, vector<128x256xbf16>, vector<8x256xf32> -> vector<8x256xf32>
    %182 = arith.addf %177, %179 : vector<8x512xf32>
    %183 = vector.extract_strided_slice %182 {offsets = [0, 0], sizes = [8, 128], strides = [1, 1]} : vector<8x512xf32> to vector<8x128xf32>
    %184 = vector.extract_strided_slice %181 {offsets = [0, 0], sizes = [8, 128], strides = [1, 1]} : vector<8x256xf32> to vector<8x128xf32>
    %185 = arith.addf %183, %184 : vector<8x128xf32>
    %186 = arith.negf %185 : vector<8x128xf32>
    %187 = math.exp %186 : vector<8x128xf32>
    %cst_53 = arith.constant 1.000000e+00 : f32
    %188 = vector.broadcast %cst_53 : f32 to vector<8x128xf32>
    %189 = arith.addf %188, %187 : vector<8x128xf32>
    %190 = arith.divf %188, %189 : vector<8x128xf32>
    %191 = vector.extract_strided_slice %182 {offsets = [0, 128], sizes = [8, 128], strides = [1, 1]} : vector<8x512xf32> to vector<8x128xf32>
    %192 = vector.extract_strided_slice %181 {offsets = [0, 128], sizes = [8, 128], strides = [1, 1]} : vector<8x256xf32> to vector<8x128xf32>
    %193 = arith.addf %191, %192 : vector<8x128xf32>
    %194 = arith.negf %193 : vector<8x128xf32>
    %195 = math.exp %194 : vector<8x128xf32>
    %cst_54 = arith.constant 1.000000e+00 : f32
    %196 = vector.broadcast %cst_54 : f32 to vector<8x128xf32>
    %197 = arith.addf %196, %195 : vector<8x128xf32>
    %198 = arith.divf %196, %197 : vector<8x128xf32>
    %199 = vector.extract_strided_slice %182 {offsets = [0, 384], sizes = [8, 128], strides = [1, 1]} : vector<8x512xf32> to vector<8x128xf32>
    %200 = math.tanh %199 : vector<8x128xf32>
    %201 = arith.mulf %198, %162 : vector<8x128xf32>
    %202 = arith.mulf %190, %200 : vector<8x128xf32>
    %203 = arith.addf %201, %202 : vector<8x128xf32>
    %204 = vector.extract_strided_slice %182 {offsets = [0, 256], sizes = [8, 128], strides = [1, 1]} : vector<8x512xf32> to vector<8x128xf32>
    %205 = arith.truncf %203 : vector<8x128xf32> to vector<8x128xbf16>
    %cst_55 = arith.constant dense<0.000000e+00> : vector<8x128xf32>
    %206 = tpu.matmul %205, %9, %cst_55 {dimension_numbers = #tpu.dot_dimension_numbers<[1], [0], [0], [1], [0, 0, 1, 1], [], []>} : vector<8x128xbf16>, vector<128x128xbf16>, vector<8x128xf32> -> vector<8x128xf32>
    %207 = arith.addf %204, %206 : vector<8x128xf32>
    %208 = arith.negf %207 : vector<8x128xf32>
    %209 = math.exp %208 : vector<8x128xf32>
    %cst_56 = arith.constant 1.000000e+00 : f32
    %210 = vector.broadcast %cst_56 : f32 to vector<8x128xf32>
    %211 = arith.addf %210, %209 : vector<8x128xf32>
    %212 = arith.divf %210, %211 : vector<8x128xf32>
    %213 = arith.mulf %212, %203 : vector<8x128xf32>
    %c0_57 = arith.constant 0 : index
    %c4 = arith.constant 4 : index
    %214 = vector.load %arg7[%c0_57, %c4] : memref<8x8xf32, #tpu.memory_space<vmem>>, vector<8x1xf32>
    %215 = vector.broadcast %214 : vector<8x1xf32> to vector<8x128xf32>
    %216 = arith.mulf %215, %213 : vector<8x128xf32>
    %217 = arith.addf %176, %216 : vector<8x128xf32>
    %c40 = arith.constant 40 : index
    %c0_58 = arith.constant 0 : index
    %218 = vector.load %arg9[%c40, %c0_58] : memref<64x512xf32, #tpu.memory_space<vmem>>, vector<8x512xf32>
    %219 = arith.truncf %213 : vector<8x128xf32> to vector<8x128xbf16>
    %cst_59 = arith.constant dense<0.000000e+00> : vector<8x512xf32>
    %220 = tpu.matmul %219, %7, %cst_59 {dimension_numbers = #tpu.dot_dimension_numbers<[1], [0], [0], [1], [0, 0, 1, 1], [], []>} : vector<8x128xbf16>, vector<128x512xbf16>, vector<8x512xf32> -> vector<8x512xf32>
    %221 = arith.truncf %203 : vector<8x128xf32> to vector<8x128xbf16>
    %cst_60 = arith.constant dense<0.000000e+00> : vector<8x256xf32>
    %222 = tpu.matmul %221, %8, %cst_60 {dimension_numbers = #tpu.dot_dimension_numbers<[1], [0], [0], [1], [0, 0, 1, 1], [], []>} : vector<8x128xbf16>, vector<128x256xbf16>, vector<8x256xf32> -> vector<8x256xf32>
    %223 = arith.addf %218, %220 : vector<8x512xf32>
    %224 = vector.extract_strided_slice %223 {offsets = [0, 0], sizes = [8, 128], strides = [1, 1]} : vector<8x512xf32> to vector<8x128xf32>
    %225 = vector.extract_strided_slice %222 {offsets = [0, 0], sizes = [8, 128], strides = [1, 1]} : vector<8x256xf32> to vector<8x128xf32>
    %226 = arith.addf %224, %225 : vector<8x128xf32>
    %227 = arith.negf %226 : vector<8x128xf32>
    %228 = math.exp %227 : vector<8x128xf32>
    %cst_61 = arith.constant 1.000000e+00 : f32
    %229 = vector.broadcast %cst_61 : f32 to vector<8x128xf32>
    %230 = arith.addf %229, %228 : vector<8x128xf32>
    %231 = arith.divf %229, %230 : vector<8x128xf32>
    %232 = vector.extract_strided_slice %223 {offsets = [0, 128], sizes = [8, 128], strides = [1, 1]} : vector<8x512xf32> to vector<8x128xf32>
    %233 = vector.extract_strided_slice %222 {offsets = [0, 128], sizes = [8, 128], strides = [1, 1]} : vector<8x256xf32> to vector<8x128xf32>
    %234 = arith.addf %232, %233 : vector<8x128xf32>
    %235 = arith.negf %234 : vector<8x128xf32>
    %236 = math.exp %235 : vector<8x128xf32>
    %cst_62 = arith.constant 1.000000e+00 : f32
    %237 = vector.broadcast %cst_62 : f32 to vector<8x128xf32>
    %238 = arith.addf %237, %236 : vector<8x128xf32>
    %239 = arith.divf %237, %238 : vector<8x128xf32>
    %240 = vector.extract_strided_slice %223 {offsets = [0, 384], sizes = [8, 128], strides = [1, 1]} : vector<8x512xf32> to vector<8x128xf32>
    %241 = math.tanh %240 : vector<8x128xf32>
    %242 = arith.mulf %239, %203 : vector<8x128xf32>
    %243 = arith.mulf %231, %241 : vector<8x128xf32>
    %244 = arith.addf %242, %243 : vector<8x128xf32>
    %245 = vector.extract_strided_slice %223 {offsets = [0, 256], sizes = [8, 128], strides = [1, 1]} : vector<8x512xf32> to vector<8x128xf32>
    %246 = arith.truncf %244 : vector<8x128xf32> to vector<8x128xbf16>
    %cst_63 = arith.constant dense<0.000000e+00> : vector<8x128xf32>
    %247 = tpu.matmul %246, %9, %cst_63 {dimension_numbers = #tpu.dot_dimension_numbers<[1], [0], [0], [1], [0, 0, 1, 1], [], []>} : vector<8x128xbf16>, vector<128x128xbf16>, vector<8x128xf32> -> vector<8x128xf32>
    %248 = arith.addf %245, %247 : vector<8x128xf32>
    %249 = arith.negf %248 : vector<8x128xf32>
    %250 = math.exp %249 : vector<8x128xf32>
    %cst_64 = arith.constant 1.000000e+00 : f32
    %251 = vector.broadcast %cst_64 : f32 to vector<8x128xf32>
    %252 = arith.addf %251, %250 : vector<8x128xf32>
    %253 = arith.divf %251, %252 : vector<8x128xf32>
    %254 = arith.mulf %253, %244 : vector<8x128xf32>
    %c0_65 = arith.constant 0 : index
    %c5 = arith.constant 5 : index
    %255 = vector.load %arg7[%c0_65, %c5] : memref<8x8xf32, #tpu.memory_space<vmem>>, vector<8x1xf32>
    %256 = vector.broadcast %255 : vector<8x1xf32> to vector<8x128xf32>
    %257 = arith.mulf %256, %254 : vector<8x128xf32>
    %258 = arith.addf %217, %257 : vector<8x128xf32>
    %c48 = arith.constant 48 : index
    %c0_66 = arith.constant 0 : index
    %259 = vector.load %arg9[%c48, %c0_66] : memref<64x512xf32, #tpu.memory_space<vmem>>, vector<8x512xf32>
    %260 = arith.truncf %254 : vector<8x128xf32> to vector<8x128xbf16>
    %cst_67 = arith.constant dense<0.000000e+00> : vector<8x512xf32>
    %261 = tpu.matmul %260, %7, %cst_67 {dimension_numbers = #tpu.dot_dimension_numbers<[1], [0], [0], [1], [0, 0, 1, 1], [], []>} : vector<8x128xbf16>, vector<128x512xbf16>, vector<8x512xf32> -> vector<8x512xf32>
    %262 = arith.truncf %244 : vector<8x128xf32> to vector<8x128xbf16>
    %cst_68 = arith.constant dense<0.000000e+00> : vector<8x256xf32>
    %263 = tpu.matmul %262, %8, %cst_68 {dimension_numbers = #tpu.dot_dimension_numbers<[1], [0], [0], [1], [0, 0, 1, 1], [], []>} : vector<8x128xbf16>, vector<128x256xbf16>, vector<8x256xf32> -> vector<8x256xf32>
    %264 = arith.addf %259, %261 : vector<8x512xf32>
    %265 = vector.extract_strided_slice %264 {offsets = [0, 0], sizes = [8, 128], strides = [1, 1]} : vector<8x512xf32> to vector<8x128xf32>
    %266 = vector.extract_strided_slice %263 {offsets = [0, 0], sizes = [8, 128], strides = [1, 1]} : vector<8x256xf32> to vector<8x128xf32>
    %267 = arith.addf %265, %266 : vector<8x128xf32>
    %268 = arith.negf %267 : vector<8x128xf32>
    %269 = math.exp %268 : vector<8x128xf32>
    %cst_69 = arith.constant 1.000000e+00 : f32
    %270 = vector.broadcast %cst_69 : f32 to vector<8x128xf32>
    %271 = arith.addf %270, %269 : vector<8x128xf32>
    %272 = arith.divf %270, %271 : vector<8x128xf32>
    %273 = vector.extract_strided_slice %264 {offsets = [0, 128], sizes = [8, 128], strides = [1, 1]} : vector<8x512xf32> to vector<8x128xf32>
    %274 = vector.extract_strided_slice %263 {offsets = [0, 128], sizes = [8, 128], strides = [1, 1]} : vector<8x256xf32> to vector<8x128xf32>
    %275 = arith.addf %273, %274 : vector<8x128xf32>
    %276 = arith.negf %275 : vector<8x128xf32>
    %277 = math.exp %276 : vector<8x128xf32>
    %cst_70 = arith.constant 1.000000e+00 : f32
    %278 = vector.broadcast %cst_70 : f32 to vector<8x128xf32>
    %279 = arith.addf %278, %277 : vector<8x128xf32>
    %280 = arith.divf %278, %279 : vector<8x128xf32>
    %281 = vector.extract_strided_slice %264 {offsets = [0, 384], sizes = [8, 128], strides = [1, 1]} : vector<8x512xf32> to vector<8x128xf32>
    %282 = math.tanh %281 : vector<8x128xf32>
    %283 = arith.mulf %280, %244 : vector<8x128xf32>
    %284 = arith.mulf %272, %282 : vector<8x128xf32>
    %285 = arith.addf %283, %284 : vector<8x128xf32>
    %286 = vector.extract_strided_slice %264 {offsets = [0, 256], sizes = [8, 128], strides = [1, 1]} : vector<8x512xf32> to vector<8x128xf32>
    %287 = arith.truncf %285 : vector<8x128xf32> to vector<8x128xbf16>
    %cst_71 = arith.constant dense<0.000000e+00> : vector<8x128xf32>
    %288 = tpu.matmul %287, %9, %cst_71 {dimension_numbers = #tpu.dot_dimension_numbers<[1], [0], [0], [1], [0, 0, 1, 1], [], []>} : vector<8x128xbf16>, vector<128x128xbf16>, vector<8x128xf32> -> vector<8x128xf32>
    %289 = arith.addf %286, %288 : vector<8x128xf32>
    %290 = arith.negf %289 : vector<8x128xf32>
    %291 = math.exp %290 : vector<8x128xf32>
    %cst_72 = arith.constant 1.000000e+00 : f32
    %292 = vector.broadcast %cst_72 : f32 to vector<8x128xf32>
    %293 = arith.addf %292, %291 : vector<8x128xf32>
    %294 = arith.divf %292, %293 : vector<8x128xf32>
    %295 = arith.mulf %294, %285 : vector<8x128xf32>
    %c0_73 = arith.constant 0 : index
    %c6 = arith.constant 6 : index
    %296 = vector.load %arg7[%c0_73, %c6] : memref<8x8xf32, #tpu.memory_space<vmem>>, vector<8x1xf32>
    %297 = vector.broadcast %296 : vector<8x1xf32> to vector<8x128xf32>
    %298 = arith.mulf %297, %295 : vector<8x128xf32>
    %299 = arith.addf %258, %298 : vector<8x128xf32>
    %c56 = arith.constant 56 : index
    %c0_74 = arith.constant 0 : index
    %300 = vector.load %arg9[%c56, %c0_74] : memref<64x512xf32, #tpu.memory_space<vmem>>, vector<8x512xf32>
    %301 = arith.truncf %295 : vector<8x128xf32> to vector<8x128xbf16>
    %cst_75 = arith.constant dense<0.000000e+00> : vector<8x512xf32>
    %302 = tpu.matmul %301, %7, %cst_75 {dimension_numbers = #tpu.dot_dimension_numbers<[1], [0], [0], [1], [0, 0, 1, 1], [], []>} : vector<8x128xbf16>, vector<128x512xbf16>, vector<8x512xf32> -> vector<8x512xf32>
    %303 = arith.truncf %285 : vector<8x128xf32> to vector<8x128xbf16>
    %cst_76 = arith.constant dense<0.000000e+00> : vector<8x256xf32>
    %304 = tpu.matmul %303, %8, %cst_76 {dimension_numbers = #tpu.dot_dimension_numbers<[1], [0], [0], [1], [0, 0, 1, 1], [], []>} : vector<8x128xbf16>, vector<128x256xbf16>, vector<8x256xf32> -> vector<8x256xf32>
    %305 = arith.addf %300, %302 : vector<8x512xf32>
    %306 = vector.extract_strided_slice %305 {offsets = [0, 0], sizes = [8, 128], strides = [1, 1]} : vector<8x512xf32> to vector<8x128xf32>
    %307 = vector.extract_strided_slice %304 {offsets = [0, 0], sizes = [8, 128], strides = [1, 1]} : vector<8x256xf32> to vector<8x128xf32>
    %308 = arith.addf %306, %307 : vector<8x128xf32>
    %309 = arith.negf %308 : vector<8x128xf32>
    %310 = math.exp %309 : vector<8x128xf32>
    %cst_77 = arith.constant 1.000000e+00 : f32
    %311 = vector.broadcast %cst_77 : f32 to vector<8x128xf32>
    %312 = arith.addf %311, %310 : vector<8x128xf32>
    %313 = arith.divf %311, %312 : vector<8x128xf32>
    %314 = vector.extract_strided_slice %305 {offsets = [0, 128], sizes = [8, 128], strides = [1, 1]} : vector<8x512xf32> to vector<8x128xf32>
    %315 = vector.extract_strided_slice %304 {offsets = [0, 128], sizes = [8, 128], strides = [1, 1]} : vector<8x256xf32> to vector<8x128xf32>
    %316 = arith.addf %314, %315 : vector<8x128xf32>
    %317 = arith.negf %316 : vector<8x128xf32>
    %318 = math.exp %317 : vector<8x128xf32>
    %cst_78 = arith.constant 1.000000e+00 : f32
    %319 = vector.broadcast %cst_78 : f32 to vector<8x128xf32>
    %320 = arith.addf %319, %318 : vector<8x128xf32>
    %321 = arith.divf %319, %320 : vector<8x128xf32>
    %322 = vector.extract_strided_slice %305 {offsets = [0, 384], sizes = [8, 128], strides = [1, 1]} : vector<8x512xf32> to vector<8x128xf32>
    %323 = math.tanh %322 : vector<8x128xf32>
    %324 = arith.mulf %321, %285 : vector<8x128xf32>
    %325 = arith.mulf %313, %323 : vector<8x128xf32>
    %326 = arith.addf %324, %325 : vector<8x128xf32>
    %327 = vector.extract_strided_slice %305 {offsets = [0, 256], sizes = [8, 128], strides = [1, 1]} : vector<8x512xf32> to vector<8x128xf32>
    %328 = arith.truncf %326 : vector<8x128xf32> to vector<8x128xbf16>
    %cst_79 = arith.constant dense<0.000000e+00> : vector<8x128xf32>
    %329 = tpu.matmul %328, %9, %cst_79 {dimension_numbers = #tpu.dot_dimension_numbers<[1], [0], [0], [1], [0, 0, 1, 1], [], []>} : vector<8x128xbf16>, vector<128x128xbf16>, vector<8x128xf32> -> vector<8x128xf32>
    %330 = arith.addf %327, %329 : vector<8x128xf32>
    %331 = arith.negf %330 : vector<8x128xf32>
    %332 = math.exp %331 : vector<8x128xf32>
    %cst_80 = arith.constant 1.000000e+00 : f32
    %333 = vector.broadcast %cst_80 : f32 to vector<8x128xf32>
    %334 = arith.addf %333, %332 : vector<8x128xf32>
    %335 = arith.divf %333, %334 : vector<8x128xf32>
    %336 = arith.mulf %335, %326 : vector<8x128xf32>
    %c0_81 = arith.constant 0 : index
    %c7 = arith.constant 7 : index
    %337 = vector.load %arg7[%c0_81, %c7] : memref<8x8xf32, #tpu.memory_space<vmem>>, vector<8x1xf32>
    %338 = vector.broadcast %337 : vector<8x1xf32> to vector<8x128xf32>
    %339 = arith.mulf %338, %336 : vector<8x128xf32>
    %340 = arith.addf %299, %339 : vector<8x128xf32>
    %c0_82 = arith.constant 0 : index
    %c0_83 = arith.constant 0 : index
    %341 = vector.load %arg8[%c0_82, %c0_83] : memref<8x128xf32, #tpu.memory_space<vmem>>, vector<8x128xf32>
    tpu.vector_store %arg8[%c0_82, %c0_83], %340 {strides = array<i32>} : memref<8x128xf32, #tpu.memory_space<vmem>>, vector<8x128xf32>,
    return
  }
  func.func @transform_0(%arg0: i32) -> (i32, i32) {
    %c0_i32 = arith.constant 0 : i32
    %c0_i32_0 = arith.constant 0 : i32
    %c0_i32_1 = arith.constant 0 : i32
    return %c0_i32, %c0_i32_0 : i32, i32
  }
  func.func @transform_1(%arg0: i32) -> (i32, i32) {
    %c0_i32 = arith.constant 0 : i32
    %c0_i32_0 = arith.constant 0 : i32
    %c0_i32_1 = arith.constant 0 : i32
    return %c0_i32, %c0_i32_0 : i32, i32
  }
  func.func @transform_2(%arg0: i32) -> (i32, i32) {
    %c0_i32 = arith.constant 0 : i32
    %c0_i32_0 = arith.constant 0 : i32
    %c0_i32_1 = arith.constant 0 : i32
    return %c0_i32, %c0_i32_0 : i32, i32
  }
  func.func @transform_3(%arg0: i32) -> (i32, i32) {
    %c0_i32 = arith.constant 0 : i32
    %c0_i32_0 = arith.constant 0 : i32
    %c0_i32_1 = arith.constant 0 : i32
    return %c0_i32, %c0_i32_0 : i32, i32
  }
  func.func @transform_4(%arg0: i32) -> (i32, i32) {
    %c0_i32 = arith.constant 0 : i32
    %c0_i32_0 = arith.constant 0 : i32
    %c0_i32_1 = arith.constant 0 : i32
    return %c0_i32, %c0_i32_0 : i32, i32
  }
  func.func @transform_5(%arg0: i32) -> (i32, i32) {
    %c0_i32 = arith.constant 0 : i32
    %c0_i32_0 = arith.constant 0 : i32
    %c0_i32_1 = arith.constant 0 : i32
    return %c0_i32, %c0_i32_0 : i32, i32
  }
  func.func @transform_6(%arg0: i32) -> (i32, i32) {
    %c0_i32 = arith.constant 0 : i32
    %c0_i32_0 = arith.constant 0 : i32
    %c0_i32_1 = arith.constant 0 : i32
    return %c0_i32, %c0_i32_0 : i32, i32
  }
  func.func @transform_7(%arg0: i32) -> (i32, i32) {
    %c0_i32 = arith.constant 0 : i32
    %c0_i32_0 = arith.constant 0 : i32
    %c0_i32_1 = arith.constant 0 : i32
    return %c0_i32, %c0_i32_0 : i32, i32
  }
}

</mosaic_0001>

<bundles_post_ra>
// kernel: tpu_custom_call.1
= control target key start
LH: loop header
LB: loop body
LE: loop exit
PB: predicated region body
PF: predicated region fallthrough
CT: control target
= control target key end

     0   :  { %12 = vsyncpa [#allocation4], 0  ;;  %s4573_s0 = inlined_call_operand.hbm [shape: bf16[64,256], index: 0, kind: input, shape index: {}]   ;;  %s4574_s1 = inlined_call_operand.hbm [shape: bf16[256,512], index: 1, kind: input, shape index: {}]   ;;  %s4575_s2 = inlined_call_operand.hbm [shape: bf16[128,512], index: 2, kind: input, shape index: {}]   ;;  %s4576_s3 = inlined_call_operand.hbm [shape: bf16[128,256], index: 3, kind: input, shape index: {}]   ;;  %s4577_s4 = inlined_call_operand.hbm [shape: bf16[128,128], index: 4, kind: input, shape index: {}]   ;;  %s4578_s5 = inlined_call_operand.vmem [shape: f32[1,512], index: 5, kind: input, shape index: {}]   ;;  %s4579_s6 = inlined_call_operand.hbm [shape: f32[8,8], index: 6, kind: input, shape index: {}]   ;;  %s4580_s7 = inlined_call_operand.hbm [shape: f32[8,128], index: 7, kind: output, shape index: {}]  }
   0x1   :  { %13 = vsyncpa [#allocation7], 0 }
   0x2   :  { %14 = vsyncpa [#allocation10], 0 }
   0x3   :  { %15 = vsyncpa [#allocation13], 0  ;;  %s34_s26 = sshll.u32 %s4574_s1, 4  ;;  %s35_s26 = int_to_ptr.hbm [resolvable:$true] %s34_s26 }
   0x4   :  { %16 = vsyncpa [#allocation5], 0  ;;  %s3569_s27 = smov [#allocation6]   ;;  %s3570_s29 = smov 256  }
   0x5   :  { %s36_s28 = sshll.u32 %s3569_s27, 4  ;;  %s3571_s30 = smov 16   ;;  %s37_s28 = int_to_ptr.vmem [resolvable:$true] %s36_s28 }
   0x6   :  { %42 = dma.hbm_to_vmem [thread:$0]  %s35_s26, 8192, %s37_s28, [#allocation7], %s3570_s29, %s3570_s29, %s3571_s30  }
   0x7   :  { %s60_s10 = sshll.u32 %s4576_s3, 4  ;;  %s3572_s11 = smov [#allocation9]   ;;  %s61_s10 = int_to_ptr.hbm [resolvable:$true] %s60_s10 }
   0x8   :  { %s62_s12 = sshll.u32 %s3572_s11, 4  ;;  %s21_s15 = sshll.u32 %s4573_s0, 4  ;;  %s63_s12 = int_to_ptr.vmem [resolvable:$true] %s62_s12  ;;  %s22_s15 = int_to_ptr.hbm [resolvable:$true] %s21_s15 }
   0x9   :  { %s3573_s1 = smov 128   ;;  %s3574_s16 = smov 8  }
   0xa   :  { %68 = dma.hbm_to_vmem [thread:$0]  %s61_s10, 2048, %s63_s12, [#allocation10], %s3573_s1, %s3573_s1, %s3574_s16  }
   0xb   :  { %s47_s19 = sshll.u32 %s4575_s2, 4  ;;  %s3575_s20 = smov [#allocation3]   ;;  %s48_s19 = int_to_ptr.hbm [resolvable:$true] %s47_s19 }
   0xc   :  { %s23_s21 = sshll.u32 %s3575_s20, 4  ;;  %s3576_s3 = smov [#allocation8]   ;;  %s24_s21 = int_to_ptr.vmem [resolvable:$true] %s23_s21 }
   0xd   :  { %29 = dma.hbm_to_vmem [thread:$0]  %s22_s15, 1024, %s24_s21, [#allocation4], %s3573_s1, %s3573_s1, %s3574_s16  }
   0xe   :  { %s49_s22 = sshll.u32 %s3576_s3, 4  ;;  %s73_s0 = sshll.u32 %s4577_s4, 4  ;;  %s50_s22 = int_to_ptr.vmem [resolvable:$true] %s49_s22  ;;  %s74_s0 = int_to_ptr.hbm [resolvable:$true] %s73_s0 }
   0xf   :  { %55 = dma.hbm_to_vmem [thread:$0]  %s48_s19, 4096, %s50_s22, [#allocation7], %s3570_s29, %s3570_s29, %s3571_s30  }
  0x10   :  { %s3577_s25 = smov [#allocation11]   ;;  %s89_s2 = sshll.u32 %s4579_s6, 4  ;;  %s90_s2 = int_to_ptr.hbm [resolvable:$true] %s89_s2 }
  0x11   :  { %s75_s26 = sshll.u32 %s3577_s25, 4  ;;  %s3578_s8 = smov 64   ;;  %s76_s26 = int_to_ptr.vmem [resolvable:$true] %s75_s26 }
  0x12   :  { %s3579_s9 = smov 4   ;;  %s3580_s10 = smov [#allocation12]  }
  0x13   :  { %81 = dma.hbm_to_vmem [thread:$0]  %s74_s0, 1024, %s76_s26, [#allocation10], %s3578_s8, %s3578_s8, %s3579_s9  }
  0x14   :  { %s91_s11 = sshll.u32 %s3580_s10, 4  ;;  %s92_s11 = int_to_ptr.vmem [resolvable:$true] %s91_s11 }
  0x15   :  { %94 = dma.hbm_to_vmem [thread:$0]  %s90_s2, 128, %s92_s11, [#allocation13]  }
  0x16   :  { %3559 = dma.done.wait [#allocation4], 1024  }
  0x17   :  { %3560 = vsyncadd [#allocation4], 4294966272 }
  0x18   :  { %3561 = dma.done.wait [#allocation7], 12288  }
  0x19   :  { %3562 = vsyncadd [#allocation7], 4294955008 }
  0x1a   :  { %3563 = dma.done.wait [#allocation10], 3072  }
  0x1b   :  { %3564 = vsyncadd [#allocation10], 4294964224 }
  0x1c   :  { %3565 = dma.done.wait [#allocation13], 128  }
  0x1d   :  { %3566 = vsyncadd [#allocation13], 4294967168  ;;  %v2722_v0 = vld [vmem:[#allocation6 + $0xe0] sm:$0xf]  ;;  %v3150_v1 = vld [vmem:[#allocation6 + $0xec] sm:$0xf0] }
  0x1e   :  { %v2850_v2 = vld [vmem:[#allocation6 + $0x1e0] sm:$0xf]  ;;  %v2723_v3 = vor.u32 %v3150_v1, %v2722_v0  ;;  %v3182_v4 = vld [vmem:[#allocation6 + $0x1ec] sm:$0xf0]  ;;  %v3148_v5 = vld [vmem:[#allocation6 + $0xe4] sm:$0xf] }
  0x1f   :  { %v2724_v6 = vld [vmem:[#allocation6 + $0xf0] sm:$0xf0]  ;;  %v2851_v7 = vor.u32 %v3182_v4, %v2850_v2  ;;  %v3180_v9 = vld [vmem:[#allocation6 + $0x1e4] sm:$0xf]  ;;  %v2706_v11 = vld [vmem:[#allocation6 + $0xc0] sm:$0xf] }
  0x20   :  { %v2727_v8 = vor.u32 %v3148_v5, %v2724_v6  ;;  %v2852_v10 = vld [vmem:[#allocation6 + $0x1f0] sm:$0xf0]  ;;  %562 = vmatpush.bf16.msra.mxu0 %v2723_v3  ;;  %v3146_v13 = vld [vmem:[#allocation6 + $0xcc] sm:$0xf0]  ;;  %v2834_v14 = vld [vmem:[#allocation6 + $0x1c0] sm:$0xf] }
  0x21   :  { %v2855_v12 = vor.u32 %v3180_v9, %v2852_v10  ;;  %v3178_v15 = vld [vmem:[#allocation6 + $0x1cc] sm:$0xf0]  ;;  %591 = vmatpush.bf16.msra.mxu1 %v2851_v7  ;;  %v2707_v16 = vor.u32 %v3146_v13, %v2706_v11  ;;  %v3144_v18 = vld [vmem:[#allocation6 + $0xc4] sm:$0xf]  ;;  %v2708_v19 = vld [vmem:[#allocation6 + $0xd0] sm:$0xf0] }
  0x22   :  { %620 = vmatpush.bf16.msra.mxu2 %v2727_v8  ;;  %v2835_v17 = vor.u32 %v3178_v15, %v2834_v14  ;;  %v3176_v20 = vld [vmem:[#allocation6 + $0x1c4] sm:$0xf]  ;;  %v2711_v21 = vor.u32 %v3144_v18, %v2708_v19  ;;  %v2836_v22 = vld [vmem:[#allocation6 + $0x1d0] sm:$0xf0]  ;;  %v2690_v23 = vld [vmem:[#allocation6 + $0xa0] sm:$0xf] }
  0x23   :  { %649 = vmatpush.bf16.msra.mxu3 %v2855_v12  ;;  %v3142_v24 = vld [vmem:[#allocation6 + $0xac] sm:$0xf0]  ;;  %v2839_v25 = vor.u32 %v3176_v20, %v2836_v22  ;;  %v2818_v26 = vld [vmem:[#allocation6 + $0x1a0] sm:$0xf]  ;;  %v3140_v28 = vld [vmem:[#allocation6 + $0xa4] sm:$0xf] }
  0x24   :  { %v3174_v27 = vld [vmem:[#allocation6 + $0x1ac] sm:$0xf0]  ;;  %563 = vmatpush.bf16.msra.mxu0 %v2707_v16  ;;  %v2691_v29 = vor.u32 %v3142_v24, %v2690_v23  ;;  %v2692_v30 = vld [vmem:[#allocation6 + $0xb0] sm:$0xf0]  ;;  %v3172_v31 = vld [vmem:[#allocation6 + $0x1a4] sm:$0xf] }
  0x25   :  { %v2820_v32 = vld [vmem:[#allocation6 + $0x1b0] sm:$0xf0]  ;;  %592 = vmatpush.bf16.msra.mxu1 %v2835_v17  ;;  %v2819_v33 = vor.u32 %v3174_v27, %v2818_v26  ;;  %v2695_v34 = vor.u32 %v3140_v28, %v2692_v30  ;;  %v2674_v35 = vld [vmem:[#allocation6 + $0x80] sm:$0xf]  ;;  %v3138_v36 = vld [vmem:[#allocation6 + $0x8c] sm:$0xf0] }
  0x26   :  { %621 = vmatpush.bf16.msra.mxu2 %v2711_v21  ;;  %v2802_v37 = vld [vmem:[#allocation6 + $0x180] sm:$0xf]  ;;  %v2823_v38 = vor.u32 %v3172_v31, %v2820_v32  ;;  %v3170_v39 = vld [vmem:[#allocation6 + $0x18c] sm:$0xf0]  ;;  %v3136_v40 = vld [vmem:[#allocation6 + $0x84] sm:$0xf]  ;;  %v2675_v44 = vor.u32 %v3138_v36, %v2674_v35 }
  0x27   :  { %650 = vmatpush.bf16.msra.mxu3 %v2839_v25  ;;  %v2676_v41 = vld [vmem:[#allocation6 + $0x90] sm:$0xf0]  ;;  %v3168_v42 = vld [vmem:[#allocation6 + $0x184] sm:$0xf]  ;;  %v2803_v45 = vor.u32 %v3170_v39, %v2802_v37  ;;  %v2658_v47 = vld [vmem:[#allocation6 + $0x60] sm:$0xf] }
  0x28   :  { %v2804_v43 = vld [vmem:[#allocation6 + $0x190] sm:$0xf0]  ;;  %564 = vmatpush.bf16.msra.mxu0 %v2691_v29  ;;  %v2679_v46 = vor.u32 %v3136_v40, %v2676_v41  ;;  %v3134_v48 = vld [vmem:[#allocation6 + $0x6c] sm:$0xf0]  ;;  %v2786_v49 = vld [vmem:[#allocation6 + $0x160] sm:$0xf] }
  0x29   :  { %593 = vmatpush.bf16.msra.mxu1 %v2819_v33  ;;  %v2807_v50 = vor.u32 %v3168_v42, %v2804_v43  ;;  %v3166_v51 = vld [vmem:[#allocation6 + $0x16c] sm:$0xf0]  ;;  %v3132_v52 = vld [vmem:[#allocation6 + $0x64] sm:$0xf]  ;;  %v2660_v53 = vld [vmem:[#allocation6 + $0x70] sm:$0xf0]  ;;  %v2659_v56 = vor.u32 %v3134_v48, %v2658_v47 }
  0x2a   :  { %622 = vmatpush.bf16.msra.mxu2 %v2695_v34  ;;  %v3164_v54 = vld [vmem:[#allocation6 + $0x164] sm:$0xf]  ;;  %v2788_v55 = vld [vmem:[#allocation6 + $0x170] sm:$0xf0]  ;;  %v2787_v57 = vor.u32 %v3166_v51, %v2786_v49  ;;  %v2663_v58 = vor.u32 %v3132_v52, %v2660_v53  ;;  %v2642_v59 = vld [vmem:[#allocation6 + $0x40] sm:$0xf] }
  0x2b   :  { %651 = vmatpush.bf16.msra.mxu3 %v2823_v38  ;;  %v3130_v60 = vld [vmem:[#allocation6 + $0x4c] sm:$0xf0]  ;;  %v2770_v61 = vld [vmem:[#allocation6 + $0x140] sm:$0xf]  ;;  %v2791_v62 = vor.u32 %v3164_v54, %v2788_v55  ;;  %v3128_v0 = vld [vmem:[#allocation6 + $0x44] sm:$0xf] }
  0x2c   :  { %565 = vmatpush.bf16.msra.mxu0 %v2675_v44  ;;  %v3162_v63 = vld [vmem:[#allocation6 + $0x14c] sm:$0xf0]  ;;  %v2644_v1 = vld [vmem:[#allocation6 + $0x50] sm:$0xf0]  ;;  %v3160_v2 = vld [vmem:[#allocation6 + $0x144] sm:$0xf]  ;;  %v2643_v4 = vor.u32 %v3130_v60, %v2642_v59 }
  0x2d   :  { %594 = vmatpush.bf16.msra.mxu1 %v2803_v45  ;;  %v2772_v3 = vld [vmem:[#allocation6 + $0x150] sm:$0xf0]  ;;  %v2771_v5 = vor.u32 %v3162_v63, %v2770_v61  ;;  %v2647_v6 = vor.u32 %v3128_v0, %v2644_v1  ;;  %v2626_v7 = vld [vmem:[#allocation6 + $0x20] sm:$0xf]  ;;  %v3126_v8 = vld [vmem:[#allocation6 + $0x2c] sm:$0xf0] }
  0x2e   :  { %623 = vmatpush.bf16.msra.mxu2 %v2679_v46  ;;  %v2754_v9 = vld [vmem:[#allocation6 + $0x120] sm:$0xf]  ;;  %v2775_v10 = vor.u32 %v3160_v2, %v2772_v3  ;;  %v3158_v11 = vld [vmem:[#allocation6 + $0x12c] sm:$0xf0]  ;;  %v3124_v12 = vld [vmem:[#allocation6 + $0x24] sm:$0xf]  ;;  %v2627_v16 = vor.u32 %v3126_v8, %v2626_v7 }
  0x2f   :  { %652 = vmatpush.bf16.msra.mxu3 %v2807_v50  ;;  %v2628_v13 = vld [vmem:[#allocation6 + $0x30] sm:$0xf0]  ;;  %v3156_v14 = vld [vmem:[#allocation6 + $0x124] sm:$0xf]  ;;  %v2610_v17 = vld [vmem:[#allocation6] sm:$0xf]  ;;  %v2755_v19 = vor.u32 %v3158_v11, %v2754_v9 }
  0x30   :  { %566 = vmatpush.bf16.msra.mxu0 %v2659_v56  ;;  %v2756_v15 = vld [vmem:[#allocation6 + $0x130] sm:$0xf0]  ;;  %v3122_v18 = vld [vmem:[#allocation6 + $0xc] sm:$0xf0]  ;;  %v2631_v20 = vor.u32 %v3124_v12, %v2628_v13  ;;  %v2738_v21 = vld [vmem:[#allocation6 + $0x100] sm:$0xf] }
  0x31   :  { %595 = vmatpush.bf16.msra.mxu1 %v2787_v57  ;;  %v3154_v22 = vld [vmem:[#allocation6 + $0x10c] sm:$0xf0]  ;;  %v3120_v23 = vld [vmem:[#allocation6 + $0x4] sm:$0xf]  ;;  %v2759_v24 = vor.u32 %v3156_v14, %v2756_v15  ;;  %v2612_v25 = vld [vmem:[#allocation6 + $0x10] sm:$0xf0]  ;;  %v2611_v31 = vor.u32 %v3122_v18, %v2610_v17 }
  0x32   :  { %624 = vmatpush.bf16.msra.mxu2 %v2663_v58  ;;  %v3152_v26 = vld [vmem:[#allocation6 + $0x104] sm:$0xf]  ;;  %v2740_v27 = vld [vmem:[#allocation6 + $0x110] sm:$0xf0]  ;;  %v2578_v28 = vld [vmem:[#allocation3] sm:$0xf]  ;;  %v2739_v35 = vor.u32 %v3154_v22, %v2738_v21  ;;  %v2615_v36 = vor.u32 %v3120_v23, %v2612_v25 }
  0x33   :  { %653 = vmatpush.bf16.msra.mxu3 %v2791_v62  ;;  %v2730_v29 = vld [vmem:[#allocation6 + $0xe8] sm:$0xf]  ;;  %v3151_v30 = vld [vmem:[#allocation6 + $0xf4] sm:$0xf0]  ;;  %v3112_v37 = vld [vmem:[#allocation3 + $0x4] sm:$0xf]  ;;  %v2743_v39 = vor.u32 %v3152_v26, %v2740_v27 }
  0x34   :  { %567 = vmatpush.bf16.msra.mxu0 %v2643_v4  ;;  %v3113_v32 = vld [vmem:[#allocation3 + $0x4] sm:$0xf0]  ;;  %v3183_v34 = vld [vmem:[#allocation6 + $0x1f4] sm:$0xf0]  ;;  %v2580_v38 = vld [vmem:[#allocation3 + $0x8] sm:$0xf0]  ;;  %v2731_v40 = vor.u32 %v3151_v30, %v2730_v29 }
  0x35   :  { %596 = vmatpush.bf16.msra.mxu1 %v2771_v5  ;;  %v2858_v33 = vld [vmem:[#allocation6 + $0x1e8] sm:$0xf]  ;;  %v3648_v42 = vor.u32 %v3113_v32, %v2578_v28  ;;  %v3147_v44 = vld [vmem:[#allocation6 + $0xd4] sm:$0xf0]  ;;  %v3181_v45 = vld [vmem:[#allocation6 + $0x1ec] sm:$0xf]  ;;  %v3650_v47 = vor.u32 %v3112_v37, %v2580_v38 }
  0x36   :  { %625 = vmatpush.bf16.msra.mxu2 %v2647_v6  ;;  %v2714_v41 = vld [vmem:[#allocation6 + $0xc8] sm:$0xf]  ;;  %v2859_v43 = vor.u32 %v3183_v34, %v2858_v33  ;;  %v2860_v46 = vld [vmem:[#allocation6 + $0x1f8] sm:$0xf0]  ;;  %v3179_v49 = vld [vmem:[#allocation6 + $0x1d4] sm:$0xf0] }
  0x37   :  { %654 = vmatpush.bf16.msra.mxu3 %v2775_v10  ;;  %v2842_v48 = vld [vmem:[#allocation6 + $0x1c8] sm:$0xf]  ;;  %v2715_v50 = vor.u32 %v3147_v44, %v2714_v41  ;;  %v2863_v52 = vor.u32 %v3181_v45, %v2860_v46  ;;  %v3143_v54 = vld [vmem:[#allocation6 + $0xb4] sm:$0xf0]  ;;  %v3149_v55 = vld [vmem:[#allocation6 + $0xec] sm:$0xf] }
  0x38   :  { %568 = vmatpush.bf16.msra.mxu0 %v2627_v16  ;;  %v2698_v51 = vld [vmem:[#allocation6 + $0xa8] sm:$0xf]  ;;  %v2843_v53 = vor.u32 %v3179_v49, %v2842_v48  ;;  %v2732_v56 = vld [vmem:[#allocation6 + $0xf8] sm:$0xf0]  ;;  %v3175_v58 = vld [vmem:[#allocation6 + $0x1b4] sm:$0xf0] }
  0x39   :  { %597 = vmatpush.bf16.msra.mxu1 %v2755_v19  ;;  %v2826_v57 = vld [vmem:[#allocation6 + $0x1a8] sm:$0xf]  ;;  %v2735_v59 = vor.u32 %v3149_v55, %v2732_v56  ;;  %v2699_v60 = vor.u32 %v3143_v54, %v2698_v51  ;;  %v3145_v62 = vld [vmem:[#allocation6 + $0xcc] sm:$0xf]  ;;  %v2716_v63 = vld [vmem:[#allocation6 + $0xd8] sm:$0xf0] }
  0x3a   :  { %626 = vmatpush.bf16.msra.mxu2 %v2631_v20  ;;  %v2682_v61 = vld [vmem:[#allocation6 + $0x88] sm:$0xf]  ;;  %v2827_v0 = vor.u32 %v3175_v58, %v2826_v57  ;;  %v3139_v1 = vld [vmem:[#allocation6 + $0x94] sm:$0xf0]  ;;  %v2719_v2 = vor.u32 %v3145_v62, %v2716_v63  ;;  %v3177_v3 = vld [vmem:[#allocation6 + $0x1cc] sm:$0xf] }
  0x3b   :  { %655 = vmatpush.bf16.msra.mxu3 %v2759_v24  ;;  %v2844_v4 = vld [vmem:[#allocation6 + $0x1d8] sm:$0xf0]  ;;  %v2810_v5 = vld [vmem:[#allocation6 + $0x188] sm:$0xf]  ;;  %v3171_v6 = vld [vmem:[#allocation6 + $0x194] sm:$0xf0]  ;;  %v2683_v12 = vor.u32 %v3139_v1, %v2682_v61 }
  0x3c   :  { %569 = vmatpush.bf16.msra.mxu0 %v2611_v31  ;;  %v2847_v7 = vor.u32 %v3177_v3, %v2844_v4  ;;  %v3141_v8 = vld [vmem:[#allocation6 + $0xac] sm:$0xf]  ;;  %v2700_v9 = vld [vmem:[#allocation6 + $0xb8] sm:$0xf0]  ;;  %v2586_v11 = vld [vmem:[#allocation3 + $0x10] sm:$0xf]  ;;  %v2811_v15 = vor.u32 %v3171_v6, %v2810_v5 }
  0x3d   :  { %598 = vmatpush.bf16.msra.mxu1 %v2739_v35  ;;  %v3173_v10 = vld [vmem:[#allocation6 + $0x1ac] sm:$0xf]  ;;  %v2666_v13 = vld [vmem:[#allocation6 + $0x68] sm:$0xf]  ;;  %v2828_v14 = vld [vmem:[#allocation6 + $0x1b8] sm:$0xf0]  ;;  %v2703_v17 = vor.u32 %v3141_v8, %v2700_v9 }
  0x3e   :  { %627 = vmatpush.bf16.msra.mxu2 %v2615_v36  ;;  %v3135_v16 = vld [vmem:[#allocation6 + $0x74] sm:$0xf0]  ;;  %v2831_v18 = vor.u32 %v3173_v10, %v2828_v14  ;;  %v3169_v19 = vld [vmem:[#allocation6 + $0x18c] sm:$0xf]  ;;  %v2812_v20 = vld [vmem:[#allocation6 + $0x198] sm:$0xf0] }
  0x3f   :  { %656 = vmatpush.bf16.msra.mxu3 %v2743_v39  ;;  %570 = vmatmul.bf16.vlgmr.msra.gmra.mxu0 %v3648_v42  ;;  %v3115_v21 = vld [vmem:[#allocation3 + $0x14] sm:$0xf0]  ;;  %v2794_v22 = vld [vmem:[#allocation6 + $0x168] sm:$0xf]  ;;  %v3114_v24 = vld [vmem:[#allocation3 + $0x14] sm:$0xf]  ;;  %v2667_v26 = vor.u32 %v3135_v16, %v2666_v13  ;;  %v2815_v29 = vor.u32 %v3169_v19, %v2812_v20 }
  0x40   :  { %678 = vmatpush.bf16.msrb.mxu0 %v2731_v40  ;;  %599 = vmatmul.bf16.vlgmr.msra.gmra.mxu1 %v3650_v47  ;;  %v3167_v23 = vld [vmem:[#allocation6 + $0x174] sm:$0xf0]  ;;  %v2588_v25 = vld [vmem:[#allocation3 + $0x18] sm:$0xf0]  ;;  %v3137_v27 = vld [vmem:[#allocation6 + $0x8c] sm:$0xf]  ;;  %v3656_v30 = vor.u32 %v3115_v21, %v2586_v11 }
  0x41   :  { %707 = vmatpush.bf16.msrb.mxu1 %v2859_v43  ;;  %628 = vmatmul.bf16.vlgmr.msra.gmra.mxu2 %v3648_v42  ;;  %v2684_v28 = vld [vmem:[#allocation6 + $0x98] sm:$0xf0]  ;;  %v2795_v31 = vor.u32 %v3167_v23, %v2794_v22  ;;  %v2650_v32 = vld [vmem:[#allocation6 + $0x48] sm:$0xf]  ;;  %v3131_v33 = vld [vmem:[#allocation6 + $0x54] sm:$0xf0]  ;;  %v3658_v34 = vor.u32 %v3114_v24, %v2588_v25 }
  0x42   :  { %657 = vmatmul.bf16.vlgmr.msra.gmra.mxu3 %v3650_v47  ;;  %736 = vmatpush.bf16.msrb.mxu2 %v2735_v59  ;;  %v2778_v35 = vld [vmem:[#allocation6 + $0x148] sm:$0xf]  ;;  %v3163_v36 = vld [vmem:[#allocation6 + $0x154] sm:$0xf0]  ;;  %v2687_v37 = vor.u32 %v3137_v27, %v2684_v28  ;;  %v2651_v38 = vor.u32 %v3131_v33, %v2650_v32  ;;  %v3133_v40 = vld [vmem:[#allocation6 + $0x6c] sm:$0xf] }
  0x43   :  { %765 = vmatpush.bf16.msrb.mxu3 %v2863_v52  ;;  %v2779_v39 = vor.u32 %v3163_v36, %v2778_v35  ;;  %v2668_v41 = vld [vmem:[#allocation6 + $0x78] sm:$0xf0]  ;;  %v3165_v43 = vld [vmem:[#allocation6 + $0x16c] sm:$0xf]  ;;  %v2634_v45 = vld [vmem:[#allocation6 + $0x28] sm:$0xf] }
  0x44   :  { %679 = vmatpush.bf16.msrb.mxu0 %v2715_v50  ;;  %v2796_v44 = vld [vmem:[#allocation6 + $0x178] sm:$0xf0]  ;;  %v3127_v46 = vld [vmem:[#allocation6 + $0x34] sm:$0xf0]  ;;  %v2762_v48 = vld [vmem:[#allocation6 + $0x128] sm:$0xf]  ;;  %v2671_v49 = vor.u32 %v3133_v40, %v2668_v41 }
  0x45   :  { %708 = vmatpush.bf16.msrb.mxu1 %v2843_v53  ;;  %v2799_v50 = vor.u32 %v3165_v43, %v2796_v44  ;;  %v2635_v51 = vor.u32 %v3127_v46, %v2634_v45  ;;  %v3159_v52 = vld [vmem:[#allocation6 + $0x134] sm:$0xf0]  ;;  %v3129_v53 = vld [vmem:[#allocation6 + $0x4c] sm:$0xf]  ;;  %v2652_v54 = vld [vmem:[#allocation6 + $0x58] sm:$0xf0] }
  0x46   :  { %737 = vmatpush.bf16.msrb.mxu2 %v2719_v2  ;;  %v2763_v55 = vor.u32 %v3159_v52, %v2762_v48  ;;  %v3161_v56 = vld [vmem:[#allocation6 + $0x14c] sm:$0xf]  ;;  %v2780_v57 = vld [vmem:[#allocation6 + $0x158] sm:$0xf0]  ;;  %v2618_v58 = vld [vmem:[#allocation6 + $0x8] sm:$0xf]  ;;  %v2655_v63 = vor.u32 %v3129_v53, %v2652_v54 }
  0x47   :  { %766 = vmatpush.bf16.msrb.mxu3 %v2847_v7  ;;  %v2783_v59 = vor.u32 %v3161_v56, %v2780_v57  ;;  %v2746_v61 = vld [vmem:[#allocation6 + $0x108] sm:$0xf]  ;;  %v3155_v62 = vld [vmem:[#allocation6 + $0x114] sm:$0xf0]  ;;  %v3125_v2 = vld [vmem:[#allocation6 + $0x2c] sm:$0xf] }
  0x48   :  { %680 = vmatpush.bf16.msrb.mxu0 %v2699_v60  ;;  %v3123_v60 = vld [vmem:[#allocation6 + $0x14] sm:$0xf0]  ;;  %v2636_v3 = vld [vmem:[#allocation6 + $0x38] sm:$0xf0]  ;;  %v2594_v5 = vld [vmem:[#allocation3 + $0x20] sm:$0xf]  ;;  %v2747_v6 = vor.u32 %v3155_v62, %v2746_v61 }
  0x49   :  { %709 = vmatpush.bf16.msrb.mxu1 %v2827_v0  ;;  %v3157_v0 = vld [vmem:[#allocation6 + $0x12c] sm:$0xf]  ;;  %v2619_v1 = vor.u32 %v3123_v60, %v2618_v58  ;;  %v2764_v4 = vld [vmem:[#allocation6 + $0x138] sm:$0xf0]  ;;  %v3117_v8 = vld [vmem:[#allocation3 + $0x24] sm:$0xf0]  ;;  %v2639_v13 = vor.u32 %v3125_v2, %v2636_v3 }
  0x4a   :  { %738 = vmatpush.bf16.msrb.mxu2 %v2703_v17  ;;  %v2767_v7 = vor.u32 %v3157_v0, %v2764_v4  ;;  %v3153_v9 = vld [vmem:[#allocation6 + $0x10c] sm:$0xf]  ;;  %v2748_v10 = vld [vmem:[#allocation6 + $0x118] sm:$0xf0]  ;;  %v3116_v11 = vld [vmem:[#allocation3 + $0x24] sm:$0xf]  ;;  %v3664_v16 = vor.u32 %v3117_v8, %v2594_v5 }
  0x4b   :  { %767 = vmatpush.bf16.msrb.mxu3 %v2831_v18  ;;  %v3121_v14 = vld [vmem:[#allocation6 + $0xc] sm:$0xf]  ;;  %v2751_v17 = vor.u32 %v3153_v9, %v2748_v10  ;;  %v2978_v20 = vld [vmem:[#allocation8 + $0xe0] sm:$0xf]  ;;  %v3214_v21 = vld [vmem:[#allocation8 + $0xec] sm:$0xf0] }
  0x4c   :  { %681 = vmatpush.bf16.msrb.mxu0 %v2683_v12  ;;  %v2596_v12 = vld [vmem:[#allocation3 + $0x28] sm:$0xf0]  ;;  %v3212_v22 = vld [vmem:[#allocation8 + $0xe4] sm:$0xf]  ;;  %v3672_v23 = vor.u32 %v3214_v21, %v2978_v20  ;;  %v2980_v24 = vld [vmem:[#allocation8 + $0xf0] sm:$0xf0] }
  0x4d   :  { %710 = vmatpush.bf16.msrb.mxu1 %v2811_v15  ;;  %v2620_v15 = vld [vmem:[#allocation6 + $0x18] sm:$0xf0]  ;;  %v3666_v18 = vor.u32 %v3116_v11, %v2596_v12  ;;  %v2962_v25 = vld [vmem:[#allocation8 + $0xc0] sm:$0xf]  ;;  %v3674_v27 = vor.u32 %v3212_v22, %v2980_v24  ;;  %v3208_v28 = vld [vmem:[#allocation8 + $0xc4] sm:$0xf] }
  0x4e   :  { %739 = vmatpush.bf16.msrb.mxu2 %v2687_v37  ;;  %v2623_v19 = vor.u32 %v3121_v14, %v2620_v15  ;;  %v2602_v33 = vld [vmem:[#allocation3 + $0x30] sm:$0xf]  ;;  %v3119_v35 = vld [vmem:[#allocation3 + $0x34] sm:$0xf0]  ;;  %v3118_v36 = vld [vmem:[#allocation3 + $0x34] sm:$0xf] }
  0x4f   :  { %768 = vmatpush.bf16.msrb.mxu3 %v2815_v29  ;;  %575 = vmatmul.bf16.gmra.mxu0 %v3656_v30  ;;  %v2964_v29 = vld [vmem:[#allocation8 + $0xd0] sm:$0xf0]  ;;  %v2604_v37 = vld [vmem:[#allocation3 + $0x38] sm:$0xf0]  ;;  %v2946_v40 = vld [vmem:[#allocation8 + $0xa0] sm:$0xf] }
  0x50   :  { %682 = vmatpush.bf16.msrb.mxu0 %v2667_v26  ;;  %604 = vmatmul.bf16.gmra.mxu1 %v3658_v34  ;;  %v3210_v26 = vld [vmem:[#allocation8 + $0xcc] sm:$0xf0]  ;;  %v3680_v32 = vor.u32 %v3208_v28, %v2964_v29  ;;  %v3204_v43 = vld [vmem:[#allocation8 + $0xa4] sm:$0xf]  ;;  %v2948_v45 = vld [vmem:[#allocation8 + $0xb0] sm:$0xf0] }
  0x51   :  { %711 = vmatpush.bf16.msrb.mxu1 %v2795_v31  ;;  %633 = vmatmul.bf16.gmra.mxu2 %v3656_v30  ;;  %v3677_v31 = vor.u32 %v3210_v26, %v2962_v25  ;;  %v3206_v41 = vld [vmem:[#allocation8 + $0xac] sm:$0xf0]  ;;  %v2930_v46 = vld [vmem:[#allocation8 + $0x80] sm:$0xf]  ;;  %v3213_v52 = vld [vmem:[#allocation8 + $0xec] sm:$0xf] }
  0x52   :  { %662 = vmatmul.bf16.gmra.mxu3 %v3658_v34  ;;  %740 = vmatpush.bf16.msrb.mxu2 %v2671_v49  ;;  %v3692_v44 = vor.u32 %v3206_v41, %v2946_v40  ;;  %v3202_v48 = vld [vmem:[#allocation8 + $0x8c] sm:$0xf0]  ;;  %v3694_v49 = vor.u32 %v3204_v43, %v2948_v45  ;;  %v2988_v54 = vld [vmem:[#allocation8 + $0xf8] sm:$0xf0]  ;;  %v2986_v57 = vld [vmem:[#allocation8 + $0xe8] sm:$0xf] }
  0x53   :  { %769 = vmatpush.bf16.msrb.mxu3 %v2799_v50  ;;  %v3200_v50 = vld [vmem:[#allocation8 + $0x84] sm:$0xf]  ;;  %v3697_v53 = vor.u32 %v3202_v48, %v2930_v46  ;;  %v3702_v56 = vor.u32 %v3213_v52, %v2988_v54  ;;  %v3215_v58 = vld [vmem:[#allocation8 + $0xf4] sm:$0xf0]  ;;  %v2914_v60 = vld [vmem:[#allocation8 + $0x60] sm:$0xf] }
  0x54   :  { %683 = vmatpush.bf16.msrb.mxu0 %v2651_v38  ;;  %v3684_v38 = vor.u32 %v3119_v35, %v2602_v33  ;;  %v3198_v61 = vld [vmem:[#allocation8 + $0x6c] sm:$0xf0]  ;;  %v3196_v62 = vld [vmem:[#allocation8 + $0x64] sm:$0xf]  ;;  %v2916_v0 = vld [vmem:[#allocation8 + $0x70] sm:$0xf0] }
  0x55   :  { %712 = vmatpush.bf16.msrb.mxu1 %v2779_v39  ;;  %v3686_v39 = vor.u32 %v3118_v36, %v2604_v37  ;;  %v3211_v2 = vld [vmem:[#allocation8 + $0xd4] sm:$0xf0]  ;;  %v3716_v3 = vor.u32 %v3196_v62, %v2916_v0  ;;  %v3209_v5 = vld [vmem:[#allocation8 + $0xcc] sm:$0xf]  ;;  %v3192_v8 = vld [vmem:[#allocation8 + $0x44] sm:$0xf] }
  0x56   :  { %741 = vmatpush.bf16.msrb.mxu2 %v2655_v63  ;;  %v3713_v63 = vor.u32 %v3198_v61, %v2914_v60  ;;  %v2900_v9 = vld [vmem:[#allocation8 + $0x50] sm:$0xf0]  ;;  %v2954_v12 = vld [vmem:[#allocation8 + $0xa8] sm:$0xf]  ;;  %v3205_v14 = vld [vmem:[#allocation8 + $0xac] sm:$0xf] }
  0x57   :  { %770 = vmatpush.bf16.msrb.mxu3 %v2783_v59  ;;  %v3710_v59 = vor.u32 %v3215_v58, %v2986_v57  ;;  %v3726_v11 = vor.u32 %v3192_v8, %v2900_v9  ;;  %v3190_v20 = vld [vmem:[#allocation8 + $0x2c] sm:$0xf0]  ;;  %v3188_v22 = vld [vmem:[#allocation8 + $0x24] sm:$0xf]  ;;  %v2884_v24 = vld [vmem:[#allocation8 + $0x30] sm:$0xf0] }
  0x58   :  { %684 = vmatpush.bf16.msrb.mxu0 %v2635_v51  ;;  %v2932_v51 = vld [vmem:[#allocation8 + $0x90] sm:$0xf0]  ;;  %v2938_v25 = vld [vmem:[#allocation8 + $0x88] sm:$0xf]  ;;  %v3203_v28 = vld [vmem:[#allocation8 + $0x94] sm:$0xf0]  ;;  %v3738_v35 = vor.u32 %v3188_v22, %v2884_v24 }
  0x59   :  { %713 = vmatpush.bf16.msrb.mxu1 %v2763_v55  ;;  %v3700_v55 = vor.u32 %v3200_v50, %v2932_v51  ;;  %v3201_v29 = vld [vmem:[#allocation8 + $0x8c] sm:$0xf]  ;;  %v2940_v33 = vld [vmem:[#allocation8 + $0x98] sm:$0xf0]  ;;  %v3742_v36 = vor.u32 %v3203_v28, %v2938_v25  ;;  %v2866_v40 = vld [vmem:[#allocation8] sm:$0xf] }
  0x5a   :  { %742 = vmatpush.bf16.msrb.mxu2 %v2639_v13  ;;  %v3207_v13 = vld [vmem:[#allocation8 + $0xb4] sm:$0xf0]  ;;  %v3744_v37 = vor.u32 %v3201_v29, %v2940_v33  ;;  %v3186_v41 = vld [vmem:[#allocation8 + $0xc] sm:$0xf0]  ;;  %v3184_v43 = vld [vmem:[#allocation8 + $0x4] sm:$0xf] }
  0x5b   :  { %771 = vmatpush.bf16.msrb.mxu3 %v2767_v7  ;;  %v3194_v7 = vld [vmem:[#allocation8 + $0x4c] sm:$0xf0]  ;;  %v3730_v15 = vor.u32 %v3207_v13, %v2954_v12  ;;  %v3751_v45 = vor.u32 %v3186_v41, %v2866_v40  ;;  %v2868_v46 = vld [vmem:[#allocation8 + $0x10] sm:$0xf0]  ;;  %v2922_v48 = vld [vmem:[#allocation8 + $0x68] sm:$0xf] }
  0x5c   :  { %685 = vmatpush.bf16.msrb.mxu0 %v2619_v1  ;;  %v2970_v1 = vld [vmem:[#allocation8 + $0xc8] sm:$0xf]  ;;  %v3199_v50 = vld [vmem:[#allocation8 + $0x74] sm:$0xf0]  ;;  %v3755_v51 = vor.u32 %v3184_v43, %v2868_v46  ;;  %v3197_v54 = vld [vmem:[#allocation8 + $0x6c] sm:$0xf] }
  0x5d   :  { %714 = vmatpush.bf16.msrb.mxu1 %v2747_v6  ;;  %v3718_v4 = vor.u32 %v3211_v2, %v2970_v1  ;;  %v2898_v6 = vld [vmem:[#allocation8 + $0x40] sm:$0xf]  ;;  %v3757_v52 = vor.u32 %v3199_v50, %v2922_v48  ;;  %v2924_v57 = vld [vmem:[#allocation8 + $0x78] sm:$0xf0]  ;;  %v3050_v58 = vld [vmem:[#allocation9 + $0x70] sm:$0xf] }
  0x5e   :  { %743 = vmatpush.bf16.msrb.mxu2 %v2623_v19  ;;  %v3724_v10 = vor.u32 %v3194_v7, %v2898_v6  ;;  %v2882_v19 = vld [vmem:[#allocation8 + $0x20] sm:$0xf]  ;;  %v3761_v60 = vor.u32 %v3197_v54, %v2924_v57  ;;  %v3231_v61 = vld [vmem:[#allocation9 + $0x74] sm:$0xf0]  ;;  %v3230_v62 = vld [vmem:[#allocation9 + $0x74] sm:$0xf] }
  0x5f   :  { %580 = vmatmul.bf16.gmra.mxu0 %v3664_v16  ;;  %772 = vmatpush.bf16.msrb.mxu3 %v2751_v17  ;;  %v2956_v17 = vld [vmem:[#allocation8 + $0xb8] sm:$0xf0]  ;;  %v3735_v26 = vor.u32 %v3190_v20, %v2882_v19  ;;  %v2906_v2 = vld [vmem:[#allocation8 + $0x48] sm:$0xf]  ;;  %v3042_v7 = vld [vmem:[#allocation9 + $0x60] sm:$0xf] }
  0x60   :  { %609 = vmatmul.bf16.gmra.mxu1 %v3666_v18  ;;  %1054 = vmatpush.bf16.msra.mxu0 %v3672_v23  ;;  %v3732_v21 = vor.u32 %v3205_v14, %v2956_v17  ;;  %v3052_v0 = vld [vmem:[#allocation9 + $0x78] sm:$0xf0]  ;;  %v3229_v8 = vld [vmem:[#allocation9 + $0x64] sm:$0xf0]  ;;  %v3228_v13 = vld [vmem:[#allocation9 + $0x64] sm:$0xf] }
  0x61   :  { %638 = vmatmul.bf16.gmra.mxu2 %v3664_v16  ;;  %1067 = vmatpush.bf16.msra.mxu1 %v3674_v27  ;;  %v3767_v1 = vor.u32 %v3230_v62, %v3052_v0  ;;  %v2908_v6 = vld [vmem:[#allocation8 + $0x58] sm:$0xf0]  ;;  %v3776_v12 = vor.u32 %v3229_v8, %v3042_v7  ;;  %v3044_v14 = vld [vmem:[#allocation9 + $0x68] sm:$0xf0]  ;;  %v2890_v17 = vld [vmem:[#allocation8 + $0x28] sm:$0xf] }
  0x62   :  { %667 = vmatmul.bf16.gmra.mxu3 %v3666_v18  ;;  %1080 = vmatpush.bf16.msra.mxu2 %v3710_v59  ;;  %v3778_v19 = vor.u32 %v3228_v13, %v3044_v14  ;;  %v3191_v20 = vld [vmem:[#allocation8 + $0x34] sm:$0xf0]  ;;  %v3189_v22 = vld [vmem:[#allocation8 + $0x2c] sm:$0xf]  ;;  %v2892_v24 = vld [vmem:[#allocation8 + $0x38] sm:$0xf0] }
  0x63   :  { %1093 = vmatpush.bf16.msra.mxu3 %v3702_v56  ;;  %4652 = vst [vmem:[#allocation20_spill] sm:$0xff] %v3767_v1  ;;  %v3781_v25 = vor.u32 %v3191_v20, %v2890_v17  ;;  %v3034_v28 = vld [vmem:[#allocation9 + $0x50] sm:$0xf]  ;;  %v3227_v29 = vld [vmem:[#allocation9 + $0x54] sm:$0xf0]  ;;  %v3784_v40 = vor.u32 %v3189_v22, %v2892_v24  ;;  %v3581_v22 = vmov 0  }
  0x64   :  { %1055 = vmatpush.bf16.msra.mxu0 %v3677_v31  ;;  %4653 = vst [vmem:[#allocation21_spill] sm:$0xff] %v3778_v19  ;;  %v3226_v33 = vld [vmem:[#allocation9 + $0x54] sm:$0xf]  ;;  %v3036_v41 = vld [vmem:[#allocation9 + $0x58] sm:$0xf0]  ;;  %v3788_v43 = vor.u32 %v3227_v29, %v3034_v28  ;;  %3261 = vset.pattern.permute.xlu0 %v3581_v22  ;;  %s2563_s13 = sshll.u32 %s4580_s7, 4  ;;  %s2564_s13 = int_to_ptr.hbm [resolvable:$true] %s2563_s13 }
  0x65   :  { %1068 = vmatpush.bf16.msra.mxu1 %v3680_v32  ;;  %v3790_v46 = vor.u32 %v3226_v33, %v3036_v41  ;;  %v2874_v48 = vld [vmem:[#allocation8 + $0x8] sm:$0xf]  ;;  %v3187_v50 = vld [vmem:[#allocation8 + $0x14] sm:$0xf0]  ;;  %v3185_v54 = vld [vmem:[#allocation8 + $0xc] sm:$0xf] }
  0x66   :  { %1081 = vmatpush.bf16.msra.mxu2 %v3718_v4  ;;  %v3796_v57 = vor.u32 %v3187_v50, %v2874_v48  ;;  %v3225_v62 = vld [vmem:[#allocation9 + $0x44] sm:$0xf0]  ;;  %v3018_v7 = vld [vmem:[#allocation9 + $0x30] sm:$0xf]  ;;  %v3223_v8 = vld [vmem:[#allocation9 + $0x34] sm:$0xf0] }
  0x67   :  { %4654 = vst [vmem:[#allocation22_spill] sm:$0xff] %v3790_v46  ;;  %v3222_v13 = vld [vmem:[#allocation9 + $0x34] sm:$0xf]  ;;  %v3020_v14 = vld [vmem:[#allocation9 + $0x38] sm:$0xf0]  ;;  %v3811_v17 = vor.u32 %v3223_v8, %v3018_v7 }
  0x68   :  { %1056 = vmatpush.bf16.msra.mxu0 %v3692_v44  ;;  %4655 = vst [vmem:[#allocation23_spill] sm:$0xff] %v3796_v57  ;;  %v3814_v20 = vor.u32 %v3222_v13, %v3020_v14  ;;  %v3010_v24 = vld [vmem:[#allocation9 + $0x20] sm:$0xf]  ;;  %v3221_v28 = vld [vmem:[#allocation9 + $0x24] sm:$0xf0] }
  0x69   :  { %1069 = vmatpush.bf16.msra.mxu1 %v3694_v49  ;;  %v3220_v29 = vld [vmem:[#allocation9 + $0x24] sm:$0xf]  ;;  %v3002_v41 = vld [vmem:[#allocation9 + $0x10] sm:$0xf]  ;;  %v3219_v48 = vld [vmem:[#allocation9 + $0x14] sm:$0xf0] }
  0x6a   :  { %1082 = vmatpush.bf16.msra.mxu2 %v3730_v15  ;;  %4658 = vst [vmem:[#allocation26_spill] sm:$0xff] %v3814_v20  ;;  %v3218_v50 = vld [vmem:[#allocation9 + $0x14] sm:$0xf]  ;;  %v2996_v7 = vld [vmem:[#allocation9 + $0x8] sm:$0xf0] }
  0x6b   :  { %v3849_v14 = vld [vmem:[%s4578_s5] sm:$0xf]  ;;  %s3589_s5 = smov [#allocation14]  }
  0x6c   :  { %1057 = vmatpush.bf16.msra.mxu0 %v3697_v53  ;;  %s2561_s29 = sshll.u32 %s3589_s5, 4  ;;  %s2562_s29 = int_to_ptr.vmem [resolvable:$true] %s2561_s29 }
  0x6d   :  { %1070 = vmatpush.bf16.msra.mxu1 %v3700_v55 }
  0x6e   :  { %1083 = vmatpush.bf16.msra.mxu2 %v3742_v36 }
  0x6f   :  { %585 = vmatmul.bf16.gmra.mxu0 %v3684_v38 }
  0x70   :  { %614 = vmatmul.bf16.gmra.mxu1 %v3686_v39  ;;  %1058 = vmatpush.bf16.msra.mxu0 %v3713_v63 }
  0x71   :  { %643 = vmatmul.bf16.gmra.mxu2 %v3684_v38  ;;  %1071 = vmatpush.bf16.msra.mxu1 %v3716_v3 }
  0x72   :  { %672 = vmatmul.bf16.gmra.mxu3 %v3686_v39  ;;  %1084 = vmatpush.bf16.msra.mxu2 %v3757_v52 }
  0x74   :  { %1059 = vmatpush.bf16.msra.mxu0 %v3724_v10 }
  0x75   :  { %1072 = vmatpush.bf16.msra.mxu1 %v3726_v11 }
  0x78   :  { %1060 = vmatpush.bf16.msra.mxu0 %v3735_v26 }
  0x79   :  { %1073 = vmatpush.bf16.msra.mxu1 %v3738_v35 }
  0x7c   :  { %1061 = vmatpush.bf16.msra.mxu0 %v3751_v45 }
  0x7d   :  { %1074 = vmatpush.bf16.msra.mxu1 %v3755_v51 }
  0x7f   :  { %686 = vmatmul.bf16.vlgmr.msrb.gmra.mxu0 %v3648_v42 }
  0x80   :  { %715 = vmatmul.bf16.vlgmr.msrb.gmra.mxu1 %v3650_v47 }
  0x81   :  { %744 = vmatmul.bf16.vlgmr.msrb.gmra.mxu2 %v3648_v42  ;;  %v2972_v42 = vld [vmem:[#allocation8 + $0xd8] sm:$0xf0]  ;;  %1199 = vmatpush.bf16.msrb.mxu1 %v3767_v1 }
  0x82   :  { %773 = vmatmul.bf16.vlgmr.msrb.gmra.mxu3 %v3650_v47  ;;  %v3721_v47 = vor.u32 %v3209_v5, %v2972_v42  ;;  %v3195_v5 = vld [vmem:[#allocation8 + $0x54] sm:$0xf0]  ;;  %v3193_v42 = vld [vmem:[#allocation8 + $0x4c] sm:$0xf] }
  0x83   :  { %v3774_v9 = vor.u32 %v3193_v42, %v2908_v6  ;;  %v3028_v42 = vld [vmem:[#allocation9 + $0x48] sm:$0xf0] }
  0x84   :  { %1094 = vmatpush.bf16.msra.mxu3 %v3721_v47 }
  0x85   :  { %1200 = vmatpush.bf16.msrb.mxu1 %v3778_v19 }
  0x88   :  { %1095 = vmatpush.bf16.msra.mxu3 %v3732_v21 }
  0x89   :  { %1201 = vmatpush.bf16.msrb.mxu1 %v3790_v46 }
  0x8c   :  { %1096 = vmatpush.bf16.msra.mxu3 %v3744_v37 }
  0x8f   :  { %691 = vmatmul.bf16.gmra.mxu0 %v3656_v30 }
  0x90   :  { %720 = vmatmul.bf16.gmra.mxu1 %v3658_v34  ;;  %1097 = vmatpush.bf16.msra.mxu3 %v3761_v60 }
  0x91   :  { %749 = vmatmul.bf16.gmra.mxu2 %v3656_v30  ;;  %v3765_v30 = vor.u32 %v3231_v61, %v3050_v58  ;;  %v2876_v58 = vld [vmem:[#allocation8 + $0x18] sm:$0xf0]  ;;  %v3026_v61 = vld [vmem:[#allocation9 + $0x40] sm:$0xf] }
  0x92   :  { %778 = vmatmul.bf16.gmra.mxu3 %v3658_v34  ;;  %v3770_v34 = vor.u32 %v3195_v5, %v2906_v2  ;;  %v3798_v0 = vor.u32 %v3185_v54, %v2876_v58  ;;  %v3800_v2 = vor.u32 %v3225_v62, %v3026_v61  ;;  %v3224_v5 = vld [vmem:[#allocation9 + $0x44] sm:$0xf]  ;;  %v3004_v54 = vld [vmem:[#allocation9 + $0x18] sm:$0xf0]  ;;  %v3826_v58 = vor.u32 %v3219_v48, %v3002_v41  ;;  %v2994_v62 = vld [vmem:[#allocation9] sm:$0xf] }
  0x93   :  { %1186 = vmatpush.bf16.msrb.mxu0 %v3765_v30  ;;  %v3803_v6 = vor.u32 %v3224_v5, %v3028_v42  ;;  %v3829_v61 = vor.u32 %v3218_v50, %v3004_v54  ;;  %v3217_v5 = vld [vmem:[#allocation9 + $0x4] sm:$0xf0]  ;;  %v3216_v42 = vld [vmem:[#allocation9 + $0x4] sm:$0xf] }
  0x94   :  { %1085 = vmatpush.bf16.msra.mxu2 %v3770_v34  ;;  %1098 = vmatpush.bf16.msra.mxu3 %v3774_v9  ;;  %4656 = vst [vmem:[#allocation24_spill] sm:$0xff] %v3798_v0  ;;  %v3833_v8 = vor.u32 %v3217_v5, %v2994_v62  ;;  %v3836_v13 = vor.u32 %v3216_v42, %v2996_v7 }
  0x95   :  { %4657 = vst [vmem:[#allocation25_spill] sm:$0xff] %v3803_v6  ;;  %1202 = vmatpush.bf16.msrb.mxu1 %v3803_v6 }
  0x96   :  { %4660 = vst [vmem:[#allocation28_spill] sm:$0xff] %v3829_v61 }
  0x97   :  { %1187 = vmatpush.bf16.msrb.mxu0 %v3776_v12  ;;  %4661 = vst [vmem:[#allocation29_spill] sm:$0xff] %v3833_v8 }
  0x98   :  { %1086 = vmatpush.bf16.msra.mxu2 %v3781_v25  ;;  %1099 = vmatpush.bf16.msra.mxu3 %v3784_v40  ;;  %4662 = vst [vmem:[#allocation30_spill] sm:$0xff] %v3836_v13 }
  0x99   :  { %1203 = vmatpush.bf16.msrb.mxu1 %v3814_v20 }
  0x9b   :  { %1188 = vmatpush.bf16.msrb.mxu0 %v3788_v43 }
  0x9c   :  { %1087 = vmatpush.bf16.msra.mxu2 %v3796_v57  ;;  %1100 = vmatpush.bf16.msra.mxu3 %v3798_v0 }
  0x9f   :  { %696 = vmatmul.bf16.gmra.mxu0 %v3664_v16 }
  0xa0   :  { %725 = vmatmul.bf16.gmra.mxu1 %v3666_v18  ;;  %1189 = vmatpush.bf16.msrb.mxu0 %v3800_v2 }
  0xa1   :  { %754 = vmatmul.bf16.gmra.mxu2 %v3664_v16  ;;  %1356 = vmatpush.bf16.msrb.mxu3 %v3672_v23  ;;  %v3012_v16 = vld [vmem:[#allocation9 + $0x28] sm:$0xf0] }
  0xa2   :  { %783 = vmatmul.bf16.gmra.mxu3 %v3666_v18  ;;  %v3819_v18 = vor.u32 %v3221_v28, %v3010_v24  ;;  %v3822_v33 = vor.u32 %v3220_v29, %v3012_v16  ;;  %v3853_v24 = vperm.slane %v3849_v14, 0  ;;  %v3864_v16 = vperm.slane %v3849_v14, 1 }
  0xa4   :  { %1190 = vmatpush.bf16.msrb.mxu0 %v3811_v17  ;;  %4659 = vst [vmem:[#allocation27_spill] sm:$0xff] %v3822_v33  ;;  %1204 = vmatpush.bf16.msrb.mxu1 %v3822_v33 }
  0xa5   :  { %1357 = vmatpush.bf16.msrb.mxu3 %v3677_v31  ;;  %4663 = vst [vmem:[#allocation31_spill] sm:$0xff] %v3853_v24 }
  0xa6   :  { %4664 = vst [vmem:[#allocation32_spill] sm:$0xff] %v3864_v16 }
  0xa8   :  { %1191 = vmatpush.bf16.msrb.mxu0 %v3819_v18  ;;  %1205 = vmatpush.bf16.msrb.mxu1 %v3829_v61 }
  0xa9   :  { %1358 = vmatpush.bf16.msrb.mxu3 %v3692_v44 }
  0xac   :  { %1192 = vmatpush.bf16.msrb.mxu0 %v3826_v58  ;;  %1206 = vmatpush.bf16.msrb.mxu1 %v3836_v13 }
  0xad   :  { %1359 = vmatpush.bf16.msrb.mxu3 %v3697_v53 }
  0xaf   :  { %701 = vmatmul.bf16.gmra.mxu0 %v3684_v38 }
  0xb0   :  { %730 = vmatmul.bf16.gmra.mxu1 %v3686_v39  ;;  %1193 = vmatpush.bf16.msrb.mxu0 %v3833_v8 }
  0xb1   :  { %759 = vmatmul.bf16.gmra.mxu2 %v3684_v38  ;;  %1360 = vmatpush.bf16.msrb.mxu3 %v3713_v63 }
  0xb2   :  { %788 = vmatmul.bf16.gmra.mxu3 %v3686_v39 }
  0xb5   :  { %1361 = vmatpush.bf16.msrb.mxu3 %v3724_v10 }
  0xb9   :  { %1362 = vmatpush.bf16.msrb.mxu3 %v3735_v26 }
  0xbc   :  { %v571_v38 = vpop.f32.mrf.mxu0 }
  0xbd   :  { %v572_v39 = vadd.f32 %v571_v38, %v3853_v24  ;;  %v600_v28 = vpop.f32.mrf.mxu1  ;;  %1363 = vmatpush.bf16.msrb.mxu3 %v3751_v45 }
  0xbf   :  { %v3857_v29 = vadd.f32 %v600_v28, %v572_v39  ;;  %1062 = vmatmul.bf16.vlgmr.msra.gmra.mxu0 %v3581_v22 }
  0xc0   :  { %1075 = vmatmul.bf16.vlgmr.msra.gmra.mxu1 %v3581_v22  ;;  %1369 = vmatpush.bf16.msra.mxu0 %v3674_v27 }
  0xc1   :  { %1088 = vmatmul.bf16.vlgmr.msra.gmra.mxu2 %v3581_v22  ;;  %1382 = vmatpush.bf16.msra.mxu1 %v3710_v59 }
  0xc2   :  { %1101 = vmatmul.bf16.vlgmr.msra.gmra.mxu3 %v3581_v22 }
  0xc3   :  { %1408 = vmatpush.bf16.msra.mxu3 %v3765_v30 }
  0xc4   :  { %v629_v41 = vpop.f32.mrf.mxu2  ;;  %v3871_v54 = vpop.f32.mrf.mxu0  ;;  %1370 = vmatpush.bf16.msra.mxu0 %v3680_v32 }
  0xc5   :  { %v630_v48 = vadd.f32 %v629_v41, %v3864_v16  ;;  %v658_v50 = vpop.f32.mrf.mxu3  ;;  %4665 = vst [vmem:[#allocation33_spill] sm:$0xff] %v3871_v54  ;;  %v3873_v62 = vpop.f32.mrf.mxu1  ;;  %1383 = vmatpush.bf16.msra.mxu1 %v3718_v4 }
  0xc6   :  { %4666 = vst [vmem:[#allocation34_spill] sm:$0xff] %v3873_v62 }
  0xc7   :  { %v3876_v5 = vadd.f32 %v658_v50, %v630_v48  ;;  %1409 = vmatpush.bf16.msra.mxu3 %v3776_v12 }
  0xc8   :  { %1371 = vmatpush.bf16.msra.mxu0 %v3694_v49 }
  0xc9   :  { %1384 = vmatpush.bf16.msra.mxu1 %v3730_v15 }
  0xcb   :  { %1410 = vmatpush.bf16.msra.mxu3 %v3788_v43 }
  0xcc   :  { %v3883_v42 = vpop.f32.mrf.mxu2  ;;  %v576_v38 = vpop.f32.mrf.mxu0  ;;  %1372 = vmatpush.bf16.msra.mxu0 %v3700_v55 }
  0xcd   :  { %4667 = vst [vmem:[#allocation35_spill] sm:$0xff] %v3883_v42  ;;  %v3885_v7 = vpop.f32.mrf.mxu3  ;;  %v577_v39 = vadd.f32 %v576_v38, %v3853_v24  ;;  %v605_v28 = vpop.f32.mrf.mxu1  ;;  %1385 = vmatpush.bf16.msra.mxu1 %v3742_v36 }
  0xce   :  { %4668 = vst [vmem:[#allocation36_spill] sm:$0xff] %v3885_v7 }
  0xcf   :  { %1411 = vmatpush.bf16.msra.mxu3 %v3800_v2  ;;  %v3891_v41 = vadd.f32 %v605_v28, %v577_v39  ;;  %1194 = vmatmul.bf16.vlgmr.msrb.gmra.mxu0 %v3581_v22 }
  0xd0   :  { %1207 = vmatmul.bf16.vlgmr.msrb.gmra.mxu1 %v3581_v22  ;;  %1373 = vmatpush.bf16.msra.mxu0 %v3716_v3 }
  0xd1   :  { %4669 = vst [vmem:[#allocation37_spill] sm:$0xff] %v3891_v41  ;;  %1386 = vmatpush.bf16.msra.mxu1 %v3757_v52 }
  0xd3   :  { %1412 = vmatpush.bf16.msra.mxu3 %v3811_v17 }
  0xd4   :  { %v634_v48 = vpop.f32.mrf.mxu2  ;;  %v3899_v62 = vpop.f32.mrf.mxu0  ;;  %1374 = vmatpush.bf16.msra.mxu0 %v3726_v11 }
  0xd5   :  { %v635_v50 = vadd.f32 %v634_v48, %v3864_v16  ;;  %v663_v38 = vpop.f32.mrf.mxu3  ;;  %4670 = vst [vmem:[#allocation38_spill] sm:$0xff] %v3899_v62  ;;  %v3901_v54 = vpop.f32.mrf.mxu1  ;;  %1387 = vmatpush.bf16.msra.mxu1 %v3770_v34 }
  0xd6   :  { %4671 = vst [vmem:[#allocation39_spill] sm:$0xff] %v3901_v54 }
  0xd7   :  { %v3904_v39 = vadd.f32 %v663_v38, %v635_v50  ;;  %1413 = vmatpush.bf16.msra.mxu3 %v3819_v18 }
  0xd8   :  { %1375 = vmatpush.bf16.msra.mxu0 %v3738_v35 }
  0xd9   :  { %4672 = vst [vmem:[#allocation40_spill] sm:$0xff] %v3904_v39  ;;  %1388 = vmatpush.bf16.msra.mxu1 %v3781_v25 }
  0xdb   :  { %1414 = vmatpush.bf16.msra.mxu3 %v3826_v58 }
  0xdc   :  { %v3911_v22 = vpop.f32.mrf.mxu2  ;;  %v581_v48 = vpop.f32.mrf.mxu0  ;;  %1376 = vmatpush.bf16.msra.mxu0 %v3755_v51 }
  0xdd   :  { %4673 = vst [vmem:[#allocation41_spill] sm:$0xff] %v3911_v22  ;;  %v3913_v28 = vpop.f32.mrf.mxu3  ;;  %v582_v54 = vadd.f32 %v581_v48, %v3853_v24  ;;  %v610_v62 = vpop.f32.mrf.mxu1  ;;  %1389 = vmatpush.bf16.msra.mxu1 %v3796_v57 }
  0xde   :  { %4674 = vst [vmem:[#allocation42_spill] sm:$0xff] %v3913_v28 }
  0xdf   :  { %v3919_v50 = vadd.f32 %v610_v62, %v582_v54  ;;  %1415 = vmatpush.bf16.msra.mxu3 %v3833_v8 }
  0xe0   :  { %1421 = vmatpush.bf16.msrb.mxu0 %v3767_v1 }
  0xe1   :  { %4675 = vst [vmem:[#allocation43_spill] sm:$0xff] %v3919_v50 }
  0xe4   :  { %1422 = vmatpush.bf16.msrb.mxu0 %v3778_v19  ;;  %v639_v38 = vpop.f32.mrf.mxu2  ;;  %v3924_v39 = vpop.f32.mrf.mxu0 }
  0xe5   :  { %v640_v22 = vadd.f32 %v639_v38, %v3864_v16  ;;  %v668_v28 = vpop.f32.mrf.mxu3  ;;  %4676 = vst [vmem:[#allocation44_spill] sm:$0xff] %v3924_v39  ;;  %v3926_v48 = vpop.f32.mrf.mxu1 }
  0xe6   :  { %4677 = vst [vmem:[#allocation45_spill] sm:$0xff] %v3926_v48 }
  0xe7   :  { %v3928_v41 = vadd.f32 %v668_v28, %v640_v22 }
  0xe8   :  { %1423 = vmatpush.bf16.msrb.mxu0 %v3790_v46 }
  0xe9   :  { %4678 = vst [vmem:[#allocation46_spill] sm:$0xff] %v3928_v41 }
  0xec   :  { %1424 = vmatpush.bf16.msrb.mxu0 %v3803_v6  ;;  %v3932_v54 = vpop.f32.mrf.mxu2  ;;  %v586_v50 = vpop.f32.mrf.mxu0 }
  0xed   :  { %4679 = vst [vmem:[#allocation47_spill] sm:$0xff] %v3932_v54  ;;  %v3934_v62 = vpop.f32.mrf.mxu3  ;;  %v587_v7 = vadd.f32 %v586_v50, %v3853_v24  ;;  %v615_v42 = vpop.f32.mrf.mxu1  ;;  %v3950_v50 = vperm.slane %v3849_v14, 2 }
  0xee   :  { %4680 = vst [vmem:[#allocation48_spill] sm:$0xff] %v3934_v62 }
  0xef   :  { %v3938_v38 = vadd.f32 %v615_v42, %v587_v7  ;;  %4685 = vst [vmem:[#allocation53_spill] sm:$0xff] %v3950_v50 }
  0xf0   :  { %1425 = vmatpush.bf16.msrb.mxu0 %v3814_v20 }
  0xf1   :  { %4681 = vst [vmem:[#allocation49_spill] sm:$0xff] %v3938_v38 }
  0xf4   :  { %1426 = vmatpush.bf16.msrb.mxu0 %v3822_v33  ;;  %v644_v22 = vpop.f32.mrf.mxu2  ;;  %v3942_v39 = vpop.f32.mrf.mxu0 }
  0xf5   :  { %v645_v28 = vadd.f32 %v644_v22, %v3864_v16  ;;  %v673_v48 = vpop.f32.mrf.mxu3  ;;  %4682 = vst [vmem:[#allocation50_spill] sm:$0xff] %v3942_v39  ;;  %v3944_v41 = vpop.f32.mrf.mxu1 }
  0xf6   :  { %4683 = vst [vmem:[#allocation51_spill] sm:$0xff] %v3944_v41  ;;  %v3959_v41 = vperm.slane %v3849_v14, 3 }
  0xf7   :  { %v3946_v54 = vadd.f32 %v673_v48, %v645_v28 }
  0xf8   :  { %1427 = vmatpush.bf16.msrb.mxu0 %v3829_v61  ;;  %4688 = vst [vmem:[#allocation56_spill] sm:$0xff] %v3959_v41 }
  0xf9   :  { %4684 = vst [vmem:[#allocation52_spill] sm:$0xff] %v3946_v54 }
  0xfc   :  { %1428 = vmatpush.bf16.msrb.mxu0 %v3836_v13  ;;  %v3953_v42 = vpop.f32.mrf.mxu2  ;;  %v687_v38 = vpop.f32.mrf.mxu0 }
  0xfd   :  { %4686 = vst [vmem:[#allocation54_spill] sm:$0xff] %v3953_v42  ;;  %v3955_v7 = vpop.f32.mrf.mxu3  ;;  %v688_v22 = vadd.f32 %v687_v38, %v3950_v50  ;;  %v716_v62 = vpop.f32.mrf.mxu1 }
  0xfe   :  { %4687 = vst [vmem:[#allocation55_spill] sm:$0xff] %v3955_v7 }
  0xff   :  { %v717_v39 = vadd.f32 %v716_v62, %v688_v22 }
 0x104   :  { %v745_v48 = vpop.f32.mrf.mxu2  ;;  %v3962_v24 = vpop.f32.mrf.mxu0 }
 0x105   :  { %v746_v28 = vadd.f32 %v745_v48, %v3959_v41  ;;  %v774_v54 = vpop.f32.mrf.mxu3  ;;  %4689 = vst [vmem:[#allocation57_spill] sm:$0xff] %v3962_v24  ;;  %v3964_v16 = vpop.f32.mrf.mxu1 }
 0x106   :  { %4690 = vst [vmem:[#allocation58_spill] sm:$0xff] %v3964_v16 }
 0x107   :  { %v3966_v13 = vadd.f32 %v774_v54, %v746_v28 }
 0x10c   :  { %v3968_v42 = vpop.f32.mrf.mxu2  ;;  %v692_v38 = vpop.f32.mrf.mxu0 }
 0x10d   :  { %4691 = vst [vmem:[#allocation59_spill] sm:$0xff] %v3968_v42  ;;  %v3970_v7 = vpop.f32.mrf.mxu3  ;;  %v693_v62 = vadd.f32 %v692_v38, %v3950_v50  ;;  %v721_v22 = vpop.f32.mrf.mxu1 }
 0x10e   :  { %4692 = vst [vmem:[#allocation60_spill] sm:$0xff] %v3970_v7 }
 0x10f   :  { %v3973_v14 = vadd.f32 %v721_v22, %v693_v62 }
 0x111   :  { %4693 = vst [vmem:[#allocation61_spill] sm:$0xff] %v3973_v14 }
 0x114   :  { %v750_v61 = vpop.f32.mrf.mxu2  ;;  %v3976_v20 = vpop.f32.mrf.mxu0 }
 0x115   :  { %v751_v48 = vadd.f32 %v750_v61, %v3959_v41  ;;  %v779_v33 = vpop.f32.mrf.mxu3  ;;  %4694 = vst [vmem:[#allocation62_spill] sm:$0xff] %v3976_v20  ;;  %v3978_v24 = vpop.f32.mrf.mxu1 }
 0x116   :  { %4695 = vst [vmem:[#allocation63_spill] sm:$0xff] %v3978_v24 }
 0x117   :  { %v3980_v54 = vadd.f32 %v779_v33, %v751_v48 }
 0x119   :  { %4696 = vst [vmem:[#allocation64_spill] sm:$0xff] %v3980_v54 }
 0x11c   :  { %v3982_v28 = vpop.f32.mrf.mxu2  ;;  %v697_v7 = vpop.f32.mrf.mxu0 }
 0x11d   :  { %4697 = vst [vmem:[#allocation65_spill] sm:$0xff] %v3982_v28  ;;  %v3984_v42 = vpop.f32.mrf.mxu3  ;;  %v698_v38 = vadd.f32 %v697_v7, %v3950_v50  ;;  %v726_v16 = vpop.f32.mrf.mxu1 }
 0x11e   :  { %4698 = vst [vmem:[#allocation66_spill] sm:$0xff] %v3984_v42 }
 0x11f   :  { %v3987_v62 = vadd.f32 %v726_v16, %v698_v38  ;;  %v4003_v38 = vld [vmem:[#allocation11 + $0x38] sm:$0xff] }
 0x120   :  { %4706 = vst [vmem:[#allocation74_spill] sm:$0xff] %v4003_v38  ;;  %1309 = vmatpush.bf16.msrb.mxu2 %v4003_v38  ;;  %1483 = vmatpush.bf16.msrb.mxu1 %v4003_v38 }
 0x121   :  { %4699 = vst [vmem:[#allocation67_spill] sm:$0xff] %v3987_v62 }
 0x124   :  { %v755_v22 = vpop.f32.mrf.mxu2  ;;  %v3990_v6 = vpop.f32.mrf.mxu0 }
 0x125   :  { %v756_v61 = vadd.f32 %v755_v22, %v3959_v41  ;;  %v784_v14 = vpop.f32.mrf.mxu3  ;;  %4700 = vst [vmem:[#allocation68_spill] sm:$0xff] %v3990_v6  ;;  %v3992_v20 = vpop.f32.mrf.mxu1 }
 0x126   :  { %4701 = vst [vmem:[#allocation69_spill] sm:$0xff] %v3992_v20  ;;  %v4039_v20 = vld [vmem:[#allocation11 + $0x8] sm:$0xff] }
 0x127   :  { %v3994_v33 = vadd.f32 %v784_v14, %v756_v61  ;;  %4717 = vst [vmem:[#allocation85_spill] sm:$0xff] %v4039_v20 }
 0x129   :  { %4702 = vst [vmem:[#allocation70_spill] sm:$0xff] %v3994_v33 }
 0x12c   :  { %v3996_v48 = vpop.f32.mrf.mxu2  ;;  %v702_v42 = vpop.f32.mrf.mxu0 }
 0x12d   :  { %4703 = vst [vmem:[#allocation71_spill] sm:$0xff] %v3996_v48  ;;  %v3998_v28 = vpop.f32.mrf.mxu3  ;;  %v703_v7 = vadd.f32 %v702_v42, %v3950_v50  ;;  %v731_v24 = vpop.f32.mrf.mxu1  ;;  %v4014_v42 = vld [vmem:[#allocation11 + $0x30] sm:$0xff]  ;;  %v4045_v50 = vld [vmem:[#allocation11] sm:$0xff] }
 0x12e   :  { %4704 = vst [vmem:[#allocation72_spill] sm:$0xff] %v3998_v28  ;;  %1310 = vmatpush.bf16.msrb.mxu2 %v4014_v42  ;;  %1484 = vmatpush.bf16.msrb.mxu1 %v4014_v42  ;;  %v4036_v48 = vld [vmem:[#allocation11 + $0x10] sm:$0xff] }
 0x12f   :  { %v4001_v16 = vadd.f32 %v731_v24, %v703_v7  ;;  %4710 = vst [vmem:[#allocation78_spill] sm:$0xff] %v4014_v42  ;;  %v4018_v24 = vld [vmem:[#allocation11 + $0x28] sm:$0xff] }
 0x130   :  { %4711 = vst [vmem:[#allocation79_spill] sm:$0xff] %v4018_v24 }
 0x131   :  { %4705 = vst [vmem:[#allocation73_spill] sm:$0xff] %v4001_v16 }
 0x132   :  { %1311 = vmatpush.bf16.msrb.mxu2 %v4018_v24  ;;  %1485 = vmatpush.bf16.msrb.mxu1 %v4018_v24  ;;  %4716 = vst [vmem:[#allocation84_spill] sm:$0xff] %v4036_v48 }
 0x133   :  { %4718 = vst [vmem:[#allocation86_spill] sm:$0xff] %v4045_v50 }
 0x134   :  { %v760_v22 = vpop.f32.mrf.mxu2  ;;  %v4006_v54 = vpop.f32.mrf.mxu0 }
 0x135   :  { %v761_v62 = vadd.f32 %v760_v22, %v3959_v41  ;;  %v789_v6 = vpop.f32.mrf.mxu3  ;;  %4707 = vst [vmem:[#allocation75_spill] sm:$0xff] %v4006_v54  ;;  %v4010_v14 = vpop.f32.mrf.mxu1 }
 0x136   :  { %4708 = vst [vmem:[#allocation76_spill] sm:$0xff] %v4010_v14 }
 0x137   :  { %v4012_v61 = vadd.f32 %v789_v6, %v761_v62  ;;  %v4026_v6 = vld [vmem:[#allocation11 + $0x20] sm:$0xff]  ;;  %v4030_v62 = vld [vmem:[#allocation11 + $0x18] sm:$0xff] }
 0x138   :  { %4714 = vst [vmem:[#allocation82_spill] sm:$0xff] %v4026_v6  ;;  %1312 = vmatpush.bf16.msrb.mxu2 %v4026_v6  ;;  %1486 = vmatpush.bf16.msrb.mxu1 %v4026_v6 }
 0x139   :  { %4709 = vst [vmem:[#allocation77_spill] sm:$0xff] %v4012_v61 }
 0x13a   :  { %4715 = vst [vmem:[#allocation83_spill] sm:$0xff] %v4030_v62 }
 0x13c   :  { %v4020_v7 = vpop.f32.mrf.mxu2  ;;  %v1063_v54 = vpop.f32.mrf.mxu0  ;;  %1313 = vmatpush.bf16.msrb.mxu2 %v4030_v62  ;;  %1487 = vmatpush.bf16.msrb.mxu1 %v4030_v62 }
 0x13d   :  { %4712 = vst [vmem:[#allocation80_spill] sm:$0xff] %v4020_v7  ;;  %v4022_v22 = vpop.f32.mrf.mxu3  ;;  %v1076_v14 = vpop.f32.mrf.mxu1  ;;  %v1212_v33 = vadd.f32 %v1063_v54, %v3857_v29  ;;  %v4051_v29 = vld [vmem:[#allocation12] sm:$0xff] }
 0x13e   :  { %4713 = vst [vmem:[#allocation81_spill] sm:$0xff] %v4022_v22  ;;  %1346 = vperm.xlu0 %3261, %v4051_v29  }
 0x13f   :  { %4719 = vst [vmem:[#allocation87_spill] sm:$0xff] %v4051_v29 }
 0x140   :  { %1314 = vmatpush.bf16.msrb.mxu2 %v4036_v48  ;;  %1488 = vmatpush.bf16.msrb.mxu1 %v4036_v48 }
 0x144   :  { %v1089_v61 = vpop.f32.mrf.mxu2  ;;  %v1065_v28 = vpop.f32.mrf.mxu0  ;;  %1315 = vmatpush.bf16.msrb.mxu2 %v4039_v20  ;;  %1489 = vmatpush.bf16.msrb.mxu1 %v4039_v20 }
 0x145   :  { %v4032_v16 = vadd.f32 %v1089_v61, %v717_v39  ;;  %v1102_v7 = vpop.f32.mrf.mxu3  ;;  %v1078_v22 = vpop.f32.mrf.mxu1  ;;  %v1213_v39 = vadd.f32 %v1076_v14, %v3876_v5 }
 0x148   :  { %1316 = vmatpush.bf16.msrb.mxu2 %v4045_v50  ;;  %1490 = vmatpush.bf16.msrb.mxu1 %v4045_v50 }
 0x14c   :  { %v1091_v41 = vpop.f32.mrf.mxu2  ;;  %v1195_v61 = vpop.f32.mrf.mxu0  ;;  %1395 = vmatpush.bf16.msra.mxu2 %v3702_v56 }
 0x14d   :  { %v1104_v28 = vpop.f32.mrf.mxu3  ;;  %v1216_v22 = vadd.f32 %v1212_v33, %v1195_v61  ;;  %v1208_v62 = vpop.f32.mrf.mxu1 }
 0x14e   :  { %v1236_v6 = vadd.f32 %v1213_v39, %v1208_v62 }
 0x14f   :  { %v3056_v24 = vmul.f32 -1.442695, %v1216_v22 }
 0x150   :  { %v3057_v46 = vmul.f32 -1.442695, %v1236_v6  ;;  %1396 = vmatpush.bf16.msra.mxu2 %v3721_v47 }
 0x151   :  { %3270 = vpow2.f32 %v3056_v24 }
 0x152   :  { %3272 = vpow2.f32 %v3057_v46  ;;  %v1215_v46 = vadd.f32 %v1102_v7, %v3966_v13 }
 0x154   :  { %v1197_v5 = vpop.f32.mrf.mxu0  ;;  %1397 = vmatpush.bf16.msra.mxu2 %v3732_v21 }
 0x155   :  { %v1210_v41 = vpop.f32.mrf.mxu1 }
 0x157   :  { %v3271_v54 = vpop.eup %3270 }
 0x158   :  { %v3273_v33 = vpop.eup %3272  ;;  %v1220_v14 = vadd.f32 1.0, %v3271_v54  ;;  %1398 = vmatpush.bf16.msra.mxu2 %v3744_v37 }
 0x159   :  { %v1240_v6 = vadd.f32 1.0, %v3273_v33 }
 0x15a   :  { %3274 = vrcp.f32 %v1220_v14  ;;  %v1232_v22 = vand.u32 2147483648, %v1220_v14  ;;  %v1230_v54 = vand.u32 2147483647, %v1220_v14  ;;  %vm1226_vm2 = vweird.f32 %v1220_v14 }
 0x15b   :  { %3276 = vrcp.f32 %v1240_v6  ;;  %v1252_v33 = vand.u32 2147483648, %v1240_v6  ;;  %v1250_v50 = vand.u32 2147483647, %v1240_v6  ;;  %vm1246_vm4 = vweird.f32 %v1240_v6 }
 0x15c   :  { %1399 = vmatpush.bf16.msra.mxu2 %v3761_v60  ;;  %3278 = vtanh.f32 %v1215_v46  ;;  %v1233_v13 = vor.u32 1.1754944e-38, %v1232_v22  ;;  %vm1231_vm5 = vcmp.eq.f32.partialorder %v1230_v54, 8.507059e+37 }
 0x15d   :  { %v1253_v46 = vor.u32 1.1754944e-38, %v1252_v33  ;;  %vm1251_vm7 = vcmp.eq.f32.partialorder %v1250_v50, 8.507059e+37 }
 0x160   :  { %v3275_v24 = vpop.eup %3274  ;;  %1400 = vmatpush.bf16.msra.mxu2 %v3774_v9 }
 0x161   :  { %v3277_v62 = vpop.eup %3276  ;;  %v1222_v39 = vmul.f32 %v3275_v24, %v1220_v14  ;;  %vm1227_vm0 = vweird.f32 %v3275_v24 }
 0x162   :  { %v1242_v61 = vmul.f32 %v3277_v62, %v1240_v6  ;;  %vm1247_vm1 = vweird.f32 %v3277_v62  ;;  %vm1228_vm3 = vmor %vm1226_vm2, %vm1227_vm0 }
 0x163   :  { %v1223_v28 = vsub.f32 1.0, %v1222_v39  ;;  %vm1248_vm6 = vmor %vm1246_vm4, %vm1247_vm1 }
 0x164   :  { %v1243_v5 = vsub.f32 1.0, %v1242_v61  ;;  %1401 = vmatpush.bf16.msra.mxu2 %v3784_v40  ;;  %v3279_v61 = vpop.eup %3278 }
 0x165   :  { %v1224_v41 = vmul.f32 %v3275_v24, %v1223_v28 }
 0x166   :  { %v1244_v29 = vmul.f32 %v3277_v62, %v1243_v5 }
 0x167   :  { %v1225_v20 = vadd.f32 %v3275_v24, %v1224_v41 }
 0x168   :  { %v1245_v7 = vadd.f32 %v3277_v62, %v1244_v29  ;;  %1402 = vmatpush.bf16.msra.mxu2 %v3798_v0 }
 0x169   :  { %v1229_v39 = vsel %vm1228_vm3, %v3275_v24, %v1225_v20 }
 0x16a   :  { %v1234_v28 = vsel %vm1231_vm5, %v1233_v13, %v1229_v39  ;;  %v1249_v48 = vsel %vm1248_vm6, %v3277_v62, %v1245_v7 }
 0x16b   :  { %v1254_v42 = vsel %vm1251_vm7, %v1253_v46, %v1249_v48  ;;  %v1258_v5 = vmul.f32 %v3279_v61, %v1234_v28  ;;  %v4720_v28 = vld [vmem:[#allocation21_spill] sm:$0xff] }
 0x16c   :  { %v1257_v19 = vmul.f32 0.0, %v1254_v42 }
 0x16e   :  { %v4062_v14 = vadd.f32 %v1258_v5, %v1257_v19  ;;  %v4721_v5 = vld [vmem:[#allocation78_spill] sm:$0xff] }
 0x170   :  { %v1260_v29 = vpack.c.bf16 %v4062_v14, %v4062_v14 }
 0x172   :  { %1317 = vmatmul.bf16.vlgmr.msrb.gmra.mxu2 %v1260_v29 }
 0x173   :  { %1528 = vmatpush.bf16.msrb.mxu2 %v3672_v23 }
 0x177   :  { %1529 = vmatpush.bf16.msrb.mxu2 %v3677_v31 }
 0x17b   :  { %1530 = vmatpush.bf16.msrb.mxu2 %v3692_v44 }
 0x17f   :  { %1531 = vmatpush.bf16.msrb.mxu2 %v3697_v53 }
 0x183   :  { %1532 = vmatpush.bf16.msrb.mxu2 %v3713_v63 }
 0x187   :  { %1533 = vmatpush.bf16.msrb.mxu2 %v3724_v10 }
 0x18b   :  { %1534 = vmatpush.bf16.msrb.mxu2 %v3735_v26 }
 0x18f   :  { %1535 = vmatpush.bf16.msrb.mxu2 %v3751_v45 }
 0x1f5   :  { %v1318_v19 = vpop.f32.mrf.mxu2 }
 0x1f6   :  { %v1322_v20 = vadd.f32 %v1318_v19, %v4032_v16  ;;  %v4723_v19 = vld [vmem:[#allocation79_spill] sm:$0xff] }
 0x1f8   :  { %v3090_v50 = vmul.f32 -1.442695, %v1322_v20  ;;  %v4724_v20 = vld [vmem:[#allocation25_spill] sm:$0xff] }
 0x1fa   :  { %3280 = vpow2.f32 %v3090_v50  ;;  %v4725_v50 = vld [vmem:[#allocation82_spill] sm:$0xff] }
 0x1fd   :  { %v1320_v48 = vpop.f32.mrf.mxu2 }
 0x1fe   :  { %v4726_v48 = vld [vmem:[#allocation26_spill] sm:$0xff] }
 0x200   :  { %v3281_v42 = vpop.eup %3280 }
 0x201   :  { %v1326_v6 = vadd.f32 1.0, %v3281_v42  ;;  %v4727_v42 = vld [vmem:[#allocation83_spill] sm:$0xff] }
 0x203   :  { %3282 = vrcp.f32 %v1326_v6  ;;  %v1338_v41 = vand.u32 2147483648, %v1326_v6  ;;  %v1336_v33 = vand.u32 2147483647, %v1326_v6  ;;  %vm1332_vm9 = vweird.f32 %v1326_v6 }
 0x205   :  { %v1339_v7 = vor.u32 1.1754944e-38, %v1338_v41  ;;  %vm1337_vm11 = vcmp.eq.f32.partialorder %v1336_v33, 8.507059e+37  ;;  %v4732_v41 = vld [vmem:[#allocation30_spill] sm:$0xff]  ;;  %v4734_v33 = vld [vmem:[#allocation53_spill] sm:$0xff] }
 0x209   :  { %v3283_v24 = vpop.eup %3282 }
 0x20a   :  { %v1328_v62 = vmul.f32 %v3283_v24, %v1326_v6  ;;  %vm1333_vm8 = vweird.f32 %v3283_v24  ;;  %v4728_v6 = vld [vmem:[#allocation27_spill] sm:$0xff] }
 0x20b   :  { %vm1334_vm10 = vmor %vm1332_vm9, %vm1333_vm8 }
 0x20c   :  { %v1329_v22 = vsub.f32 1.0, %v1328_v62  ;;  %v4730_v62 = vld [vmem:[#allocation28_spill] sm:$0xff] }
 0x20e   :  { %v1330_v54 = vmul.f32 %v3283_v24, %v1329_v22  ;;  %v4731_v22 = vld [vmem:[#allocation85_spill] sm:$0xff] }
 0x210   :  { %v1331_v13 = vadd.f32 %v3283_v24, %v1330_v54  ;;  %v4733_v54 = vld [vmem:[#allocation86_spill] sm:$0xff] }
 0x212   :  { %v1335_v46 = vsel %vm1334_vm10, %v3283_v24, %v1331_v13  ;;  %v4729_v24 = vld [vmem:[#allocation84_spill] sm:$0xff]  ;;  %v4735_v13 = vld [vmem:[#allocation57_spill] sm:$0xff] }
 0x213   :  { %v1340_v16 = vsel %vm1337_vm11, %v1339_v7, %v1335_v46  ;;  %v690_v7 = vadd.f32 %v4735_v13, %v4734_v33  ;;  %v4736_v46 = vld [vmem:[#allocation58_spill] sm:$0xff] }
 0x214   :  { %v4076_v39 = vmul.f32 %v1340_v16, %v4062_v14 }
 0x215   :  { %v719_v16 = vadd.f32 %v4736_v46, %v690_v7 }
 0x216   :  { %v1355_v61 = vpack.c.bf16 %v4076_v39, %v4076_v39 }
 0x218   :  { %1364 = vmatmul.bf16.vlgmr.msrb.gmra.mxu3 %v1355_v61  ;;  %1377 = vmatmul.bf16.vlgmr.msra.gmra.mxu0 %v1355_v61 }
 0x219   :  { %1390 = vmatmul.bf16.vlgmr.msra.gmra.mxu1 %v1355_v61  ;;  %1403 = vmatmul.bf16.vlgmr.msra.gmra.mxu2 %v1355_v61 }
 0x21a   :  { %1541 = vmatpush.bf16.msrb.mxu3 %v3674_v27  ;;  %1554 = vmatpush.bf16.msra.mxu0 %v3710_v59 }
 0x21b   :  { %1567 = vmatpush.bf16.msra.mxu1 %v3702_v56  ;;  %1580 = vmatpush.bf16.msra.mxu2 %v3765_v30 }
 0x21e   :  { %1542 = vmatpush.bf16.msrb.mxu3 %v3680_v32  ;;  %1555 = vmatpush.bf16.msra.mxu0 %v3718_v4 }
 0x21f   :  { %1568 = vmatpush.bf16.msra.mxu1 %v3721_v47  ;;  %1581 = vmatpush.bf16.msra.mxu2 %v3776_v12 }
 0x222   :  { %1543 = vmatpush.bf16.msrb.mxu3 %v3694_v49  ;;  %1556 = vmatpush.bf16.msra.mxu0 %v3730_v15 }
 0x223   :  { %1569 = vmatpush.bf16.msra.mxu1 %v3732_v21  ;;  %1582 = vmatpush.bf16.msra.mxu2 %v3788_v43 }
 0x226   :  { %1544 = vmatpush.bf16.msrb.mxu3 %v3700_v55  ;;  %1557 = vmatpush.bf16.msra.mxu0 %v3742_v36 }
 0x227   :  { %1570 = vmatpush.bf16.msra.mxu1 %v3744_v37  ;;  %1583 = vmatpush.bf16.msra.mxu2 %v3800_v2 }
 0x228   :  { %1416 = vmatmul.bf16.vlgmr.msra.gmra.mxu3 %v1260_v29  ;;  %1429 = vmatmul.bf16.vlgmr.msrb.gmra.mxu0 %v1260_v29  ;;  %v4722_v29 = vld [vmem:[#allocation22_spill] sm:$0xff] }
 0x22a   :  { %1545 = vmatpush.bf16.msrb.mxu3 %v3716_v3  ;;  %1558 = vmatpush.bf16.msra.mxu0 %v3757_v52 }
 0x22b   :  { %1571 = vmatpush.bf16.msra.mxu1 %v3761_v60  ;;  %1584 = vmatpush.bf16.msra.mxu2 %v3811_v17 }
 0x22e   :  { %1546 = vmatpush.bf16.msrb.mxu3 %v3726_v11  ;;  %1559 = vmatpush.bf16.msra.mxu0 %v3770_v34 }
 0x22f   :  { %1572 = vmatpush.bf16.msra.mxu1 %v3774_v9  ;;  %1585 = vmatpush.bf16.msra.mxu2 %v3819_v18 }
 0x232   :  { %1547 = vmatpush.bf16.msrb.mxu3 %v3738_v35  ;;  %1560 = vmatpush.bf16.msra.mxu0 %v3781_v25 }
 0x233   :  { %1573 = vmatpush.bf16.msra.mxu1 %v3784_v40  ;;  %1586 = vmatpush.bf16.msra.mxu2 %v3826_v58 }
 0x236   :  { %1548 = vmatpush.bf16.msrb.mxu3 %v3755_v51  ;;  %1561 = vmatpush.bf16.msra.mxu0 %v3796_v57 }
 0x237   :  { %1574 = vmatpush.bf16.msra.mxu1 %v3798_v0  ;;  %1587 = vmatpush.bf16.msra.mxu2 %v3833_v8  ;;  %v4742_v8 = vld [vmem:[#allocation34_spill] sm:$0xff] }
 0x23a   :  { %1593 = vmatpush.bf16.msra.mxu3 %v3767_v1  ;;  %1655 = vmatpush.bf16.msrb.mxu0 %v4003_v38 }
 0x23e   :  { %1594 = vmatpush.bf16.msra.mxu3 %v4720_v28  ;;  %1656 = vmatpush.bf16.msrb.mxu0 %v4721_v5  ;;  %v4741_v28 = vld [vmem:[#allocation33_spill] sm:$0xff] }
 0x242   :  { %1595 = vmatpush.bf16.msra.mxu3 %v4722_v29  ;;  %1657 = vmatpush.bf16.msrb.mxu0 %v4723_v19  ;;  %v4739_v29 = vld [vmem:[#allocation36_spill] sm:$0xff] }
 0x246   :  { %1596 = vmatpush.bf16.msra.mxu3 %v4724_v20  ;;  %1658 = vmatpush.bf16.msrb.mxu0 %v4725_v50  ;;  %v4737_v20 = vld [vmem:[#allocation32_spill] sm:$0xff] }
 0x24a   :  { %1597 = vmatpush.bf16.msra.mxu3 %v4726_v48  ;;  %1659 = vmatpush.bf16.msrb.mxu0 %v4727_v42 }
 0x24e   :  { %1598 = vmatpush.bf16.msra.mxu3 %v4728_v6  ;;  %1660 = vmatpush.bf16.msrb.mxu0 %v4729_v24 }
 0x252   :  { %1599 = vmatpush.bf16.msra.mxu3 %v4730_v62  ;;  %1661 = vmatpush.bf16.msrb.mxu0 %v4731_v22  ;;  %v4738_v62 = vld [vmem:[#allocation35_spill] sm:$0xff] }
 0x253   :  { %v632_v19 = vadd.f32 %v4738_v62, %v4737_v20 }
 0x256   :  { %1600 = vmatpush.bf16.msra.mxu3 %v4732_v41  ;;  %1662 = vmatpush.bf16.msrb.mxu0 %v4733_v54  ;;  %v661_v41 = vadd.f32 %v4739_v29, %v632_v19  ;;  %v4740_v54 = vld [vmem:[#allocation31_spill] sm:$0xff] }
 0x257   :  { %v574_v38 = vadd.f32 %v4741_v28, %v4740_v54  ;;  %v4743_v19 = vld [vmem:[#allocation87_spill] sm:$0xff] }
 0x295   :  { %v1378_v61 = vpop.f32.mrf.mxu0 }
 0x296   :  { %v1391_v48 = vpop.f32.mrf.mxu1  ;;  %v1435_v13 = vadd.f32 %v1378_v61, %v661_v41 }
 0x297   :  { %v4131_v42 = vadd.f32 %v1391_v48, %v719_v16  ;;  %v603_v48 = vadd.f32 %v4742_v8, %v574_v38  ;;  %v4744_v8 = vld [vmem:[#allocation56_spill] sm:$0xff]  ;;  %v4745_v38 = vld [vmem:[#allocation59_spill] sm:$0xff] }
 0x29b   :  { %v1365_v6 = vpop.f32.mrf.mxu3 }
 0x29c   :  { %v1404_v50 = vpop.f32.mrf.mxu2  ;;  %v1434_v0 = vadd.f32 %v1365_v6, %v603_v48  ;;  %v748_v6 = vadd.f32 %v4745_v38, %v4744_v8 }
 0x29d   :  { %v1380_v24 = vpop.f32.mrf.mxu0 }
 0x29e   :  { %v1393_v22 = vpop.f32.mrf.mxu1 }
 0x2a3   :  { %v1367_v5 = vpop.f32.mrf.mxu3 }
 0x2a4   :  { %v1406_v33 = vpop.f32.mrf.mxu2  ;;  %v3582_v5 = vmov 1  }
 0x2a5   :  { %v1430_v7 = vpop.f32.mrf.mxu0  ;;  %3262 = vset.pattern.permute.xlu0 %v3582_v5 }
 0x2a6   :  { %v1458_v46 = vadd.f32 %v1435_v13, %v1430_v7  ;;  %1518 = vperm.xlu0 %3262, %v4743_v19  }
 0x2a8   :  { %v3092_v16 = vmul.f32 -1.442695, %v1458_v46 }
 0x2aa   :  { %3284 = vpow2.f32 %v3092_v16 }
 0x2ab   :  { %v1417_v24 = vpop.f32.mrf.mxu3 }
 0x2ac   :  { %v1438_v1 = vadd.f32 %v1434_v0, %v1417_v24 }
 0x2ad   :  { %v1432_v57 = vpop.f32.mrf.mxu0 }
 0x2ae   :  { %v3091_v62 = vmul.f32 -1.442695, %v1438_v1  ;;  %v4746_v57 = vld [vmem:[#allocation60_spill] sm:$0xff] }
 0x2af   :  { %v777_v1 = vadd.f32 %v4746_v57, %v748_v6 }
 0x2b0   :  { %v3285_v22 = vpop.eup %3284  ;;  %3286 = vpow2.f32 %v3091_v62 }
 0x2b1   :  { %v1462_v29 = vadd.f32 1.0, %v3285_v22  ;;  %v1437_v48 = vadd.f32 %v1404_v50, %v777_v1 }
 0x2b3   :  { %3288 = vrcp.f32 %v1462_v29  ;;  %v1419_v28 = vpop.f32.mrf.mxu3  ;;  %v1474_v62 = vand.u32 2147483648, %v1462_v29  ;;  %vm1468_vm13 = vweird.f32 %v1462_v29  ;;  %v1472_v22 = vand.u32 2147483647, %v1462_v29 }
 0x2b5   :  { %vm1473_vm0 = vcmp.eq.f32.partialorder %v1472_v22, 8.507059e+37 }
 0x2b6   :  { %v3287_v41 = vpop.eup %3286 }
 0x2b7   :  { %v1442_v33 = vadd.f32 1.0, %v3287_v41 }
 0x2b9   :  { %v3289_v61 = vpop.eup %3288  ;;  %3290 = vrcp.f32 %v1442_v33  ;;  %v1454_v28 = vand.u32 2147483648, %v1442_v33  ;;  %v1452_v38 = vand.u32 2147483647, %v1442_v33  ;;  %vm1448_vm1 = vweird.f32 %v1442_v33 }
 0x2ba   :  { %v1464_v13 = vmul.f32 %v3289_v61, %v1462_v29  ;;  %vm1469_vm12 = vweird.f32 %v3289_v61  ;;  %3292 = vtanh.f32 %v1437_v48 }
 0x2bb   :  { %vm1470_vm14 = vmor %vm1468_vm13, %vm1469_vm12  ;;  %v1455_v50 = vor.u32 1.1754944e-38, %v1454_v28  ;;  %vm1453_vm3 = vcmp.eq.f32.partialorder %v1452_v38, 8.507059e+37  ;;  %v1347_v28 = vpop.permute.xlu0 %1346 }
 0x2bc   :  { %v1465_v0 = vsub.f32 1.0, %v1464_v13  ;;  %v1475_v13 = vor.u32 1.1754944e-38, %v1474_v62 }
 0x2be   :  { %v1466_v7 = vmul.f32 %v3289_v61, %v1465_v0 }
 0x2bf   :  { %v3291_v46 = vpop.eup %3290 }
 0x2c0   :  { %v1467_v16 = vadd.f32 %v3289_v61, %v1466_v7  ;;  %v1444_v24 = vmul.f32 %v3291_v46, %v1442_v33  ;;  %vm1449_vm15 = vweird.f32 %v3291_v46  ;;  %v3293_v1 = vpop.eup %3292 }
 0x2c1   :  { %vm1450_vm2 = vmor %vm1448_vm1, %vm1449_vm15 }
 0x2c2   :  { %v1445_v5 = vsub.f32 1.0, %v1444_v24  ;;  %v1471_v8 = vsel %vm1470_vm14, %v3289_v61, %v1467_v16 }
 0x2c3   :  { %v1476_v0 = vsel %vm1473_vm0, %v1475_v13, %v1471_v8 }
 0x2c4   :  { %v1446_v41 = vmul.f32 %v3291_v46, %v1445_v5  ;;  %v1479_v29 = vmul.f32 %v1476_v0, %v4062_v14 }
 0x2c6   :  { %v1447_v6 = vadd.f32 %v3291_v46, %v1446_v41 }
 0x2c8   :  { %v1451_v57 = vsel %vm1450_vm2, %v3291_v46, %v1447_v6 }
 0x2c9   :  { %v1456_v7 = vsel %vm1453_vm3, %v1455_v50, %v1451_v57 }
 0x2ca   :  { %v1480_v48 = vmul.f32 %v3293_v1, %v1456_v7 }
 0x2cc   :  { %v4144_v24 = vadd.f32 %v1480_v48, %v1479_v29  ;;  %v1349_v29 = vmul.f32 %v1347_v28, %v4076_v39  ;;  %v4747_v39 = vld [vmem:[#allocation23_spill] sm:$0xff] }
 0x2cd   :  { %v4755_v28 = vld [vmem:[#allocation79_spill] sm:$0xff] }
 0x2ce   :  { %v1482_v5 = vpack.c.bf16 %v4144_v24, %v4144_v24 }
 0x2d0   :  { %1491 = vmatmul.bf16.vlgmr.msrb.gmra.mxu1 %v1482_v5 }
 0x2d1   :  { %1700 = vmatpush.bf16.msrb.mxu1 %v3672_v23 }
 0x2d5   :  { %1701 = vmatpush.bf16.msrb.mxu1 %v3677_v31 }
 0x2d9   :  { %1702 = vmatpush.bf16.msrb.mxu1 %v3692_v44 }
 0x2dd   :  { %1703 = vmatpush.bf16.msrb.mxu1 %v3697_v53 }
 0x2e1   :  { %1704 = vmatpush.bf16.msrb.mxu1 %v3713_v63 }
 0x2e5   :  { %1705 = vmatpush.bf16.msrb.mxu1 %v3724_v10 }
 0x2e9   :  { %1706 = vmatpush.bf16.msrb.mxu1 %v3735_v26 }
 0x2ed   :  { %1707 = vmatpush.bf16.msrb.mxu1 %v3751_v45 }
 0x34d   :  { %v1492_v14 = vpop.f32.mrf.mxu1 }
 0x34e   :  { %v1496_v33 = vadd.f32 %v1492_v14, %v4131_v42  ;;  %v1519_v42 = vpop.permute.xlu0 %1518 }
 0x350   :  { %v3093_v61 = vmul.f32 -1.442695, %v1496_v33 }
 0x352   :  { %3294 = vpow2.f32 %v3093_v61  ;;  %v4749_v61 = vld [vmem:[#allocation24_spill] sm:$0xff] }
 0x355   :  { %v1494_v8 = vpop.f32.mrf.mxu1 }
 0x356   :  { %v4750_v8 = vld [vmem:[#allocation29_spill] sm:$0xff] }
 0x358   :  { %v3295_v46 = vpop.eup %3294 }
 0x359   :  { %v1500_v16 = vadd.f32 1.0, %v3295_v46  ;;  %v4751_v46 = vld [vmem:[#allocation74_spill] sm:$0xff] }
 0x35b   :  { %3296 = vrcp.f32 %v1500_v16  ;;  %v1512_v38 = vand.u32 2147483648, %v1500_v16  ;;  %v1510_v6 = vand.u32 2147483647, %v1500_v16  ;;  %vm1506_vm5 = vweird.f32 %v1500_v16 }
 0x35d   :  { %v1513_v0 = vor.u32 1.1754944e-38, %v1512_v38  ;;  %vm1511_vm7 = vcmp.eq.f32.partialorder %v1510_v6, 8.507059e+37  ;;  %v4757_v38 = vld [vmem:[#allocation82_spill] sm:$0xff]  ;;  %v4759_v6 = vld [vmem:[#allocation83_spill] sm:$0xff] }
 0x361   :  { %v3297_v62 = vpop.eup %3296 }
 0x362   :  { %v1502_v22 = vmul.f32 %v3297_v62, %v1500_v16  ;;  %vm1507_vm4 = vweird.f32 %v3297_v62  ;;  %v4752_v16 = vld [vmem:[#allocation21_spill] sm:$0xff] }
 0x363   :  { %vm1508_vm6 = vmor %vm1506_vm5, %vm1507_vm4 }
 0x364   :  { %v1503_v41 = vsub.f32 1.0, %v1502_v22  ;;  %v4754_v22 = vld [vmem:[#allocation22_spill] sm:$0xff] }
 0x366   :  { %v1504_v13 = vmul.f32 %v3297_v62, %v1503_v41  ;;  %v4756_v41 = vld [vmem:[#allocation25_spill] sm:$0xff] }
 0x368   :  { %v1505_v50 = vadd.f32 %v3297_v62, %v1504_v13  ;;  %v4758_v13 = vld [vmem:[#allocation26_spill] sm:$0xff] }
 0x36a   :  { %v1509_v57 = vsel %vm1508_vm6, %v3297_v62, %v1505_v50  ;;  %v4753_v62 = vld [vmem:[#allocation78_spill] sm:$0xff]  ;;  %v4760_v50 = vld [vmem:[#allocation27_spill] sm:$0xff] }
 0x36b   :  { %v1514_v1 = vsel %vm1511_vm7, %v1513_v0, %v1509_v57  ;;  %v4761_v0 = vld [vmem:[#allocation84_spill] sm:$0xff] }
 0x36c   :  { %v1516_v7 = vmul.f32 %v1514_v1, %v4144_v24  ;;  %v4762_v57 = vld [vmem:[#allocation28_spill] sm:$0xff]  ;;  %v4764_v1 = vld [vmem:[#allocation30_spill] sm:$0xff] }
 0x36e   :  { %v1521_v48 = vmul.f32 %v1519_v42, %v1516_v7  ;;  %v1527_v14 = vpack.c.bf16 %v1516_v7, %v1516_v7  ;;  %v4763_v42 = vld [vmem:[#allocation85_spill] sm:$0xff]  ;;  %v4765_v7 = vld [vmem:[#allocation86_spill] sm:$0xff] }
 0x370   :  { %v4159_v33 = vadd.f32 %v1521_v48, %v1349_v29  ;;  %1536 = vmatmul.bf16.vlgmr.msrb.gmra.mxu2 %v1527_v14  ;;  %1549 = vmatmul.bf16.vlgmr.msrb.gmra.mxu3 %v1527_v14 }
 0x371   :  { %1562 = vmatmul.bf16.vlgmr.msra.gmra.mxu0 %v1527_v14  ;;  %1575 = vmatmul.bf16.vlgmr.msra.gmra.mxu1 %v1527_v14  ;;  %v4766_v14 = vld [vmem:[#allocation61_spill] sm:$0xff] }
 0x372   :  { %1713 = vmatpush.bf16.msrb.mxu2 %v3674_v27  ;;  %1726 = vmatpush.bf16.msrb.mxu3 %v3710_v59 }
 0x373   :  { %1739 = vmatpush.bf16.msra.mxu0 %v3702_v56  ;;  %1752 = vmatpush.bf16.msra.mxu1 %v3765_v30 }
 0x376   :  { %1714 = vmatpush.bf16.msrb.mxu2 %v3680_v32  ;;  %1727 = vmatpush.bf16.msrb.mxu3 %v3718_v4 }
 0x377   :  { %1740 = vmatpush.bf16.msra.mxu0 %v3721_v47  ;;  %1753 = vmatpush.bf16.msra.mxu1 %v3776_v12 }
 0x37a   :  { %1715 = vmatpush.bf16.msrb.mxu2 %v3694_v49  ;;  %1728 = vmatpush.bf16.msrb.mxu3 %v3730_v15 }
 0x37b   :  { %1741 = vmatpush.bf16.msra.mxu0 %v3732_v21  ;;  %1754 = vmatpush.bf16.msra.mxu1 %v3788_v43 }
 0x37e   :  { %1716 = vmatpush.bf16.msrb.mxu2 %v3700_v55  ;;  %1729 = vmatpush.bf16.msrb.mxu3 %v3742_v36 }
 0x37f   :  { %1742 = vmatpush.bf16.msra.mxu0 %v3744_v37  ;;  %1755 = vmatpush.bf16.msra.mxu1 %v3800_v2 }
 0x380   :  { %1588 = vmatmul.bf16.vlgmr.msra.gmra.mxu2 %v1482_v5  ;;  %1601 = vmatmul.bf16.vlgmr.msra.gmra.mxu3 %v1482_v5  ;;  %v4748_v5 = vld [vmem:[#allocation20_spill] sm:$0xff] }
 0x382   :  { %1717 = vmatpush.bf16.msrb.mxu2 %v3716_v3  ;;  %1730 = vmatpush.bf16.msrb.mxu3 %v3757_v52 }
 0x383   :  { %1743 = vmatpush.bf16.msra.mxu0 %v3761_v60  ;;  %1756 = vmatpush.bf16.msra.mxu1 %v3811_v17 }
 0x386   :  { %1718 = vmatpush.bf16.msrb.mxu2 %v3726_v11  ;;  %1731 = vmatpush.bf16.msrb.mxu3 %v3770_v34 }
 0x387   :  { %1744 = vmatpush.bf16.msra.mxu0 %v3774_v9  ;;  %1757 = vmatpush.bf16.msra.mxu1 %v3819_v18 }
 0x38a   :  { %1719 = vmatpush.bf16.msrb.mxu2 %v3738_v35  ;;  %1732 = vmatpush.bf16.msrb.mxu3 %v3781_v25 }
 0x38b   :  { %1745 = vmatpush.bf16.msra.mxu0 %v3784_v40  ;;  %1758 = vmatpush.bf16.msra.mxu1 %v3826_v58 }
 0x38e   :  { %1720 = vmatpush.bf16.msrb.mxu2 %v3755_v51  ;;  %1733 = vmatpush.bf16.msrb.mxu3 %v4747_v39 }
 0x38f   :  { %1746 = vmatpush.bf16.msra.mxu0 %v4749_v61  ;;  %1759 = vmatpush.bf16.msra.mxu1 %v4750_v8 }
 0x392   :  { %1765 = vmatpush.bf16.msra.mxu2 %v4748_v5  ;;  %1827 = vmatpush.bf16.msra.mxu3 %v4751_v46 }
 0x396   :  { %1766 = vmatpush.bf16.msra.mxu2 %v4752_v16  ;;  %1828 = vmatpush.bf16.msra.mxu3 %v4753_v62 }
 0x39a   :  { %1767 = vmatpush.bf16.msra.mxu2 %v4754_v22  ;;  %1829 = vmatpush.bf16.msra.mxu3 %v4755_v28 }
 0x39e   :  { %1768 = vmatpush.bf16.msra.mxu2 %v4756_v41  ;;  %1830 = vmatpush.bf16.msra.mxu3 %v4757_v38 }
 0x3a2   :  { %1769 = vmatpush.bf16.msra.mxu2 %v4758_v13  ;;  %1831 = vmatpush.bf16.msra.mxu3 %v4759_v6 }
 0x3a6   :  { %1770 = vmatpush.bf16.msra.mxu2 %v4760_v50  ;;  %1832 = vmatpush.bf16.msra.mxu3 %v4761_v0  ;;  %v4767_v0 = vld [vmem:[#allocation37_spill] sm:$0xff] }
 0x3aa   :  { %1771 = vmatpush.bf16.msra.mxu2 %v4762_v57  ;;  %1833 = vmatpush.bf16.msra.mxu3 %v4763_v42  ;;  %v4768_v57 = vld [vmem:[#allocation40_spill] sm:$0xff] }
 0x3ae   :  { %1772 = vmatpush.bf16.msra.mxu2 %v4764_v1  ;;  %1834 = vmatpush.bf16.msra.mxu3 %v4765_v7 }
 0x3ee   :  { %v1563_v29 = vpop.f32.mrf.mxu0  ;;  %v1576_v48 = vpop.f32.mrf.mxu1 }
 0x3ef   :  { %v4210_v20 = vadd.f32 %v1563_v29, %v4766_v14  ;;  %v3583_v29 = vmov 2  }
 0x3f0   :  { %3263 = vset.pattern.permute.xlu1 %v3583_v29 }
 0x3f1   :  { %1690 = vperm.xlu1 %3263, %v4743_v19  }
 0x3f3   :  { %v1537_v54 = vpop.f32.mrf.mxu2  ;;  %v1550_v13 = vpop.f32.mrf.mxu3 }
 0x3f4   :  { %v1606_v28 = vadd.f32 %v1537_v54, %v4767_v0  ;;  %v1607_v22 = vadd.f32 %v1550_v13, %v4768_v57 }
 0x3f6   :  { %v1565_v6 = vpop.f32.mrf.mxu0  ;;  %v1578_v38 = vpop.f32.mrf.mxu1 }
 0x3fb   :  { %v1539_v50 = vpop.f32.mrf.mxu2  ;;  %v1552_v41 = vpop.f32.mrf.mxu3 }
 0x3fc   :  { %v4769_v50 = vld [vmem:[#allocation64_spill] sm:$0xff] }
 0x403   :  { %v1589_v42 = vpop.f32.mrf.mxu2  ;;  %v1602_v62 = vpop.f32.mrf.mxu3 }
 0x404   :  { %v1610_v1 = vadd.f32 %v1606_v28, %v1589_v42  ;;  %v1630_v16 = vadd.f32 %v1607_v22, %v1602_v62  ;;  %v1609_v28 = vadd.f32 %v1576_v48, %v4769_v50 }
 0x406   :  { %v3094_v7 = vmul.f32 -1.442695, %v1610_v1  ;;  %v3095_v46 = vmul.f32 -1.442695, %v1630_v16 }
 0x408   :  { %3298 = vpow2.f32 %v3094_v7 }
 0x409   :  { %3300 = vpow2.f32 %v3095_v46 }
 0x40b   :  { %v1591_v14 = vpop.f32.mrf.mxu2  ;;  %v1604_v8 = vpop.f32.mrf.mxu3 }
 0x40e   :  { %v3299_v38 = vpop.eup %3298 }
 0x40f   :  { %v3301_v41 = vpop.eup %3300  ;;  %v1614_v6 = vadd.f32 1.0, %v3299_v38 }
 0x410   :  { %v1634_v54 = vadd.f32 1.0, %v3301_v41 }
 0x411   :  { %3302 = vrcp.f32 %v1614_v6  ;;  %v1626_v46 = vand.u32 2147483648, %v1614_v6  ;;  %v1624_v8 = vand.u32 2147483647, %v1614_v6  ;;  %vm1620_vm10 = vweird.f32 %v1614_v6 }
 0x412   :  { %3304 = vrcp.f32 %v1634_v54  ;;  %v1646_v1 = vand.u32 2147483648, %v1634_v54  ;;  %v1644_v29 = vand.u32 2147483647, %v1634_v54  ;;  %vm1640_vm12 = vweird.f32 %v1634_v54 }
 0x413   :  { %3306 = vtanh.f32 %v1609_v28  ;;  %v1627_v38 = vor.u32 1.1754944e-38, %v1626_v46  ;;  %vm1625_vm13 = vcmp.eq.f32.partialorder %v1624_v8, 8.507059e+37 }
 0x414   :  { %v1647_v50 = vor.u32 1.1754944e-38, %v1646_v1  ;;  %vm1645_vm15 = vcmp.eq.f32.partialorder %v1644_v29, 8.507059e+37 }
 0x417   :  { %v3303_v13 = vpop.eup %3302 }
 0x418   :  { %v3305_v62 = vpop.eup %3304  ;;  %v1616_v22 = vmul.f32 %v3303_v13, %v1614_v6  ;;  %vm1621_vm8 = vweird.f32 %v3303_v13 }
 0x419   :  { %v1636_v16 = vmul.f32 %v3305_v62, %v1634_v54  ;;  %vm1641_vm9 = vweird.f32 %v3305_v62  ;;  %vm1622_vm11 = vmor %vm1620_vm10, %vm1621_vm8  ;;  %v3307_v28 = vpop.eup %3306 }
 0x41a   :  { %v1617_v0 = vsub.f32 1.0, %v1616_v22  ;;  %vm1642_vm14 = vmor %vm1640_vm12, %vm1641_vm9 }
 0x41b   :  { %v1637_v57 = vsub.f32 1.0, %v1636_v16 }
 0x41c   :  { %v1618_v42 = vmul.f32 %v3303_v13, %v1617_v0 }
 0x41d   :  { %v1638_v7 = vmul.f32 %v3305_v62, %v1637_v57 }
 0x41e   :  { %v1619_v14 = vadd.f32 %v3303_v13, %v1618_v42 }
 0x41f   :  { %v1639_v41 = vadd.f32 %v3305_v62, %v1638_v7 }
 0x420   :  { %v1623_v48 = vsel %vm1622_vm11, %v3303_v13, %v1619_v14 }
 0x421   :  { %v1628_v22 = vsel %vm1625_vm13, %v1627_v38, %v1623_v48  ;;  %v1643_v16 = vsel %vm1642_vm14, %v3305_v62, %v1639_v41 }
 0x422   :  { %v1648_v0 = vsel %vm1645_vm15, %v1647_v50, %v1643_v16  ;;  %v1652_v19 = vmul.f32 %v3307_v28, %v1628_v22 }
 0x423   :  { %v1651_v57 = vmul.f32 %v1648_v0, %v4144_v24 }
 0x425   :  { %v4217_v61 = vadd.f32 %v1652_v19, %v1651_v57  ;;  %v4771_v57 = vld [vmem:[#allocation29_spill] sm:$0xff] }
 0x427   :  { %v1654_v6 = vpack.c.bf16 %v4217_v61, %v4217_v61 }
 0x429   :  { %1663 = vmatmul.bf16.vlgmr.msrb.gmra.mxu0 %v1654_v6 }
 0x42a   :  { %1872 = vmatpush.bf16.msrb.mxu0 %v3672_v23 }
 0x42e   :  { %1873 = vmatpush.bf16.msrb.mxu0 %v3677_v31 }
 0x432   :  { %1874 = vmatpush.bf16.msrb.mxu0 %v3692_v44 }
 0x436   :  { %1875 = vmatpush.bf16.msrb.mxu0 %v3697_v53 }
 0x43a   :  { %1876 = vmatpush.bf16.msrb.mxu0 %v3713_v63 }
 0x43e   :  { %1877 = vmatpush.bf16.msrb.mxu0 %v3724_v10 }
 0x442   :  { %1878 = vmatpush.bf16.msrb.mxu0 %v3735_v26 }
 0x446   :  { %1879 = vmatpush.bf16.msrb.mxu0 %v3751_v45 }
 0x4a6   :  { %v1664_v19 = vpop.f32.mrf.mxu0 }
 0x4a7   :  { %v1668_v24 = vadd.f32 %v1664_v19, %v4210_v20  ;;  %v1691_v20 = vpop.permute.xlu1 %1690  ;;  %v4773_v19 = vld [vmem:[#allocation21_spill] sm:$0xff] }
 0x4a9   :  { %v3096_v54 = vmul.f32 -1.442695, %v1668_v24  ;;  %v4774_v24 = vld [vmem:[#allocation78_spill] sm:$0xff] }
 0x4ab   :  { %3308 = vpow2.f32 %v3096_v54  ;;  %v4775_v54 = vld [vmem:[#allocation22_spill] sm:$0xff] }
 0x4ae   :  { %v1666_v13 = vpop.f32.mrf.mxu0 }
 0x4af   :  { %v4776_v13 = vld [vmem:[#allocation79_spill] sm:$0xff] }
 0x4b1   :  { %v3309_v62 = vpop.eup %3308 }
 0x4b2   :  { %v1672_v46 = vadd.f32 1.0, %v3309_v62  ;;  %v4777_v62 = vld [vmem:[#allocation25_spill] sm:$0xff] }
 0x4b4   :  { %3310 = vrcp.f32 %v1672_v46  ;;  %v1684_v7 = vand.u32 2147483648, %v1672_v46  ;;  %v1682_v14 = vand.u32 2147483647, %v1672_v46  ;;  %vm1678_vm1 = vweird.f32 %v1672_v46 }
 0x4b6   :  { %v1685_v41 = vor.u32 1.1754944e-38, %v1684_v7  ;;  %vm1683_vm3 = vcmp.eq.f32.partialorder %v1682_v14, 8.507059e+37  ;;  %v4782_v7 = vld [vmem:[#allocation84_spill] sm:$0xff]  ;;  %v4784_v14 = vld [vmem:[#allocation85_spill] sm:$0xff] }
 0x4ba   :  { %v3311_v42 = vpop.eup %3310 }
 0x4bb   :  { %v1674_v8 = vmul.f32 %v3311_v42, %v1672_v46  ;;  %vm1679_vm0 = vweird.f32 %v3311_v42  ;;  %v4778_v46 = vld [vmem:[#allocation82_spill] sm:$0xff] }
 0x4bc   :  { %vm1680_vm2 = vmor %vm1678_vm1, %vm1679_vm0 }
 0x4bd   :  { %v1675_v1 = vsub.f32 1.0, %v1674_v8  ;;  %v4780_v8 = vld [vmem:[#allocation83_spill] sm:$0xff] }
 0x4bf   :  { %v1676_v29 = vmul.f32 %v3311_v42, %v1675_v1  ;;  %v4781_v1 = vld [vmem:[#allocation27_spill] sm:$0xff] }
 0x4c1   :  { %v1677_v38 = vadd.f32 %v3311_v42, %v1676_v29  ;;  %v4783_v29 = vld [vmem:[#allocation28_spill] sm:$0xff] }
 0x4c3   :  { %v1681_v48 = vsel %vm1680_vm2, %v3311_v42, %v1677_v38  ;;  %v4779_v42 = vld [vmem:[#allocation26_spill] sm:$0xff] }
 0x4c4   :  { %v1686_v50 = vsel %vm1683_vm3, %v1685_v41, %v1681_v48  ;;  %v4785_v38 = vld [vmem:[#allocation30_spill] sm:$0xff] }
 0x4c5   :  { %v1688_v28 = vmul.f32 %v1686_v50, %v4217_v61  ;;  %v4786_v41 = vld [vmem:[#allocation86_spill] sm:$0xff]  ;;  %v4787_v50 = vld [vmem:[#allocation53_spill] sm:$0xff] }
 0x4c7   :  { %v1693_v22 = vmul.f32 %v1691_v20, %v1688_v28  ;;  %v1699_v16 = vpack.c.bf16 %v1688_v28, %v1688_v28  ;;  %v4788_v28 = vld [vmem:[#allocation62_spill] sm:$0xff] }
 0x4c9   :  { %v4232_v0 = vadd.f32 %v1693_v22, %v4159_v33  ;;  %1708 = vmatmul.bf16.vlgmr.msrb.gmra.mxu1 %v1699_v16  ;;  %1721 = vmatmul.bf16.vlgmr.msrb.gmra.mxu2 %v1699_v16  ;;  %v4770_v33 = vld [vmem:[#allocation24_spill] sm:$0xff]  ;;  %v695_v22 = vadd.f32 %v4788_v28, %v4787_v50 }
 0x4ca   :  { %1734 = vmatmul.bf16.vlgmr.msrb.gmra.mxu3 %v1699_v16  ;;  %1747 = vmatmul.bf16.vlgmr.msra.gmra.mxu0 %v1699_v16  ;;  %v4789_v16 = vld [vmem:[#allocation63_spill] sm:$0xff] }
 0x4cb   :  { %1885 = vmatpush.bf16.msrb.mxu1 %v3674_v27  ;;  %1898 = vmatpush.bf16.msrb.mxu2 %v3710_v59 }
 0x4cc   :  { %1911 = vmatpush.bf16.msrb.mxu3 %v3702_v56  ;;  %1924 = vmatpush.bf16.msra.mxu0 %v3765_v30 }
 0x4cf   :  { %1886 = vmatpush.bf16.msrb.mxu1 %v3680_v32  ;;  %1899 = vmatpush.bf16.msrb.mxu2 %v3718_v4 }
 0x4d0   :  { %1912 = vmatpush.bf16.msrb.mxu3 %v3721_v47  ;;  %1925 = vmatpush.bf16.msra.mxu0 %v3776_v12 }
 0x4d3   :  { %1887 = vmatpush.bf16.msrb.mxu1 %v3694_v49  ;;  %1900 = vmatpush.bf16.msrb.mxu2 %v3730_v15 }
 0x4d4   :  { %1913 = vmatpush.bf16.msrb.mxu3 %v3732_v21  ;;  %1926 = vmatpush.bf16.msra.mxu0 %v3788_v43 }
 0x4d7   :  { %1888 = vmatpush.bf16.msrb.mxu1 %v3700_v55  ;;  %1901 = vmatpush.bf16.msrb.mxu2 %v3742_v36 }
 0x4d8   :  { %1914 = vmatpush.bf16.msrb.mxu3 %v3744_v37  ;;  %1927 = vmatpush.bf16.msra.mxu0 %v3800_v2 }
 0x4d9   :  { %1760 = vmatmul.bf16.vlgmr.msra.gmra.mxu1 %v1654_v6  ;;  %1773 = vmatmul.bf16.vlgmr.msra.gmra.mxu2 %v1654_v6  ;;  %v4772_v6 = vld [vmem:[#allocation74_spill] sm:$0xff] }
 0x4db   :  { %1889 = vmatpush.bf16.msrb.mxu1 %v3716_v3  ;;  %1902 = vmatpush.bf16.msrb.mxu2 %v3757_v52 }
 0x4dc   :  { %1915 = vmatpush.bf16.msrb.mxu3 %v3761_v60  ;;  %1928 = vmatpush.bf16.msra.mxu0 %v3811_v17 }
 0x4df   :  { %1890 = vmatpush.bf16.msrb.mxu1 %v3726_v11  ;;  %1903 = vmatpush.bf16.msrb.mxu2 %v3770_v34 }
 0x4e0   :  { %1916 = vmatpush.bf16.msrb.mxu3 %v3774_v9  ;;  %1929 = vmatpush.bf16.msra.mxu0 %v3819_v18 }
 0x4e3   :  { %1891 = vmatpush.bf16.msrb.mxu1 %v3738_v35  ;;  %1904 = vmatpush.bf16.msrb.mxu2 %v3781_v25 }
 0x4e4   :  { %1917 = vmatpush.bf16.msrb.mxu3 %v3784_v40  ;;  %1930 = vmatpush.bf16.msra.mxu0 %v3826_v58 }
 0x4e7   :  { %1892 = vmatpush.bf16.msrb.mxu1 %v3755_v51  ;;  %1905 = vmatpush.bf16.msrb.mxu2 %v4747_v39 }
 0x4e8   :  { %1918 = vmatpush.bf16.msrb.mxu3 %v4770_v33  ;;  %1931 = vmatpush.bf16.msra.mxu0 %v4771_v57 }
 0x4eb   :  { %1937 = vmatpush.bf16.msra.mxu1 %v4748_v5  ;;  %1999 = vmatpush.bf16.msra.mxu2 %v4772_v6  ;;  %v724_v6 = vadd.f32 %v4789_v16, %v695_v22  ;;  %v4795_v22 = vld [vmem:[#allocation42_spill] sm:$0xff] }
 0x4ef   :  { %1938 = vmatpush.bf16.msra.mxu1 %v4773_v19  ;;  %2000 = vmatpush.bf16.msra.mxu2 %v4774_v24 }
 0x4f3   :  { %1939 = vmatpush.bf16.msra.mxu1 %v4775_v54  ;;  %2001 = vmatpush.bf16.msra.mxu2 %v4776_v13  ;;  %v4794_v54 = vld [vmem:[#allocation41_spill] sm:$0xff] }
 0x4f7   :  { %1940 = vmatpush.bf16.msra.mxu1 %v4777_v62  ;;  %2002 = vmatpush.bf16.msra.mxu2 %v4778_v46 }
 0x4fb   :  { %1941 = vmatpush.bf16.msra.mxu1 %v4779_v42  ;;  %2003 = vmatpush.bf16.msra.mxu2 %v4780_v8  ;;  %v4792_v42 = vld [vmem:[#allocation39_spill] sm:$0xff] }
 0x4ff   :  { %1942 = vmatpush.bf16.msra.mxu1 %v4781_v1  ;;  %2004 = vmatpush.bf16.msra.mxu2 %v4782_v7  ;;  %v4790_v7 = vld [vmem:[#allocation31_spill] sm:$0xff] }
 0x503   :  { %1943 = vmatpush.bf16.msra.mxu1 %v4783_v29  ;;  %2005 = vmatpush.bf16.msra.mxu2 %v4784_v14  ;;  %v4791_v29 = vld [vmem:[#allocation38_spill] sm:$0xff] }
 0x504   :  { %v579_v1 = vadd.f32 %v4791_v29, %v4790_v7  ;;  %v4819_v7 = vld [vmem:[#allocation67_spill] sm:$0xff] }
 0x507   :  { %1944 = vmatpush.bf16.msra.mxu1 %v4785_v38  ;;  %2006 = vmatpush.bf16.msra.mxu2 %v4786_v41  ;;  %v608_v38 = vadd.f32 %v4792_v42, %v579_v1  ;;  %v4793_v41 = vld [vmem:[#allocation32_spill] sm:$0xff]  ;;  %v4796_v1 = vld [vmem:[#allocation87_spill] sm:$0xff] }
 0x508   :  { %v637_v19 = vadd.f32 %v4794_v54, %v4793_v41  ;;  %v4797_v54 = vld [vmem:[#allocation56_spill] sm:$0xff] }
 0x50a   :  { %v666_v16 = vadd.f32 %v4795_v22, %v637_v19 }
 0x546   :  { %v1709_v48 = vpop.f32.mrf.mxu1 }
 0x547   :  { %v1748_v20 = vpop.f32.mrf.mxu0  ;;  %v1778_v57 = vadd.f32 %v1709_v48, %v608_v38  ;;  %v4799_v48 = vld [vmem:[#allocation66_spill] sm:$0xff] }
 0x54c   :  { %v1722_v24 = vpop.f32.mrf.mxu2 }
 0x54d   :  { %v1735_v13 = vpop.f32.mrf.mxu3 }
 0x54e   :  { %v4285_v46 = vadd.f32 %v1735_v13, %v724_v6  ;;  %v1711_v8 = vpop.f32.mrf.mxu1  ;;  %v1779_v6 = vadd.f32 %v1722_v24, %v666_v16 }
 0x54f   :  { %v1750_v14 = vpop.f32.mrf.mxu0 }
 0x554   :  { %v1724_v62 = vpop.f32.mrf.mxu2 }
 0x555   :  { %v1737_v33 = vpop.f32.mrf.mxu3  ;;  %v3584_v62 = vmov 3  }
 0x556   :  { %v1761_v28 = vpop.f32.mrf.mxu1  ;;  %3264 = vset.pattern.permute.xlu1 %v3584_v62  ;;  %v4798_v33 = vld [vmem:[#allocation65_spill] sm:$0xff] }
 0x557   :  { %v1782_v50 = vadd.f32 %v1778_v57, %v1761_v28  ;;  %1862 = vperm.xlu1 %3264, %v4796_v1   ;;  %v753_v38 = vadd.f32 %v4798_v33, %v4797_v54 }
 0x559   :  { %v3097_v5 = vmul.f32 -1.442695, %v1782_v50  ;;  %v782_v50 = vadd.f32 %v4799_v48, %v753_v38 }
 0x55b   :  { %3312 = vpow2.f32 %v3097_v5  ;;  %v1781_v28 = vadd.f32 %v1748_v20, %v782_v50 }
 0x55c   :  { %v1774_v13 = vpop.f32.mrf.mxu2 }
 0x55d   :  { %v1802_v8 = vadd.f32 %v1779_v6, %v1774_v13 }
 0x55e   :  { %v1763_v39 = vpop.f32.mrf.mxu1 }
 0x55f   :  { %v3098_v29 = vmul.f32 -1.442695, %v1802_v8 }
 0x561   :  { %v3313_v14 = vpop.eup %3312  ;;  %3314 = vpow2.f32 %v3098_v29 }
 0x562   :  { %v1786_v42 = vadd.f32 1.0, %v3313_v14 }
 0x564   :  { %3316 = vrcp.f32 %v1786_v42  ;;  %v1776_v57 = vpop.f32.mrf.mxu2  ;;  %v1798_v16 = vand.u32 2147483648, %v1786_v42  ;;  %v1796_v13 = vand.u32 2147483647, %v1786_v42  ;;  %vm1792_vm5 = vweird.f32 %v1786_v42 }
 0x566   :  { %v1799_v62 = vor.u32 1.1754944e-38, %v1798_v16  ;;  %vm1797_vm7 = vcmp.eq.f32.partialorder %v1796_v13, 8.507059e+37 }
 0x567   :  { %v3315_v19 = vpop.eup %3314 }
 0x568   :  { %v1806_v5 = vadd.f32 1.0, %v3315_v19 }
 0x56a   :  { %v3317_v24 = vpop.eup %3316  ;;  %3318 = vrcp.f32 %v1806_v5  ;;  %v1818_v20 = vand.u32 2147483648, %v1806_v5  ;;  %v1816_v48 = vand.u32 2147483647, %v1806_v5  ;;  %vm1812_vm9 = vweird.f32 %v1806_v5 }
 0x56b   :  { %v1788_v39 = vmul.f32 %v3317_v24, %v1786_v42  ;;  %3320 = vtanh.f32 %v1781_v28  ;;  %vm1793_vm4 = vweird.f32 %v3317_v24 }
 0x56c   :  { %vm1794_vm6 = vmor %vm1792_vm5, %vm1793_vm4  ;;  %vm1817_vm11 = vcmp.eq.f32.partialorder %v1816_v48, 8.507059e+37 }
 0x56d   :  { %v1789_v22 = vsub.f32 1.0, %v1788_v39  ;;  %v1819_v39 = vor.u32 1.1754944e-38, %v1818_v20 }
 0x56f   :  { %v1790_v6 = vmul.f32 %v3317_v24, %v1789_v22 }
 0x570   :  { %v3319_v8 = vpop.eup %3318 }
 0x571   :  { %v1791_v29 = vadd.f32 %v3317_v24, %v1790_v6  ;;  %v1808_v14 = vmul.f32 %v3319_v8, %v1806_v5  ;;  %v3321_v38 = vpop.eup %3320  ;;  %vm1813_vm8 = vweird.f32 %v3319_v8 }
 0x572   :  { %vm1814_vm10 = vmor %vm1812_vm9, %vm1813_vm8 }
 0x573   :  { %v1795_v1 = vsel %vm1794_vm6, %v3317_v24, %v1791_v29  ;;  %v1809_v33 = vsub.f32 1.0, %v1808_v14 }
 0x574   :  { %v1800_v57 = vsel %vm1797_vm7, %v1799_v62, %v1795_v1 }
 0x575   :  { %v1810_v19 = vmul.f32 %v3319_v8, %v1809_v33  ;;  %v1824_v50 = vmul.f32 %v3321_v38, %v1800_v57 }
 0x577   :  { %v1811_v28 = vadd.f32 %v3319_v8, %v1810_v19 }
 0x579   :  { %v1815_v22 = vsel %vm1814_vm10, %v3319_v8, %v1811_v28 }
 0x57a   :  { %v1820_v42 = vsel %vm1817_vm11, %v1819_v39, %v1815_v22 }
 0x57b   :  { %v1823_v6 = vmul.f32 %v1820_v42, %v4217_v61 }
 0x57d   :  { %v4298_v16 = vadd.f32 %v1824_v50, %v1823_v6 }
 0x57f   :  { %v1826_v24 = vpack.c.bf16 %v4298_v16, %v4298_v16 }
 0x581   :  { %1835 = vmatmul.bf16.vlgmr.msra.gmra.mxu3 %v1826_v24 }
 0x582   :  { %2044 = vmatpush.bf16.msra.mxu3 %v3672_v23 }
 0x586   :  { %2045 = vmatpush.bf16.msra.mxu3 %v3677_v31 }
 0x58a   :  { %2046 = vmatpush.bf16.msra.mxu3 %v3692_v44 }
 0x58e   :  { %2047 = vmatpush.bf16.msra.mxu3 %v3697_v53 }
 0x592   :  { %2048 = vmatpush.bf16.msra.mxu3 %v3713_v63 }
 0x596   :  { %2049 = vmatpush.bf16.msra.mxu3 %v3724_v10 }
 0x59a   :  { %2050 = vmatpush.bf16.msra.mxu3 %v3735_v26 }
 0x59e   :  { %2051 = vmatpush.bf16.msra.mxu3 %v3751_v45 }
 0x604   :  { %v1836_v61 = vpop.f32.mrf.mxu3 }
 0x605   :  { %v1840_v5 = vadd.f32 %v1836_v61, %v4285_v46  ;;  %v1863_v46 = vpop.permute.xlu1 %1862  ;;  %v4802_v61 = vld [vmem:[#allocation24_spill] sm:$0xff] }
 0x607   :  { %v3099_v13 = vmul.f32 -1.442695, %v1840_v5  ;;  %v4803_v5 = vld [vmem:[#allocation29_spill] sm:$0xff] }
 0x609   :  { %3322 = vpow2.f32 %v3099_v13  ;;  %v4348_v13 = vld [vmem:[#allocation11 + $0x38] sm:$0xff] }
 0x60a   :  { %4804 = vst [vmem:[#allocation57_spill] sm:$0xff] %v4348_v13 }
 0x60c   :  { %v1838_v8 = vpop.f32.mrf.mxu3 }
 0x60d   :  { %v4805_v8 = vld [vmem:[#allocation21_spill] sm:$0xff] }
 0x60f   :  { %v3323_v29 = vpop.eup %3322 }
 0x610   :  { %v1844_v14 = vadd.f32 1.0, %v3323_v29  ;;  %v4352_v29 = vld [vmem:[#allocation11 + $0x30] sm:$0xff] }
 0x611   :  { %4806 = vst [vmem:[#allocation58_spill] sm:$0xff] %v4352_v29 }
 0x612   :  { %3324 = vrcp.f32 %v1844_v14  ;;  %v1856_v38 = vand.u32 2147483648, %v1844_v14  ;;  %v1854_v20 = vand.u32 2147483647, %v1844_v14  ;;  %vm1850_vm13 = vweird.f32 %v1844_v14 }
 0x614   :  { %v1857_v48 = vor.u32 1.1754944e-38, %v1856_v38  ;;  %vm1855_vm15 = vcmp.eq.f32.partialorder %v1854_v20, 8.507059e+37  ;;  %v4811_v38 = vld [vmem:[#allocation26_spill] sm:$0xff]  ;;  %v4813_v20 = vld [vmem:[#allocation27_spill] sm:$0xff] }
 0x618   :  { %v3325_v62 = vpop.eup %3324 }
 0x619   :  { %v1846_v1 = vmul.f32 %v3325_v62, %v1844_v14  ;;  %vm1851_vm12 = vweird.f32 %v3325_v62  ;;  %v4807_v14 = vld [vmem:[#allocation22_spill] sm:$0xff] }
 0x61a   :  { %vm1852_vm14 = vmor %vm1850_vm13, %vm1851_vm12 }
 0x61b   :  { %v1847_v33 = vsub.f32 1.0, %v1846_v1  ;;  %v4809_v1 = vld [vmem:[#allocation25_spill] sm:$0xff] }
 0x61d   :  { %v1848_v57 = vmul.f32 %v3325_v62, %v1847_v33  ;;  %v4360_v33 = vld [vmem:[#allocation11 + $0x20] sm:$0xff] }
 0x61e   :  { %4810 = vst [vmem:[#allocation36_spill] sm:$0xff] %v4360_v33 }
 0x61f   :  { %v1849_v19 = vadd.f32 %v3325_v62, %v1848_v57  ;;  %v4364_v57 = vld [vmem:[#allocation11 + $0x18] sm:$0xff] }
 0x620   :  { %4812 = vst [vmem:[#allocation33_spill] sm:$0xff] %v4364_v57 }
 0x621   :  { %v1853_v50 = vsel %vm1852_vm14, %v3325_v62, %v1849_v19  ;;  %v4356_v62 = vld [vmem:[#allocation11 + $0x28] sm:$0xff]  ;;  %v4368_v19 = vld [vmem:[#allocation11 + $0x10] sm:$0xff] }
 0x622   :  { %v1858_v28 = vsel %vm1855_vm15, %v1857_v48, %v1853_v50  ;;  %4808 = vst [vmem:[#allocation35_spill] sm:$0xff] %v4356_v62  ;;  %v4815_v48 = vld [vmem:[#allocation28_spill] sm:$0xff]  ;;  %v4372_v50 = vld [vmem:[#allocation11 + $0x8] sm:$0xff] }
 0x623   :  { %v1860_v39 = vmul.f32 %v1858_v28, %v4298_v16  ;;  %4814 = vst [vmem:[#allocation34_spill] sm:$0xff] %v4368_v19  ;;  %v4376_v28 = vld [vmem:[#allocation11] sm:$0xff] }
 0x624   :  { %4816 = vst [vmem:[#allocation59_spill] sm:$0xff] %v4372_v50 }
 0x625   :  { %v1865_v22 = vmul.f32 %v1863_v46, %v1860_v39  ;;  %v1871_v42 = vpack.c.bf16 %v1860_v39, %v1860_v39  ;;  %v4817_v46 = vld [vmem:[#allocation30_spill] sm:$0xff]  ;;  %4818 = vst [vmem:[#allocation60_spill] sm:$0xff] %v4376_v28 }
 0x627   :  { %v4313_v6 = vadd.f32 %v1865_v22, %v4232_v0  ;;  %1880 = vmatmul.bf16.vlgmr.msrb.gmra.mxu0 %v1871_v42  ;;  %1893 = vmatmul.bf16.vlgmr.msrb.gmra.mxu1 %v1871_v42  ;;  %v4800_v0 = vld [vmem:[#allocation23_spill] sm:$0xff] }
 0x628   :  { %1906 = vmatmul.bf16.vlgmr.msrb.gmra.mxu2 %v1871_v42  ;;  %1919 = vmatmul.bf16.vlgmr.msrb.gmra.mxu3 %v1871_v42 }
 0x629   :  { %2057 = vmatpush.bf16.msrb.mxu0 %v3674_v27  ;;  %2070 = vmatpush.bf16.msrb.mxu1 %v3710_v59 }
 0x62a   :  { %2083 = vmatpush.bf16.msrb.mxu2 %v3702_v56  ;;  %2096 = vmatpush.bf16.msrb.mxu3 %v3765_v30 }
 0x62d   :  { %2058 = vmatpush.bf16.msrb.mxu0 %v3680_v32  ;;  %2071 = vmatpush.bf16.msrb.mxu1 %v3718_v4 }
 0x62e   :  { %2084 = vmatpush.bf16.msrb.mxu2 %v3721_v47  ;;  %2097 = vmatpush.bf16.msrb.mxu3 %v3776_v12 }
 0x631   :  { %2059 = vmatpush.bf16.msrb.mxu0 %v3694_v49  ;;  %2072 = vmatpush.bf16.msrb.mxu1 %v3730_v15 }
 0x632   :  { %2085 = vmatpush.bf16.msrb.mxu2 %v3732_v21  ;;  %2098 = vmatpush.bf16.msrb.mxu3 %v3788_v43 }
 0x635   :  { %2060 = vmatpush.bf16.msrb.mxu0 %v3700_v55  ;;  %2073 = vmatpush.bf16.msrb.mxu1 %v3742_v36 }
 0x636   :  { %2086 = vmatpush.bf16.msrb.mxu2 %v3744_v37  ;;  %2099 = vmatpush.bf16.msrb.mxu3 %v3800_v2 }
 0x637   :  { %1932 = vmatmul.bf16.vlgmr.msra.gmra.mxu0 %v1826_v24  ;;  %1945 = vmatmul.bf16.vlgmr.msra.gmra.mxu1 %v1826_v24  ;;  %v4801_v24 = vld [vmem:[#allocation20_spill] sm:$0xff] }
 0x639   :  { %2061 = vmatpush.bf16.msrb.mxu0 %v3716_v3  ;;  %2074 = vmatpush.bf16.msrb.mxu1 %v3757_v52 }
 0x63a   :  { %2087 = vmatpush.bf16.msrb.mxu2 %v3761_v60  ;;  %2100 = vmatpush.bf16.msrb.mxu3 %v3811_v17 }
 0x63d   :  { %2062 = vmatpush.bf16.msrb.mxu0 %v3726_v11  ;;  %2075 = vmatpush.bf16.msrb.mxu1 %v3770_v34 }
 0x63e   :  { %2088 = vmatpush.bf16.msrb.mxu2 %v3774_v9  ;;  %2101 = vmatpush.bf16.msrb.mxu3 %v3819_v18 }
 0x641   :  { %2063 = vmatpush.bf16.msrb.mxu0 %v3738_v35  ;;  %2076 = vmatpush.bf16.msrb.mxu1 %v3781_v25 }
 0x642   :  { %2089 = vmatpush.bf16.msrb.mxu2 %v3784_v40  ;;  %2102 = vmatpush.bf16.msrb.mxu3 %v3826_v58 }
 0x645   :  { %2064 = vmatpush.bf16.msrb.mxu0 %v3755_v51  ;;  %2077 = vmatpush.bf16.msrb.mxu1 %v4800_v0 }
 0x646   :  { %2090 = vmatpush.bf16.msrb.mxu2 %v4802_v61  ;;  %2103 = vmatpush.bf16.msrb.mxu3 %v4803_v5 }
 0x649   :  { %2109 = vmatpush.bf16.msra.mxu0 %v4801_v24  ;;  %2171 = vmatpush.bf16.msra.mxu1 %v4348_v13  ;;  %v3585_v13 = vmov 4  }
 0x64a   :  { %3265 = vset.pattern.permute.xlu2 %v3585_v13 }
 0x64d   :  { %2110 = vmatpush.bf16.msra.mxu0 %v4805_v8  ;;  %2172 = vmatpush.bf16.msra.mxu1 %v4352_v29 }
 0x651   :  { %2111 = vmatpush.bf16.msra.mxu0 %v4807_v14  ;;  %2173 = vmatpush.bf16.msra.mxu1 %v4356_v62 }
 0x655   :  { %2112 = vmatpush.bf16.msra.mxu0 %v4809_v1  ;;  %2174 = vmatpush.bf16.msra.mxu1 %v4360_v33 }
 0x659   :  { %2113 = vmatpush.bf16.msra.mxu0 %v4811_v38  ;;  %2175 = vmatpush.bf16.msra.mxu1 %v4364_v57  ;;  %v4821_v38 = vld [vmem:[#allocation46_spill] sm:$0xff] }
 0x65d   :  { %2114 = vmatpush.bf16.msra.mxu0 %v4813_v20  ;;  %2176 = vmatpush.bf16.msra.mxu1 %v4368_v19 }
 0x661   :  { %2115 = vmatpush.bf16.msra.mxu0 %v4815_v48  ;;  %2177 = vmatpush.bf16.msra.mxu1 %v4372_v50  ;;  %v4820_v48 = vld [vmem:[#allocation43_spill] sm:$0xff] }
 0x665   :  { %2116 = vmatpush.bf16.msra.mxu0 %v4817_v46  ;;  %2178 = vmatpush.bf16.msra.mxu1 %v4376_v28 }
 0x6a4   :  { %v1881_v39 = vpop.f32.mrf.mxu0  ;;  %v1894_v22 = vpop.f32.mrf.mxu1 }
 0x6a5   :  { %v1950_v57 = vadd.f32 %v1881_v39, %v4820_v48  ;;  %v1951_v33 = vadd.f32 %v1894_v22, %v4821_v38 }
 0x6ab   :  { %v1907_v42 = vpop.f32.mrf.mxu2  ;;  %v1920_v54 = vpop.f32.mrf.mxu3 }
 0x6ac   :  { %v4380_v41 = vadd.f32 %v1907_v42, %v4819_v7  ;;  %v1883_v19 = vpop.f32.mrf.mxu0  ;;  %v1896_v20 = vpop.f32.mrf.mxu1 }
 0x6ad   :  { %v4384_v19 = vld [vmem:[#allocation12] sm:$0xff] }
 0x6ae   :  { %4822 = vst [vmem:[#allocation61_spill] sm:$0xff] %v4384_v19  ;;  %2034 = vperm.xlu2 %3265, %v4384_v19  }
 0x6b3   :  { %v1909_v50 = vpop.f32.mrf.mxu2  ;;  %v1922_v1 = vpop.f32.mrf.mxu3 }
 0x6b4   :  { %v1933_v46 = vpop.f32.mrf.mxu0  ;;  %v1946_v62 = vpop.f32.mrf.mxu1 }
 0x6b5   :  { %v1954_v14 = vadd.f32 %v1950_v57, %v1933_v46  ;;  %v1974_v29 = vadd.f32 %v1951_v33, %v1946_v62  ;;  %v4823_v62 = vld [vmem:[#allocation70_spill] sm:$0xff] }
 0x6b7   :  { %v3100_v28 = vmul.f32 -1.442695, %v1954_v14  ;;  %v3101_v8 = vmul.f32 -1.442695, %v1974_v29  ;;  %v1953_v14 = vadd.f32 %v1920_v54, %v4823_v62 }
 0x6b9   :  { %3326 = vpow2.f32 %v3100_v28 }
 0x6ba   :  { %3328 = vpow2.f32 %v3101_v8 }
 0x6bc   :  { %v1935_v7 = vpop.f32.mrf.mxu0  ;;  %v1948_v42 = vpop.f32.mrf.mxu1 }
 0x6bf   :  { %v3327_v20 = vpop.eup %3326 }
 0x6c0   :  { %v3329_v38 = vpop.eup %3328  ;;  %v1958_v48 = vadd.f32 1.0, %v3327_v20 }
 0x6c1   :  { %v1978_v1 = vadd.f32 1.0, %v3329_v38 }
 0x6c2   :  { %3330 = vrcp.f32 %v1958_v48  ;;  %v1970_v13 = vand.u32 2147483648, %v1958_v48  ;;  %v1968_v39 = vand.u32 2147483647, %v1958_v48  ;;  %vm1964_vm2 = vweird.f32 %v1958_v48 }
 0x6c3   :  { %3332 = vrcp.f32 %v1978_v1  ;;  %v1990_v22 = vand.u32 2147483648, %v1978_v1  ;;  %v1988_v42 = vand.u32 2147483647, %v1978_v1  ;;  %vm1984_vm4 = vweird.f32 %v1978_v1 }
 0x6c4   :  { %3334 = vtanh.f32 %v1953_v14  ;;  %v1971_v38 = vor.u32 1.1754944e-38, %v1970_v13  ;;  %vm1969_vm5 = vcmp.eq.f32.partialorder %v1968_v39, 8.507059e+37 }
 0x6c5   :  { %v1991_v62 = vor.u32 1.1754944e-38, %v1990_v22  ;;  %vm1989_vm7 = vcmp.eq.f32.partialorder %v1988_v42, 8.507059e+37 }
 0x6c8   :  { %v3331_v57 = vpop.eup %3330 }
 0x6c9   :  { %v3333_v29 = vpop.eup %3332  ;;  %v1960_v33 = vmul.f32 %v3331_v57, %v1958_v48  ;;  %vm1965_vm0 = vweird.f32 %v3331_v57 }
 0x6ca   :  { %v1980_v8 = vmul.f32 %v3333_v29, %v1978_v1  ;;  %vm1985_vm1 = vweird.f32 %v3333_v29  ;;  %vm1966_vm3 = vmor %vm1964_vm2, %vm1965_vm0  ;;  %v3335_v14 = vpop.eup %3334 }
 0x6cb   :  { %v1961_v50 = vsub.f32 1.0, %v1960_v33  ;;  %vm1986_vm6 = vmor %vm1984_vm4, %vm1985_vm1 }
 0x6cc   :  { %v1981_v46 = vsub.f32 1.0, %v1980_v8 }
 0x6cd   :  { %v1962_v28 = vmul.f32 %v3331_v57, %v1961_v50 }
 0x6ce   :  { %v1982_v7 = vmul.f32 %v3333_v29, %v1981_v46 }
 0x6cf   :  { %v1963_v20 = vadd.f32 %v3331_v57, %v1962_v28 }
 0x6d0   :  { %v1983_v19 = vadd.f32 %v3333_v29, %v1982_v7 }
 0x6d1   :  { %v1967_v54 = vsel %vm1966_vm3, %v3331_v57, %v1963_v20 }
 0x6d2   :  { %v1972_v33 = vsel %vm1969_vm5, %v1971_v38, %v1967_v54  ;;  %v1987_v8 = vsel %vm1986_vm6, %v3333_v29, %v1983_v19 }
 0x6d3   :  { %v1992_v50 = vsel %vm1989_vm7, %v1991_v62, %v1987_v8  ;;  %v1996_v5 = vmul.f32 %v3335_v14, %v1972_v33 }
 0x6d4   :  { %v1995_v46 = vmul.f32 %v1992_v50, %v4298_v16 }
 0x6d6   :  { %v4389_v61 = vadd.f32 %v1996_v5, %v1995_v46  ;;  %v4825_v46 = vld [vmem:[#allocation29_spill] sm:$0xff] }
 0x6d8   :  { %v1998_v48 = vpack.c.bf16 %v4389_v61, %v4389_v61 }
 0x6da   :  { %2007 = vmatmul.bf16.vlgmr.msra.gmra.mxu2 %v1998_v48 }
 0x6db   :  { %2216 = vmatpush.bf16.msra.mxu2 %v3672_v23 }
 0x6df   :  { %2217 = vmatpush.bf16.msra.mxu2 %v3677_v31 }
 0x6e3   :  { %2218 = vmatpush.bf16.msra.mxu2 %v3692_v44 }
 0x6e7   :  { %2219 = vmatpush.bf16.msra.mxu2 %v3697_v53 }
 0x6eb   :  { %2220 = vmatpush.bf16.msra.mxu2 %v3713_v63 }
 0x6ef   :  { %2221 = vmatpush.bf16.msra.mxu2 %v3724_v10 }
 0x6f3   :  { %2222 = vmatpush.bf16.msra.mxu2 %v3735_v26 }
 0x6f7   :  { %2223 = vmatpush.bf16.msra.mxu2 %v3751_v45 }
 0x75d   :  { %v2008_v16 = vpop.f32.mrf.mxu2 }
 0x75e   :  { %v2012_v5 = vadd.f32 %v2008_v16, %v4380_v41  ;;  %v2035_v41 = vpop.permute.xlu2 %2034  ;;  %v4827_v16 = vld [vmem:[#allocation21_spill] sm:$0xff] }
 0x760   :  { %v3102_v19 = vmul.f32 -1.442695, %v2012_v5  ;;  %v4828_v5 = vld [vmem:[#allocation58_spill] sm:$0xff] }
 0x762   :  { %3336 = vpow2.f32 %v3102_v19  ;;  %v4829_v19 = vld [vmem:[#allocation22_spill] sm:$0xff] }
 0x765   :  { %v2010_v1 = vpop.f32.mrf.mxu2 }
 0x766   :  { %v4830_v1 = vld [vmem:[#allocation35_spill] sm:$0xff] }
 0x768   :  { %v3337_v57 = vpop.eup %3336 }
 0x769   :  { %v2016_v29 = vadd.f32 1.0, %v3337_v57  ;;  %v4831_v57 = vld [vmem:[#allocation25_spill] sm:$0xff] }
 0x76b   :  { %3338 = vrcp.f32 %v2016_v29  ;;  %v2028_v22 = vand.u32 2147483648, %v2016_v29  ;;  %v2026_v42 = vand.u32 2147483647, %v2016_v29  ;;  %vm2022_vm9 = vweird.f32 %v2016_v29 }
 0x76d   :  { %v2029_v38 = vor.u32 1.1754944e-38, %v2028_v22  ;;  %vm2027_vm11 = vcmp.eq.f32.partialorder %v2026_v42, 8.507059e+37  ;;  %v4836_v22 = vld [vmem:[#allocation34_spill] sm:$0xff]  ;;  %v4838_v42 = vld [vmem:[#allocation59_spill] sm:$0xff] }
 0x771   :  { %v3339_v13 = vpop.eup %3338 }
 0x772   :  { %v2018_v28 = vmul.f32 %v3339_v13, %v2016_v29  ;;  %vm2023_vm8 = vweird.f32 %v3339_v13  ;;  %v4832_v29 = vld [vmem:[#allocation36_spill] sm:$0xff] }
 0x773   :  { %vm2024_vm10 = vmor %vm2022_vm9, %vm2023_vm8 }
 0x774   :  { %v2019_v39 = vsub.f32 1.0, %v2018_v28  ;;  %v4834_v28 = vld [vmem:[#allocation33_spill] sm:$0xff] }
 0x776   :  { %v2020_v7 = vmul.f32 %v3339_v13, %v2019_v39  ;;  %v4835_v39 = vld [vmem:[#allocation27_spill] sm:$0xff] }
 0x778   :  { %v2021_v20 = vadd.f32 %v3339_v13, %v2020_v7  ;;  %v4837_v7 = vld [vmem:[#allocation28_spill] sm:$0xff] }
 0x77a   :  { %v2025_v54 = vsel %vm2024_vm10, %v3339_v13, %v2021_v20  ;;  %v4833_v13 = vld [vmem:[#allocation26_spill] sm:$0xff] }
 0x77b   :  { %v2030_v62 = vsel %vm2027_vm11, %v2029_v38, %v2025_v54  ;;  %v4839_v20 = vld [vmem:[#allocation30_spill] sm:$0xff]  ;;  %v4840_v38 = vld [vmem:[#allocation60_spill] sm:$0xff]  ;;  %v4841_v54 = vld [vmem:[#allocation53_spill] sm:$0xff] }
 0x77c   :  { %v2032_v14 = vmul.f32 %v2030_v62, %v4389_v61 }
 0x77e   :  { %v2037_v33 = vmul.f32 %v2035_v41, %v2032_v14  ;;  %v2043_v8 = vpack.c.bf16 %v2032_v14, %v2032_v14  ;;  %v4842_v41 = vld [vmem:[#allocation68_spill] sm:$0xff]  ;;  %v4843_v14 = vld [vmem:[#allocation69_spill] sm:$0xff] }
 0x77f   :  { %v700_v62 = vadd.f32 %v4842_v41, %v4841_v54 }
 0x780   :  { %v4404_v50 = vadd.f32 %v2037_v33, %v4313_v6  ;;  %2052 = vmatmul.bf16.vlgmr.msra.gmra.mxu3 %v2043_v8  ;;  %2065 = vmatmul.bf16.vlgmr.msrb.gmra.mxu0 %v2043_v8  ;;  %v4824_v6 = vld [vmem:[#allocation24_spill] sm:$0xff] }
 0x781   :  { %2078 = vmatmul.bf16.vlgmr.msrb.gmra.mxu1 %v2043_v8  ;;  %2091 = vmatmul.bf16.vlgmr.msrb.gmra.mxu2 %v2043_v8  ;;  %v729_v33 = vadd.f32 %v4843_v14, %v700_v62 }
 0x782   :  { %2229 = vmatpush.bf16.msra.mxu3 %v3674_v27  ;;  %2242 = vmatpush.bf16.msrb.mxu0 %v3710_v59 }
 0x783   :  { %2255 = vmatpush.bf16.msrb.mxu1 %v3702_v56  ;;  %2268 = vmatpush.bf16.msrb.mxu2 %v3765_v30 }
 0x786   :  { %2230 = vmatpush.bf16.msra.mxu3 %v3680_v32  ;;  %2243 = vmatpush.bf16.msrb.mxu0 %v3718_v4 }
 0x787   :  { %2256 = vmatpush.bf16.msrb.mxu1 %v3721_v47  ;;  %2269 = vmatpush.bf16.msrb.mxu2 %v3776_v12 }
 0x78a   :  { %2231 = vmatpush.bf16.msra.mxu3 %v3694_v49  ;;  %2244 = vmatpush.bf16.msrb.mxu0 %v3730_v15 }
 0x78b   :  { %2257 = vmatpush.bf16.msrb.mxu1 %v3732_v21  ;;  %2270 = vmatpush.bf16.msrb.mxu2 %v3788_v43 }
 0x78e   :  { %2232 = vmatpush.bf16.msra.mxu3 %v3700_v55  ;;  %2245 = vmatpush.bf16.msrb.mxu0 %v3742_v36 }
 0x78f   :  { %2258 = vmatpush.bf16.msrb.mxu1 %v3744_v37  ;;  %2271 = vmatpush.bf16.msrb.mxu2 %v3800_v2 }
 0x790   :  { %2104 = vmatmul.bf16.vlgmr.msrb.gmra.mxu3 %v1998_v48  ;;  %2117 = vmatmul.bf16.vlgmr.msra.gmra.mxu0 %v1998_v48  ;;  %v4826_v48 = vld [vmem:[#allocation57_spill] sm:$0xff] }
 0x792   :  { %2233 = vmatpush.bf16.msra.mxu3 %v3716_v3  ;;  %2246 = vmatpush.bf16.msrb.mxu0 %v3757_v52 }
 0x793   :  { %2259 = vmatpush.bf16.msrb.mxu1 %v3761_v60  ;;  %2272 = vmatpush.bf16.msrb.mxu2 %v3811_v17 }
 0x796   :  { %2234 = vmatpush.bf16.msra.mxu3 %v3726_v11  ;;  %2247 = vmatpush.bf16.msrb.mxu0 %v3770_v34 }
 0x797   :  { %2260 = vmatpush.bf16.msrb.mxu1 %v3774_v9  ;;  %2273 = vmatpush.bf16.msrb.mxu2 %v3819_v18 }
 0x79a   :  { %2235 = vmatpush.bf16.msra.mxu3 %v3738_v35  ;;  %2248 = vmatpush.bf16.msrb.mxu0 %v3781_v25 }
 0x79b   :  { %2261 = vmatpush.bf16.msrb.mxu1 %v3784_v40  ;;  %2274 = vmatpush.bf16.msrb.mxu2 %v3826_v58 }
 0x79e   :  { %2236 = vmatpush.bf16.msra.mxu3 %v3755_v51  ;;  %2249 = vmatpush.bf16.msrb.mxu0 %v4800_v0 }
 0x79f   :  { %2262 = vmatpush.bf16.msrb.mxu1 %v4824_v6  ;;  %2275 = vmatpush.bf16.msrb.mxu2 %v4825_v46  ;;  %v4849_v46 = vld [vmem:[#allocation45_spill] sm:$0xff] }
 0x7a2   :  { %2281 = vmatpush.bf16.msrb.mxu3 %v4801_v24  ;;  %2343 = vmatpush.bf16.msra.mxu0 %v4826_v48 }
 0x7a6   :  { %2282 = vmatpush.bf16.msrb.mxu3 %v4827_v16  ;;  %2344 = vmatpush.bf16.msra.mxu0 %v4828_v5  ;;  %v4848_v16 = vld [vmem:[#allocation44_spill] sm:$0xff] }
 0x7aa   :  { %2283 = vmatpush.bf16.msrb.mxu3 %v4829_v19  ;;  %2345 = vmatpush.bf16.msra.mxu0 %v4830_v1  ;;  %v4846_v19 = vld [vmem:[#allocation48_spill] sm:$0xff] }
 0x7ae   :  { %2284 = vmatpush.bf16.msrb.mxu3 %v4831_v57  ;;  %2346 = vmatpush.bf16.msra.mxu0 %v4832_v29  ;;  %v4844_v57 = vld [vmem:[#allocation32_spill] sm:$0xff] }
 0x7b2   :  { %2285 = vmatpush.bf16.msrb.mxu3 %v4833_v13  ;;  %2347 = vmatpush.bf16.msra.mxu0 %v4834_v28 }
 0x7b6   :  { %2286 = vmatpush.bf16.msrb.mxu3 %v4835_v39  ;;  %2348 = vmatpush.bf16.msra.mxu0 %v4836_v22 }
 0x7ba   :  { %2287 = vmatpush.bf16.msrb.mxu3 %v4837_v7  ;;  %2349 = vmatpush.bf16.msra.mxu0 %v4838_v42  ;;  %v4845_v7 = vld [vmem:[#allocation47_spill] sm:$0xff] }
 0x7bb   :  { %v642_v1 = vadd.f32 %v4845_v7, %v4844_v57 }
 0x7be   :  { %2288 = vmatpush.bf16.msrb.mxu3 %v4839_v20  ;;  %2350 = vmatpush.bf16.msra.mxu0 %v4840_v38  ;;  %v671_v20 = vadd.f32 %v4846_v19, %v642_v1  ;;  %v4847_v38 = vld [vmem:[#allocation31_spill] sm:$0xff]  ;;  %v4850_v1 = vld [vmem:[#allocation61_spill] sm:$0xff] }
 0x7bf   :  { %v584_v48 = vadd.f32 %v4848_v16, %v4847_v38 }
 0x7fd   :  { %v2066_v8 = vpop.f32.mrf.mxu0 }
 0x7fe   :  { %v2079_v13 = vpop.f32.mrf.mxu1  ;;  %v2123_v41 = vadd.f32 %v2066_v8, %v671_v20 }
 0x7ff   :  { %v4457_v28 = vadd.f32 %v2079_v13, %v729_v33  ;;  %v613_v13 = vadd.f32 %v4849_v46, %v584_v48  ;;  %v4851_v46 = vld [vmem:[#allocation56_spill] sm:$0xff]  ;;  %v4852_v48 = vld [vmem:[#allocation71_spill] sm:$0xff] }
 0x803   :  { %v2053_v39 = vpop.f32.mrf.mxu3 }
 0x804   :  { %v2092_v29 = vpop.f32.mrf.mxu2  ;;  %v2122_v6 = vadd.f32 %v2053_v39, %v613_v13  ;;  %v758_v39 = vadd.f32 %v4852_v48, %v4851_v46 }
 0x805   :  { %v2068_v22 = vpop.f32.mrf.mxu0 }
 0x806   :  { %v2081_v42 = vpop.f32.mrf.mxu1 }
 0x80b   :  { %v2055_v5 = vpop.f32.mrf.mxu3 }
 0x80c   :  { %v2094_v54 = vpop.f32.mrf.mxu2  ;;  %v3586_v5 = vmov 5  }
 0x80d   :  { %v2118_v62 = vpop.f32.mrf.mxu0  ;;  %3266 = vset.pattern.permute.xlu2 %v3586_v5 }
 0x80e   :  { %v2146_v14 = vadd.f32 %v2123_v41, %v2118_v62  ;;  %2206 = vperm.xlu2 %3266, %v4850_v1  }
 0x810   :  { %v3104_v33 = vmul.f32 -1.442695, %v2146_v14 }
 0x812   :  { %3340 = vpow2.f32 %v3104_v33 }
 0x813   :  { %v2105_v22 = vpop.f32.mrf.mxu3 }
 0x814   :  { %v2126_v24 = vadd.f32 %v2122_v6, %v2105_v22 }
 0x815   :  { %v2120_v0 = vpop.f32.mrf.mxu0 }
 0x816   :  { %v3103_v7 = vmul.f32 -1.442695, %v2126_v24  ;;  %v4853_v0 = vld [vmem:[#allocation72_spill] sm:$0xff] }
 0x817   :  { %v787_v24 = vadd.f32 %v4853_v0, %v758_v39 }
 0x818   :  { %v3341_v42 = vpop.eup %3340  ;;  %3342 = vpow2.f32 %v3103_v7 }
 0x819   :  { %v2150_v19 = vadd.f32 1.0, %v3341_v42  ;;  %v2125_v13 = vadd.f32 %v2092_v29, %v787_v24 }
 0x81b   :  { %3344 = vrcp.f32 %v2150_v19  ;;  %v2107_v16 = vpop.f32.mrf.mxu3  ;;  %v2162_v7 = vand.u32 2147483648, %v2150_v19  ;;  %vm2156_vm13 = vweird.f32 %v2150_v19  ;;  %v2160_v42 = vand.u32 2147483647, %v2150_v19 }
 0x81d   :  { %vm2161_vm0 = vcmp.eq.f32.partialorder %v2160_v42, 8.507059e+37 }
 0x81e   :  { %v3343_v20 = vpop.eup %3342 }
 0x81f   :  { %v2130_v54 = vadd.f32 1.0, %v3343_v20 }
 0x821   :  { %v3345_v8 = vpop.eup %3344  ;;  %3346 = vrcp.f32 %v2130_v54  ;;  %v2142_v16 = vand.u32 2147483648, %v2130_v54  ;;  %v2140_v46 = vand.u32 2147483647, %v2130_v54  ;;  %vm2136_vm1 = vweird.f32 %v2130_v54 }
 0x822   :  { %v2152_v41 = vmul.f32 %v3345_v8, %v2150_v19  ;;  %vm2157_vm12 = vweird.f32 %v3345_v8  ;;  %3348 = vtanh.f32 %v2125_v13 }
 0x823   :  { %vm2158_vm14 = vmor %vm2156_vm13, %vm2157_vm12  ;;  %v2143_v29 = vor.u32 1.1754944e-38, %v2142_v16  ;;  %vm2141_vm3 = vcmp.eq.f32.partialorder %v2140_v46, 8.507059e+37 }
 0x824   :  { %v2153_v6 = vsub.f32 1.0, %v2152_v41  ;;  %v2163_v41 = vor.u32 1.1754944e-38, %v2162_v7 }
 0x826   :  { %v2154_v62 = vmul.f32 %v3345_v8, %v2153_v6 }
 0x827   :  { %v3347_v14 = vpop.eup %3346 }
 0x828   :  { %v2155_v33 = vadd.f32 %v3345_v8, %v2154_v62  ;;  %v2132_v22 = vmul.f32 %v3347_v14, %v2130_v54  ;;  %vm2137_vm15 = vweird.f32 %v3347_v14  ;;  %v3349_v24 = vpop.eup %3348 }
 0x829   :  { %vm2138_vm2 = vmor %vm2136_vm1, %vm2137_vm15 }
 0x82a   :  { %v2133_v5 = vsub.f32 1.0, %v2132_v22  ;;  %v2159_v20 = vsel %vm2158_vm14, %v3345_v8, %v2155_v33 }
 0x82b   :  { %v2164_v6 = vsel %vm2161_vm0, %v2163_v41, %v2159_v20 }
 0x82c   :  { %v2134_v48 = vmul.f32 %v3347_v14, %v2133_v5  ;;  %v2167_v19 = vmul.f32 %v2164_v6, %v4389_v61  ;;  %v4875_v6 = vld [vmem:[#allocation52_spill] sm:$0xff] }
 0x82e   :  { %v2135_v39 = vadd.f32 %v3347_v14, %v2134_v48 }
 0x830   :  { %v2139_v0 = vsel %vm2138_vm2, %v3347_v14, %v2135_v39 }
 0x831   :  { %v2144_v62 = vsel %vm2141_vm3, %v2143_v29, %v2139_v0 }
 0x832   :  { %v2168_v13 = vmul.f32 %v3349_v24, %v2144_v62 }
 0x834   :  { %v4470_v22 = vadd.f32 %v2168_v13, %v2167_v19 }
 0x836   :  { %v2170_v8 = vpack.c.bf16 %v4470_v22, %v4470_v22 }
 0x838   :  { %2179 = vmatmul.bf16.vlgmr.msra.gmra.mxu1 %v2170_v8 }
 0x839   :  { %2388 = vmatpush.bf16.msra.mxu1 %v3672_v23 }
 0x83d   :  { %2389 = vmatpush.bf16.msra.mxu1 %v3677_v31 }
 0x841   :  { %2390 = vmatpush.bf16.msra.mxu1 %v3692_v44 }
 0x845   :  { %2391 = vmatpush.bf16.msra.mxu1 %v3697_v53 }
 0x849   :  { %2392 = vmatpush.bf16.msra.mxu1 %v3713_v63 }
 0x84d   :  { %2393 = vmatpush.bf16.msra.mxu1 %v3724_v10 }
 0x851   :  { %2394 = vmatpush.bf16.msra.mxu1 %v3735_v26 }
 0x855   :  { %2395 = vmatpush.bf16.msra.mxu1 %v3751_v45 }
 0x8b5   :  { %v2180_v61 = vpop.f32.mrf.mxu1 }
 0x8b6   :  { %v2184_v54 = vadd.f32 %v2180_v61, %v4457_v28  ;;  %v2207_v28 = vpop.permute.xlu2 %2206  ;;  %v3587_v61 = vmov 6  }
 0x8b7   :  { %3267 = vset.pattern.permute.xlu1 %v3587_v61  ;;  %v4879_v61 = vld [vmem:[#allocation76_spill] sm:$0xff] }
 0x8b8   :  { %v3105_v46 = vmul.f32 -1.442695, %v2184_v54  ;;  %2378 = vperm.xlu1 %3267, %v4850_v1  }
 0x8ba   :  { %3350 = vpow2.f32 %v3105_v46 }
 0x8bd   :  { %v2182_v23 = vpop.f32.mrf.mxu1 }
 0x8c0   :  { %v3351_v14 = vpop.eup %3350 }
 0x8c1   :  { %v2188_v31 = vadd.f32 1.0, %v3351_v14 }
 0x8c3   :  { %3352 = vrcp.f32 %v2188_v31  ;;  %v2200_v7 = vand.u32 2147483648, %v2188_v31  ;;  %v2198_v10 = vand.u32 2147483647, %v2188_v31  ;;  %vm2194_vm5 = vweird.f32 %v2188_v31 }
 0x8c5   :  { %v2201_v26 = vor.u32 1.1754944e-38, %v2200_v7  ;;  %vm2199_vm7 = vcmp.eq.f32.partialorder %v2198_v10, 8.507059e+37 }
 0x8c9   :  { %v3353_v44 = vpop.eup %3352 }
 0x8ca   :  { %v2190_v33 = vmul.f32 %v3353_v44, %v2188_v31  ;;  %vm2195_vm4 = vweird.f32 %v3353_v44 }
 0x8cb   :  { %vm2196_vm6 = vmor %vm2194_vm5, %vm2195_vm4 }
 0x8cc   :  { %v2191_v53 = vsub.f32 1.0, %v2190_v33 }
 0x8ce   :  { %v2192_v63 = vmul.f32 %v3353_v44, %v2191_v53  ;;  %v4876_v53 = vld [vmem:[#allocation77_spill] sm:$0xff] }
 0x8d0   :  { %v2193_v42 = vadd.f32 %v3353_v44, %v2192_v63 }
 0x8d2   :  { %v2197_v45 = vsel %vm2196_vm6, %v3353_v44, %v2193_v42 }
 0x8d3   :  { %v2202_v5 = vsel %vm2199_vm7, %v2201_v26, %v2197_v45 }
 0x8d4   :  { %v2204_v16 = vmul.f32 %v2202_v5, %v4470_v22 }
 0x8d6   :  { %v2209_v20 = vmul.f32 %v2207_v28, %v2204_v16  ;;  %v2215_v48 = vpack.c.bf16 %v2204_v16, %v2204_v16 }
 0x8d8   :  { %v4485_v41 = vadd.f32 %v2209_v20, %v4404_v50  ;;  %2224 = vmatmul.bf16.vlgmr.msra.gmra.mxu2 %v2215_v48  ;;  %2237 = vmatmul.bf16.vlgmr.msra.gmra.mxu3 %v2215_v48  ;;  %v4874_v50 = vld [vmem:[#allocation49_spill] sm:$0xff] }
 0x8d9   :  { %2250 = vmatmul.bf16.vlgmr.msrb.gmra.mxu0 %v2215_v48  ;;  %2263 = vmatmul.bf16.vlgmr.msrb.gmra.mxu1 %v2215_v48 }
 0x8da   :  { %2401 = vmatpush.bf16.msra.mxu2 %v3674_v27  ;;  %2414 = vmatpush.bf16.msra.mxu3 %v3710_v59  ;;  %v4854_v27 = vld [vmem:[#allocation23_spill] sm:$0xff]  ;;  %v4859_v59 = vld [vmem:[#allocation21_spill] sm:$0xff] }
 0x8db   :  { %2427 = vmatpush.bf16.msrb.mxu0 %v3702_v56  ;;  %2440 = vmatpush.bf16.msrb.mxu1 %v3765_v30  ;;  %v4858_v56 = vld [vmem:[#allocation57_spill] sm:$0xff]  ;;  %v4872_v30 = vld [vmem:[#allocation60_spill] sm:$0xff] }
 0x8de   :  { %2402 = vmatpush.bf16.msra.mxu2 %v3680_v32  ;;  %2415 = vmatpush.bf16.msra.mxu3 %v3718_v4  ;;  %v4855_v32 = vld [vmem:[#allocation20_spill] sm:$0xff]  ;;  %v4861_v4 = vld [vmem:[#allocation22_spill] sm:$0xff] }
 0x8df   :  { %2428 = vmatpush.bf16.msrb.mxu0 %v3721_v47  ;;  %2441 = vmatpush.bf16.msrb.mxu1 %v3776_v12  ;;  %v4862_v47 = vld [vmem:[#allocation35_spill] sm:$0xff]  ;;  %v4873_v12 = vld [vmem:[#allocation73_spill] sm:$0xff] }
 0x8e2   :  { %2403 = vmatpush.bf16.msra.mxu2 %v3694_v49  ;;  %2416 = vmatpush.bf16.msra.mxu3 %v3730_v15  ;;  %v4856_v49 = vld [vmem:[#allocation24_spill] sm:$0xff] }
 0x8e3   :  { %2429 = vmatpush.bf16.msrb.mxu0 %v3732_v21  ;;  %2442 = vmatpush.bf16.msrb.mxu1 %v3788_v43  ;;  %v4864_v15 = vld [vmem:[#allocation36_spill] sm:$0xff]  ;;  %v4865_v21 = vld [vmem:[#allocation26_spill] sm:$0xff] }
 0x8e6   :  { %2404 = vmatpush.bf16.msra.mxu2 %v3700_v55  ;;  %2417 = vmatpush.bf16.msra.mxu3 %v3742_v36  ;;  %v4857_v55 = vld [vmem:[#allocation29_spill] sm:$0xff]  ;;  %v4867_v36 = vld [vmem:[#allocation27_spill] sm:$0xff] }
 0x8e7   :  { %2430 = vmatpush.bf16.msrb.mxu0 %v3744_v37  ;;  %2443 = vmatpush.bf16.msrb.mxu1 %v3800_v2  ;;  %v4868_v37 = vld [vmem:[#allocation34_spill] sm:$0xff] }
 0x8e8   :  { %2276 = vmatmul.bf16.vlgmr.msrb.gmra.mxu2 %v2170_v8  ;;  %2289 = vmatmul.bf16.vlgmr.msrb.gmra.mxu3 %v2170_v8 }
 0x8ea   :  { %2405 = vmatpush.bf16.msra.mxu2 %v3716_v3  ;;  %2418 = vmatpush.bf16.msra.mxu3 %v3757_v52  ;;  %v4860_v3 = vld [vmem:[#allocation58_spill] sm:$0xff]  ;;  %v4870_v52 = vld [vmem:[#allocation59_spill] sm:$0xff] }
 0x8eb   :  { %2431 = vmatpush.bf16.msrb.mxu0 %v3761_v60  ;;  %2444 = vmatpush.bf16.msrb.mxu1 %v3811_v17  ;;  %v4871_v60 = vld [vmem:[#allocation30_spill] sm:$0xff] }
 0x8ee   :  { %2406 = vmatpush.bf16.msra.mxu2 %v3726_v11  ;;  %2419 = vmatpush.bf16.msra.mxu3 %v3770_v34  ;;  %v4863_v11 = vld [vmem:[#allocation25_spill] sm:$0xff] }
 0x8ef   :  { %2432 = vmatpush.bf16.msrb.mxu0 %v3774_v9  ;;  %2445 = vmatpush.bf16.msrb.mxu1 %v3819_v18 }
 0x8f2   :  { %2407 = vmatpush.bf16.msra.mxu2 %v3738_v35  ;;  %2420 = vmatpush.bf16.msra.mxu3 %v3781_v25  ;;  %v4866_v35 = vld [vmem:[#allocation33_spill] sm:$0xff] }
 0x8f3   :  { %2433 = vmatpush.bf16.msrb.mxu0 %v3784_v40  ;;  %2446 = vmatpush.bf16.msrb.mxu1 %v3826_v58 }
 0x8f6   :  { %2408 = vmatpush.bf16.msra.mxu2 %v3755_v51  ;;  %2421 = vmatpush.bf16.msra.mxu3 %v4854_v27  ;;  %v4869_v51 = vld [vmem:[#allocation28_spill] sm:$0xff] }
 0x8f7   :  { %2434 = vmatpush.bf16.msrb.mxu0 %v4856_v49  ;;  %2447 = vmatpush.bf16.msrb.mxu1 %v4857_v55 }
 0x8fa   :  { %2453 = vmatpush.bf16.msrb.mxu2 %v4855_v32  ;;  %2515 = vmatpush.bf16.msrb.mxu3 %v4858_v56 }
 0x8fe   :  { %2454 = vmatpush.bf16.msrb.mxu2 %v4859_v59  ;;  %2516 = vmatpush.bf16.msrb.mxu3 %v4860_v3 }
 0x902   :  { %2455 = vmatpush.bf16.msrb.mxu2 %v4861_v4  ;;  %2517 = vmatpush.bf16.msrb.mxu3 %v4862_v47 }
 0x906   :  { %2456 = vmatpush.bf16.msrb.mxu2 %v4863_v11  ;;  %2518 = vmatpush.bf16.msrb.mxu3 %v4864_v15 }
 0x90a   :  { %2457 = vmatpush.bf16.msrb.mxu2 %v4865_v21  ;;  %2519 = vmatpush.bf16.msrb.mxu3 %v4866_v35 }
 0x90e   :  { %2458 = vmatpush.bf16.msrb.mxu2 %v4867_v36  ;;  %2520 = vmatpush.bf16.msrb.mxu3 %v4868_v37 }
 0x912   :  { %2459 = vmatpush.bf16.msrb.mxu2 %v4869_v51  ;;  %2521 = vmatpush.bf16.msrb.mxu3 %v4870_v52 }
 0x916   :  { %2460 = vmatpush.bf16.msrb.mxu2 %v4871_v60  ;;  %2522 = vmatpush.bf16.msrb.mxu3 %v4872_v30 }
 0x956   :  { %v2251_v34 = vpop.f32.mrf.mxu0  ;;  %v2264_v9 = vpop.f32.mrf.mxu1 }
 0x957   :  { %v4536_v25 = vadd.f32 %v2251_v34, %v4873_v12  ;;  %v2297_v7 = vadd.f32 %v2264_v9, %v4876_v53  ;;  %v4881_v53 = vld [vmem:[#allocation51_spill] sm:$0xff] }
 0x95b   :  { %v2225_v40 = vpop.f32.mrf.mxu2  ;;  %v2238_v43 = vpop.f32.mrf.mxu3 }
 0x95c   :  { %v2294_v39 = vadd.f32 %v2225_v40, %v4874_v50  ;;  %v2295_v29 = vadd.f32 %v2238_v43, %v4875_v6 }
 0x95e   :  { %v2253_v2 = vpop.f32.mrf.mxu0  ;;  %v2266_v17 = vpop.f32.mrf.mxu1 }
 0x963   :  { %v2227_v18 = vpop.f32.mrf.mxu2  ;;  %v2240_v58 = vpop.f32.mrf.mxu3 }
 0x96b   :  { %v2277_v0 = vpop.f32.mrf.mxu2  ;;  %v2290_v24 = vpop.f32.mrf.mxu3 }
 0x96c   :  { %v2298_v62 = vadd.f32 %v2294_v39, %v2277_v0  ;;  %v2318_v19 = vadd.f32 %v2295_v29, %v2290_v24 }
 0x96e   :  { %v3106_v13 = vmul.f32 -1.442695, %v2298_v62  ;;  %v3107_v8 = vmul.f32 -1.442695, %v2318_v19  ;;  %v4877_v19 = vld [vmem:[#allocation53_spill] sm:$0xff] }
 0x970   :  { %3354 = vpow2.f32 %v3106_v13  ;;  %v4878_v13 = vld [vmem:[#allocation75_spill] sm:$0xff] }
 0x971   :  { %3356 = vpow2.f32 %v3107_v8  ;;  %v705_v8 = vadd.f32 %v4878_v13, %v4877_v19 }
 0x973   :  { %v2279_v54 = vpop.f32.mrf.mxu2  ;;  %v2292_v46 = vpop.f32.mrf.mxu3 }
 0x974   :  { %v734_v54 = vadd.f32 %v4879_v61, %v705_v8 }
 0x976   :  { %v3355_v23 = vpop.eup %3354 }
 0x977   :  { %v3357_v14 = vpop.eup %3356  ;;  %v2302_v31 = vadd.f32 1.0, %v3355_v23 }
 0x978   :  { %v2322_v44 = vadd.f32 1.0, %v3357_v14 }
 0x979   :  { %3358 = vrcp.f32 %v2302_v31  ;;  %v2314_v45 = vand.u32 2147483648, %v2302_v31  ;;  %v2312_v16 = vand.u32 2147483647, %v2302_v31  ;;  %vm2308_vm10 = vweird.f32 %v2302_v31 }
 0x97a   :  { %3360 = vrcp.f32 %v2322_v44  ;;  %v2334_v20 = vand.u32 2147483648, %v2322_v44  ;;  %v2332_v27 = vand.u32 2147483647, %v2322_v44  ;;  %vm2328_vm12 = vweird.f32 %v2322_v44 }
 0x97b   :  { %3362 = vtanh.f32 %v2297_v7  ;;  %v2315_v49 = vor.u32 1.1754944e-38, %v2314_v45  ;;  %vm2313_vm13 = vcmp.eq.f32.partialorder %v2312_v16, 8.507059e+37  ;;  %v4883_v16 = vld [vmem:[#allocation55_spill] sm:$0xff] }
 0x97c   :  { %v2335_v59 = vor.u32 1.1754944e-38, %v2334_v20  ;;  %vm2333_vm15 = vcmp.eq.f32.partialorder %v2332_v27, 8.507059e+37 }
 0x97f   :  { %v3359_v33 = vpop.eup %3358 }
 0x980   :  { %v3361_v63 = vpop.eup %3360  ;;  %v2304_v10 = vmul.f32 %v3359_v33, %v2302_v31  ;;  %vm2309_vm8 = vweird.f32 %v3359_v33 }
 0x981   :  { %v2324_v42 = vmul.f32 %v3361_v63, %v2322_v44  ;;  %vm2329_vm9 = vweird.f32 %v3361_v63  ;;  %vm2310_vm11 = vmor %vm2308_vm10, %vm2309_vm8  ;;  %v3363_v3 = vpop.eup %3362 }
 0x982   :  { %v2305_v26 = vsub.f32 1.0, %v2304_v10  ;;  %vm2330_vm14 = vmor %vm2328_vm12, %vm2329_vm9  ;;  %v4882_v10 = vld [vmem:[#allocation54_spill] sm:$0xff] }
 0x983   :  { %v2325_v28 = vsub.f32 1.0, %v2324_v42  ;;  %v647_v42 = vadd.f32 %v4882_v10, %v4844_v57  ;;  %v4884_v57 = vld [vmem:[#allocation56_spill] sm:$0xff] }
 0x984   :  { %v2306_v5 = vmul.f32 %v3359_v33, %v2305_v26 }
 0x985   :  { %v2326_v48 = vmul.f32 %v3361_v63, %v2325_v28  ;;  %v676_v20 = vadd.f32 %v4883_v16, %v647_v42 }
 0x986   :  { %v2307_v32 = vadd.f32 %v3359_v33, %v2306_v5 }
 0x987   :  { %v2327_v55 = vadd.f32 %v3361_v63, %v2326_v48 }
 0x988   :  { %v2311_v56 = vsel %vm2310_vm11, %v3359_v33, %v2307_v32 }
 0x989   :  { %v2316_v4 = vsel %vm2313_vm13, %v2315_v49, %v2311_v56  ;;  %v2331_v47 = vsel %vm2330_vm14, %v3361_v63, %v2327_v55 }
 0x98a   :  { %v2336_v11 = vsel %vm2333_vm15, %v2335_v59, %v2331_v47  ;;  %v2340_v15 = vmul.f32 %v3363_v3, %v2316_v4  ;;  %v3588_v3 = vmov 7   ;;  %v4885_v4 = vld [vmem:[#allocation80_spill] sm:$0xff] }
 0x98b   :  { %v2339_v21 = vmul.f32 %v2336_v11, %v4470_v22  ;;  %3268 = vset.pattern.permute.xlu2 %v3588_v3  ;;  %3269 = vset.pattern.permute.xlu0 %v3588_v3  ;;  %v763_v47 = vadd.f32 %v4885_v4, %v4884_v57 }
 0x98c   :  { %2550 = vperm.xlu2 %3268, %v4850_v1  }
 0x98d   :  { %v4543_v35 = vadd.f32 %v2340_v15, %v2339_v21  ;;  %v4886_v21 = vld [vmem:[#allocation81_spill] sm:$0xff] }
 0x98f   :  { %v2342_v36 = vpack.c.bf16 %v4543_v35, %v4543_v35 }
 0x991   :  { %2351 = vmatmul.bf16.vlgmr.msra.gmra.mxu0 %v2342_v36 }
 0xa0e   :  { %v2352_v37 = vpop.f32.mrf.mxu0 }
 0xa0f   :  { %v2356_v51 = vadd.f32 %v2352_v37, %v4536_v25  ;;  %v2379_v25 = vpop.permute.xlu1 %2378 }
 0xa11   :  { %v3108_v52 = vmul.f32 -1.442695, %v2356_v51 }
 0xa13   :  { %3364 = vpow2.f32 %v3108_v52 }
 0xa16   :  { %v2354_v60 = vpop.f32.mrf.mxu0 }
 0xa19   :  { %v3365_v30 = vpop.eup %3364 }
 0xa1a   :  { %v2360_v34 = vadd.f32 1.0, %v3365_v30 }
 0xa1c   :  { %3366 = vrcp.f32 %v2360_v34  ;;  %v2372_v43 = vand.u32 2147483648, %v2360_v34  ;;  %v2370_v2 = vand.u32 2147483647, %v2360_v34  ;;  %vm2366_vm1 = vweird.f32 %v2360_v34 }
 0xa1e   :  { %v2373_v18 = vor.u32 1.1754944e-38, %v2372_v43  ;;  %vm2371_vm3 = vcmp.eq.f32.partialorder %v2370_v2, 8.507059e+37 }
 0xa22   :  { %v3367_v9 = vpop.eup %3366 }
 0xa23   :  { %v2362_v12 = vmul.f32 %v3367_v9, %v2360_v34  ;;  %vm2367_vm0 = vweird.f32 %v3367_v9 }
 0xa24   :  { %vm2368_vm2 = vmor %vm2366_vm1, %vm2367_vm0 }
 0xa25   :  { %v2363_v40 = vsub.f32 1.0, %v2362_v12 }
 0xa27   :  { %v2364_v22 = vmul.f32 %v3367_v9, %v2363_v40 }
 0xa29   :  { %v2365_v17 = vadd.f32 %v3367_v9, %v2364_v22 }
 0xa2b   :  { %v2369_v58 = vsel %vm2368_vm2, %v3367_v9, %v2365_v17 }
 0xa2c   :  { %v2374_v50 = vsel %vm2371_vm3, %v2373_v18, %v2369_v58 }
 0xa2d   :  { %v2376_v39 = vmul.f32 %v2374_v50, %v4543_v35 }
 0xa2f   :  { %v2381_v6 = vmul.f32 %v2379_v25, %v2376_v39  ;;  %v2387_v29 = vpack.c.bf16 %v2376_v39, %v2376_v39 }
 0xa31   :  { %v4550_v0 = vadd.f32 %v2381_v6, %v4485_v41  ;;  %2396 = vmatmul.bf16.vlgmr.msra.gmra.mxu1 %v2387_v29  ;;  %2409 = vmatmul.bf16.vlgmr.msra.gmra.mxu2 %v2387_v29  ;;  %v4880_v41 = vld [vmem:[#allocation50_spill] sm:$0xff] }
 0xa32   :  { %2422 = vmatmul.bf16.vlgmr.msra.gmra.mxu3 %v2387_v29  ;;  %2435 = vmatmul.bf16.vlgmr.msrb.gmra.mxu0 %v2387_v29  ;;  %v589_v44 = vadd.f32 %v4880_v41, %v4847_v38 }
 0xa34   :  { %v618_v7 = vadd.f32 %v4881_v53, %v589_v44 }
 0xa41   :  { %2448 = vmatmul.bf16.vlgmr.msrb.gmra.mxu1 %v2342_v36  ;;  %2461 = vmatmul.bf16.vlgmr.msrb.gmra.mxu2 %v2342_v36  ;;  %v792_v36 = vadd.f32 %v4886_v21, %v763_v47 }
 0xaae   :  { %v2397_v24 = vpop.f32.mrf.mxu1 }
 0xaaf   :  { %v2436_v62 = vpop.f32.mrf.mxu0  ;;  %v2466_v26 = vadd.f32 %v2397_v24, %v618_v7 }
 0xab0   :  { %v2469_v52 = vadd.f32 %v2436_v62, %v792_v36 }
 0xab4   :  { %v2410_v46 = vpop.f32.mrf.mxu2 }
 0xab5   :  { %v2423_v23 = vpop.f32.mrf.mxu3  ;;  %v2467_v27 = vadd.f32 %v2410_v46, %v676_v20 }
 0xab6   :  { %v4555_v14 = vadd.f32 %v2423_v23, %v734_v54  ;;  %v2399_v31 = vpop.f32.mrf.mxu1 }
 0xab7   :  { %v2438_v33 = vpop.f32.mrf.mxu0 }
 0xabc   :  { %v2412_v63 = vpop.f32.mrf.mxu2 }
 0xabd   :  { %v2425_v45 = vpop.f32.mrf.mxu3 }
 0xabe   :  { %v2449_v28 = vpop.f32.mrf.mxu1 }
 0xabf   :  { %v2470_v5 = vadd.f32 %v2466_v26, %v2449_v28 }
 0xac1   :  { %v3109_v48 = vmul.f32 -1.442695, %v2470_v5 }
 0xac3   :  { %3368 = vpow2.f32 %v3109_v48 }
 0xac4   :  { %v2462_v32 = vpop.f32.mrf.mxu2 }
 0xac5   :  { %v2490_v49 = vadd.f32 %v2467_v27, %v2462_v32 }
 0xac6   :  { %v2451_v55 = vpop.f32.mrf.mxu1 }
 0xac7   :  { %v3110_v38 = vmul.f32 -1.442695, %v2490_v49 }
 0xac9   :  { %v3369_v56 = vpop.eup %3368  ;;  %3370 = vpow2.f32 %v3110_v38 }
 0xaca   :  { %v2474_v59 = vadd.f32 1.0, %v3369_v56 }
 0xacc   :  { %3372 = vrcp.f32 %v2474_v59  ;;  %v2464_v11 = vpop.f32.mrf.mxu2  ;;  %v2486_v34 = vand.u32 2147483648, %v2474_v59  ;;  %v2484_v12 = vand.u32 2147483647, %v2474_v59  ;;  %vm2480_vm5 = vweird.f32 %v2474_v59 }
 0xace   :  { %v2487_v22 = vor.u32 1.1754944e-38, %v2486_v34  ;;  %vm2485_vm7 = vcmp.eq.f32.partialorder %v2484_v12, 8.507059e+37 }
 0xacf   :  { %v3371_v15 = vpop.eup %3370 }
 0xad0   :  { %v2494_v37 = vadd.f32 1.0, %v3371_v15 }
 0xad2   :  { %v3373_v51 = vpop.eup %3372  ;;  %3374 = vrcp.f32 %v2494_v37  ;;  %v2506_v58 = vand.u32 2147483648, %v2494_v37  ;;  %v2504_v39 = vand.u32 2147483647, %v2494_v37  ;;  %vm2500_vm9 = vweird.f32 %v2494_v37 }
 0xad3   :  { %v2476_v60 = vmul.f32 %v3373_v51, %v2474_v59  ;;  %3376 = vtanh.f32 %v2469_v52  ;;  %vm2481_vm4 = vweird.f32 %v3373_v51 }
 0xad4   :  { %vm2482_vm6 = vmor %vm2480_vm5, %vm2481_vm4  ;;  %v2507_v24 = vor.u32 1.1754944e-38, %v2506_v58  ;;  %vm2505_vm11 = vcmp.eq.f32.partialorder %v2504_v39, 8.507059e+37 }
 0xad5   :  { %v2477_v30 = vsub.f32 1.0, %v2476_v60 }
 0xad7   :  { %v2478_v9 = vmul.f32 %v3373_v51, %v2477_v30 }
 0xad8   :  { %v3375_v1 = vpop.eup %3374 }
 0xad9   :  { %v2479_v40 = vadd.f32 %v3373_v51, %v2478_v9  ;;  %v2496_v43 = vmul.f32 %v3375_v1, %v2494_v37  ;;  %v3377_v18 = vpop.eup %3376  ;;  %vm2501_vm8 = vweird.f32 %v3375_v1 }
 0xada   :  { %vm2502_vm10 = vmor %vm2500_vm9, %vm2501_vm8 }
 0xadb   :  { %v2483_v2 = vsel %vm2482_vm6, %v3373_v51, %v2479_v40  ;;  %v2497_v17 = vsub.f32 1.0, %v2496_v43 }
 0xadc   :  { %v2488_v25 = vsel %vm2485_vm7, %v2487_v22, %v2483_v2 }
 0xadd   :  { %v2498_v50 = vmul.f32 %v3375_v1, %v2497_v17  ;;  %v2512_v6 = vmul.f32 %v3377_v18, %v2488_v25 }
 0xadf   :  { %v2499_v29 = vadd.f32 %v3375_v1, %v2498_v50 }
 0xae1   :  { %v2503_v62 = vsel %vm2502_vm10, %v3375_v1, %v2499_v29 }
 0xae2   :  { %v2508_v19 = vsel %vm2505_vm11, %v2507_v24, %v2503_v62 }
 0xae3   :  { %v2511_v13 = vmul.f32 %v2508_v19, %v4543_v35 }
 0xae5   :  { %v2513_v8 = vadd.f32 %v2512_v6, %v2511_v13 }
 0xae7   :  { %v2514_v61 = vpack.c.bf16 %v2513_v8, %v2513_v8 }
 0xae9   :  { %2523 = vmatmul.bf16.vlgmr.msrb.gmra.mxu3 %v2514_v61 }
 0xb6c   :  { %v2524_v54 = vpop.f32.mrf.mxu3 }
 0xb6d   :  { %v2528_v46 = vadd.f32 %v2524_v54, %v4555_v14  ;;  %v2551_v14 = vpop.permute.xlu2 %2550 }
 0xb6f   :  { %v3111_v23 = vmul.f32 -1.442695, %v2528_v46 }
 0xb71   :  { %3378 = vpow2.f32 %v3111_v23 }
 0xb74   :  { %v2526_v31 = vpop.f32.mrf.mxu3 }
 0xb77   :  { %v3379_v41 = vpop.eup %3378 }
 0xb78   :  { %v2532_v44 = vadd.f32 1.0, %v3379_v41 }
 0xb7a   :  { %3380 = vrcp.f32 %v2532_v44  ;;  %v2544_v63 = vand.u32 2147483648, %v2532_v44  ;;  %v2542_v42 = vand.u32 2147483647, %v2532_v44  ;;  %vm2538_vm13 = vweird.f32 %v2532_v44 }
 0xb7c   :  { %v2545_v26 = vor.u32 1.1754944e-38, %v2544_v63  ;;  %vm2543_vm15 = vcmp.eq.f32.partialorder %v2542_v42, 8.507059e+37 }
 0xb80   :  { %v3381_v33 = vpop.eup %3380 }
 0xb81   :  { %v2534_v53 = vmul.f32 %v3381_v33, %v2532_v44  ;;  %vm2539_vm12 = vweird.f32 %v3381_v33 }
 0xb82   :  { %vm2540_vm14 = vmor %vm2538_vm13, %vm2539_vm12 }
 0xb83   :  { %v2535_v7 = vsub.f32 1.0, %v2534_v53 }
 0xb85   :  { %v2536_v10 = vmul.f32 %v3381_v33, %v2535_v7 }
 0xb87   :  { %v2537_v35 = vadd.f32 %v3381_v33, %v2536_v10 }
 0xb89   :  { %v2541_v45 = vsel %vm2540_vm14, %v3381_v33, %v2537_v35 }
 0xb8a   :  { %v2546_v28 = vsel %vm2543_vm15, %v2545_v26, %v2541_v45 }
 0xb8b   :  { %v2548_v5 = vmul.f32 %v2546_v28, %v2513_v8 }
 0xb8d   :  { %v2553_v16 = vmul.f32 %v2551_v14, %v2548_v5 }
 0xb8f   :  { %v2554_v20 = vadd.f32 %v2553_v16, %v4550_v0 }
 0xb91   :  { %2555 = vst [vmem:[#allocation14] sm:$0xff] %v2554_v20 }
 0xb92   :  { %2566 = dma.vmem_to_hbm [thread:$0]  %s2562_s29, 128, %s2564_s13, [#allocation5]  }
 0xb93   :  { %3567 = dma.done.wait [#allocation5], 128  }
 0xb94   :  { %3568 = vsyncadd [#allocation5], 4294967168 }
 0xb95   :  { %2571 = vsyncpa [#allocation4], 1 }
 0xb96   :  { %2572 = vsyncpa [#allocation7], 1 }
 0xb97   :  { %2573 = vsyncpa [#allocation10], 1 }
 0xb98   :  { %2574 = vsyncpa [#allocation13], 1 }
 0xb99   :  { %2575 = vsyncpa [#allocation5], 1 }

</bundles_post_ra>
